<compile_context>
chip_gen: v7x
topology: tpu7x:2x2x1
jax: 0.10.0
libtpu: 0.0.40
codegen_flags: <defaults>
</compile_context>

<pallas_src>
import functools

import jax
import jax.numpy as jnp
from jax.experimental import pallas as pl
from jax.experimental.pallas import tpu as pltpu

EPS = 1e-5                     # PyTorch BatchNorm default eps
CPAD = 8                       # pad the 3-channel input K dim to 8
ROW_TILE_TARGET = 2048         # point-tile target (rows of the flattened input)
VMEM_LIMIT_BYTES = 32 * 1024 * 1024


# --------------------------------------------------------------------------
# tiling helper: tile is a multiple of 8, N padded up to a multiple of tile
# --------------------------------------------------------------------------
def _choose_tile(n, target=ROW_TILE_TARGET):
    """Returns (tile, n_tiles, n_padded) with tile % 8 == 0, small padding."""
    n_tiles = -(-n // target)                 # ceil
    tile = -(-n // n_tiles)                   # ceil
    tile = ((tile + 7) // 8) * 8              # sublane multiple
    return tile, n_tiles, n_tiles * tile


# --------------------------------------------------------------------------
# Fused conv-stack + max-over-points + FC-head kernel
# --------------------------------------------------------------------------
def _pointnet_stack_kernel(*refs, n_conv, conv_relu, per_batch_w0,
                           n_fc, fc_relu, do_log_softmax):
    # refs = [x, cw0, cb0, ..., fw0, fb0, ..., o_fc, acc_scratch]
    x_ref = refs[0]
    conv_refs = refs[1:1 + 2 * n_conv]
    fc_refs = refs[1 + 2 * n_conv:1 + 2 * n_conv + 2 * n_fc]
    o_ref = refs[-2]
    acc_ref = refs[-1]

    nt = pl.program_id(1)
    nt_last = pl.num_programs(1) - 1

    # ---- conv stack on this point tile (bf16 matmuls, f32 accumulation) ----
    h = x_ref[...]                                        # (TN, Cin) f32
    for li in range(n_conv):
        w_ref = conv_refs[2 * li]
        b_ref = conv_refs[2 * li + 1]
        w = w_ref[0] if (li == 0 and per_batch_w0) else w_ref[...]
        h = jnp.dot(h.astype(jnp.bfloat16), w.astype(jnp.bfloat16),
                    preferred_element_type=jnp.float32) + b_ref[...]
        if conv_relu[li]:
            h = jnp.maximum(h, 0.0)

    # ---- running max at sublane granularity (pure VPU per-tile update) ----
    tn, cout = h.shape
    part = jnp.max(h.reshape(tn // 8, 8, cout), axis=0)   # (8, cout)

    @pl.when(nt == 0)
    def _():
        acc_ref[...] = part

    @pl.when(nt > 0)
    def _():
        acc_ref[...] = jnp.maximum(acc_ref[...], part)

    # ---- epilogue: sublane collapse + FC head (+ log_softmax) ----
    @pl.when(nt == nt_last)
    def _():
        g = jnp.max(acc_ref[...], axis=0, keepdims=True)  # (1, cout)
        for li in range(n_fc):
            w_ref = fc_refs[2 * li]
            b_ref = fc_refs[2 * li + 1]
            g = jnp.dot(g.astype(jnp.bfloat16), w_ref[...].astype(jnp.bfloat16),
                        preferred_element_type=jnp.float32) + b_ref[...]
            if fc_relu[li]:
                g = jnp.maximum(g, 0.0)
        if do_log_softmax:
            m = jnp.max(g, axis=-1, keepdims=True)
            s = g - m
            lse = jnp.log(jnp.sum(jnp.exp(s), axis=-1, keepdims=True))
            g = s - lse
        o_ref[0] = g


def conv_fc_stack(x_flat, conv_layers, conv_relu, fc_layers, fc_relu,
                  B, n_pad, tile, *, per_batch_w0=False, do_log_softmax=False):
    """One fused pallas_call: [matmul+bias(+relu)]*Lc + max over points
    + [matmul+bias(+relu)]*Lf (+ log_softmax).

    x_flat:      (B*n_pad, Cin_pad) channels-last, flattened (padded) points.
    conv_layers: list of (w, b); layer 0 weight may be per-batch (B, Cin, C0).
    fc_layers:   list of (w, b) applied to the (1, Cout) max-pooled feature.
    Returns (B, fc_out).
    """
    M, cin = x_flat.shape
    assert M == B * n_pad and n_pad % tile == 0 and tile % 8 == 0
    NT = n_pad // tile
    cout = conv_layers[-1][0].shape[-1]
    fc_out = fc_layers[-1][0].shape[-1]

    single = pl.Buffered(1)   # constant blocks: no need for a 2nd pipeline buf

    inputs = [x_flat]
    in_specs = [pl.BlockSpec((tile, cin), lambda b, nt: (b * NT + nt, 0))]

    for li, (w, bias) in enumerate(conv_layers):
        if li == 0 and per_batch_w0:
            in_specs.append(pl.BlockSpec((1,) + w.shape[1:],
                                         lambda b, nt: (b, 0, 0)))
        else:
            in_specs.append(pl.BlockSpec(w.shape, lambda b, nt: (0, 0),
                                         pipeline_mode=single))
        in_specs.append(pl.BlockSpec((1, bias.shape[-1]), lambda b, nt: (0, 0),
                                     pipeline_mode=single))
        inputs.extend([w, bias.reshape(1, -1)])

    for (w, bias) in fc_layers:
        in_specs.append(pl.BlockSpec(w.shape, lambda b, nt: (0, 0),
                                     pipeline_mode=single))
        in_specs.append(pl.BlockSpec((1, bias.shape[-1]), lambda b, nt: (0, 0),
                                     pipeline_mode=single))
        inputs.extend([w, bias.reshape(1, -1)])

    out = pl.pallas_call(
        functools.partial(_pointnet_stack_kernel,
                          n_conv=len(conv_layers), conv_relu=tuple(conv_relu),
                          per_batch_w0=per_batch_w0,
                          n_fc=len(fc_layers), fc_relu=tuple(fc_relu),
                          do_log_softmax=do_log_softmax),
        out_shape=jax.ShapeDtypeStruct((B, 1, fc_out), jnp.float32),
        grid=(B, NT),
        in_specs=in_specs,
        out_specs=pl.BlockSpec((1, 1, fc_out), lambda b, nt: (b, 0, 0)),
        scratch_shapes=[pltpu.VMEM((8, cout), jnp.float32)],
        compiler_params=pltpu.CompilerParams(
            dimension_semantics=("parallel", "arbitrary"),
            vmem_limit_bytes=VMEM_LIMIT_BYTES),
    )(*inputs)
    return out.reshape(B, fc_out)


# --------------------------------------------------------------------------
# Deterministic parameter initialization (+ BN folding)
# --------------------------------------------------------------------------
def _init_lin(key, cin, cout):
    k1, k2 = jax.random.split(key)
    bound = 1.0 / (cin ** 0.5)
    w = jax.random.uniform(k1, (cin, cout), jnp.float32, -bound, bound)
    b = jax.random.uniform(k2, (cout,), jnp.float32, -bound, bound)
    return w, b


def _init_bn(key, c):
    k1, k2, k3, k4 = jax.random.split(key, 4)
    gamma = jax.random.uniform(k1, (c,), jnp.float32, 0.5, 1.5)
    beta = 0.1 * jax.random.normal(k2, (c,), jnp.float32)
    mean = 0.1 * jax.random.normal(k3, (c,), jnp.float32)
    var = jax.random.uniform(k4, (c,), jnp.float32, 0.5, 1.5)
    return gamma, beta, mean, var


def _fold_bn(w, b, bn):
    gamma, beta, mean, var = bn
    scale = gamma / jnp.sqrt(var + EPS)
    return w * scale[None, :], (b - mean) * scale + beta


def init_params(key, d=3, k=2):
    keys = iter(jax.random.split(key, 64))

    def layer(cin, cout, with_bn):
        w, b = _init_lin(next(keys), cin, cout)
        if with_bn:
            w, b = _fold_bn(w, b, _init_bn(next(keys), cout))
        return w, b

    params = {
        # STN(3): conv stack 3->64->128->1024 (all BN+ReLU)
        "stn_conv": [layer(d, 64, True), layer(64, 128, True),
                     layer(128, 1024, True)],
        # STN fc: 1024->512(BN,relu), 512->256(BN,relu), 256->d*d (plain)
        "stn_fc": [layer(1024, 512, True), layer(512, 256, True),
                   layer(256, d * d, False)],
        # feature extractor: 3->64->64->64->128->1024 (BN all; ReLU all but last)
        "feat_conv": [layer(d, 64, True), layer(64, 64, True),
                      layer(64, 64, True), layer(64, 128, True),
                      layer(128, 1024, True)],
        # classifier head: 1024->512(BN,relu), 512->256(BN,relu), 256->k
        "cls_fc": [layer(1024, 512, True), layer(512, 256, True),
                   layer(256, k, False)],
    }
    return params


def _bf16(layers):
    return [(w.astype(jnp.bfloat16), b) for (w, b) in layers]


# --------------------------------------------------------------------------
# Forward pass (tiny glue in JAX, all heavy compute in two fused Pallas calls)
# --------------------------------------------------------------------------
def pointnet_cls_forward(x_ncl, params, d=3, row_tile_target=ROW_TILE_TARGET):
    """x_ncl: (B, 3, N) float32, matching PyTorch Conv1d NCL layout."""
    B, C, N = x_ncl.shape
    assert C == d
    x = jnp.transpose(x_ncl, (0, 2, 1))                      # (B, N, d)

    tile, _, n_pad = _choose_tile(N, row_tile_target)
    if n_pad > N:
        # replicate the last point; duplicates never change the max over points
        x = jnp.pad(x, ((0, 0), (0, n_pad - N), (0, 0)), mode="edge")
    x_pad = jnp.pad(x, ((0, 0), (0, 0), (0, CPAD - d)))      # (B, n_pad, 8)
    x_flat = x_pad.reshape(B * n_pad, CPAD)

    # ---- STN(3): conv stack + maxpool + fc head in one pallas_call ----
    w1, b1 = params["stn_conv"][0]
    w1p = jnp.pad(w1, ((0, CPAD - d), (0, 0)))               # (8, 64) f32
    stn_conv = [(w1p, b1)] + _bf16(params["stn_conv"][1:])
    trans_flat = conv_fc_stack(x_flat, stn_conv, (True, True, True),
                               _bf16(params["stn_fc"]), (True, True, False),
                               B, n_pad, tile)               # (B, 9)
    iden = jnp.eye(d, dtype=jnp.float32).reshape(1, d * d)
    trans = (trans_flat + iden).reshape(B, d, d)             # (B, 3, 3)

    # ---- feature extractor + classifier head in one pallas_call ----
    # (x @ trans) @ W1 == x @ (trans @ W1): per-batch combined (3,64) weight.
    w1f, b1f = params["feat_conv"][0]
    comb = jnp.einsum("bij,jk->bik", trans, w1f)             # (B, d, 64), tiny
    comb_pad = jnp.pad(comb, ((0, 0), (0, CPAD - d), (0, 0)))  # (B, 8, 64) f32
    feat_conv = [(comb_pad, b1f)] + _bf16(params["feat_conv"][1:])
    logp = conv_fc_stack(x_flat, feat_conv,
                         (True, True, True, True, False),
                         _bf16(params["cls_fc"]), (True, True, False),
                         B, n_pad, tile,
                         per_batch_w0=True, do_log_softmax=True)  # (B, k)

    trans_feat = None  # feature_transform=False
    return logp, trans, trans_feat


# --------------------------------------------------------------------------
# Pure-JAX f32 reference (same folded eval-mode params) for validation
# --------------------------------------------------------------------------
def reference_forward(x_ncl, params, d=3):
    x = jnp.transpose(x_ncl, (0, 2, 1))                      # (B, N, d)
    B = x.shape[0]
    h = x
    for w, b in params["stn_conv"]:
        h = jnp.maximum(h @ w + b, 0.0)
    h = jnp.max(h, axis=1)
    for i, (w, b) in enumerate(params["stn_fc"]):
        h = h @ w + b
        if i < len(params["stn_fc"]) - 1:
            h = jnp.maximum(h, 0.0)
    trans = (h + jnp.eye(d, dtype=jnp.float32).reshape(1, d * d)).reshape(B, d, d)
    h = jnp.einsum("bnd,bde->bne", x, trans)
    for i, (w, b) in enumerate(params["feat_conv"]):
        h = h @ w + b
        if i < len(params["feat_conv"]) - 1:
            h = jnp.maximum(h, 0.0)
    h = jnp.max(h, axis=1)
    for i, (w, b) in enumerate(params["cls_fc"]):
        h = h @ w + b
        if i < len(params["cls_fc"]) - 1:
            h = jnp.maximum(h, 0.0)
    return jax.nn.log_softmax(h, axis=1), trans


# --------------------------------------------------------------------------
if __name__ == "__main__":
    key = jax.random.PRNGKey(0)
    kx, kp = jax.random.split(key)

    B, C, N, K_CLS = 2, 3, 16, 2
    x = jax.random.normal(kx, (B, C, N), jnp.float32)
    params = init_params(kp, d=3, k=K_CLS)

    fwd = jax.jit(lambda inp: pointnet_cls_forward(inp, params, d=3))
    logp, trans, trans_feat = fwd(x)
    jax.block_until_ready((logp, trans))

    assert logp.shape == (B, K_CLS)
    assert trans.shape == (B, 3, 3)
    assert trans_feat is None
    # log_softmax rows must exp-sum to 1 (independent of matmul precision)
    assert bool(jnp.allclose(jnp.sum(jnp.exp(logp), axis=1), 1.0, atol=1e-4))

    # validate against pure-JAX f32 reference (same folded eval-mode params).
    # Kernel matmuls use bf16 operands (f32 accumulation), so tolerances are
    # looser than the earlier all-f32 version.
    ref_logp, ref_trans = reference_forward(x, params, d=3)
    assert bool(jnp.allclose(trans, ref_trans, atol=1e-1, rtol=1e-1))
    assert bool(jnp.allclose(logp, ref_logp, atol=1e-1, rtol=1e-1))

    print("KERNEL_OK")
</pallas_src>

<mosaic_0001>
module attributes {stable_mosaic.version = 11 : i64} {
  func.func @_pointnet_stack_kernel(%arg0: i32, %arg1: i32, %arg2: memref<16x8xf32, #tpu.memory_space<vmem>>, %arg3: memref<8x64xf32, #tpu.memory_space<vmem>>, %arg4: memref<1x64xf32, #tpu.memory_space<vmem>>, %arg5: memref<64x128xbf16, #tpu.memory_space<vmem>>, %arg6: memref<1x128xf32, #tpu.memory_space<vmem>>, %arg7: memref<128x1024xbf16, #tpu.memory_space<vmem>>, %arg8: memref<1x1024xf32, #tpu.memory_space<vmem>>, %arg9: memref<1024x512xbf16, #tpu.memory_space<vmem>>, %arg10: memref<1x512xf32, #tpu.memory_space<vmem>>, %arg11: memref<512x256xbf16, #tpu.memory_space<vmem>>, %arg12: memref<1x256xf32, #tpu.memory_space<vmem>>, %arg13: memref<256x9xbf16, #tpu.memory_space<vmem>>, %arg14: memref<1x9xf32, #tpu.memory_space<vmem>>, %arg15: memref<1x1x9xf32, #tpu.memory_space<vmem>>, %arg16: memref<8x1024xf32, #tpu.memory_space<vmem>>) attributes {dimension_semantics = [#tpu.dimension_semantics<parallel>, #tpu.dimension_semantics<arbitrary>], iteration_bounds = array<i64: 2, 1>, scalar_prefetch = 0 : i64, scratch_operands = 1 : i64, tpu.core_type = #tpu.core_type<tc>, window_params = [{transform_indices = @transform_0, window_bounds = array<i64: 16, 8>}, {pipeline_mode = #tpu.pipeline_mode<synchronous>, transform_indices = @transform_1, window_bounds = array<i64: 8, 64>}, {pipeline_mode = #tpu.pipeline_mode<synchronous>, transform_indices = @transform_2, window_bounds = array<i64: 1, 64>}, {pipeline_mode = #tpu.pipeline_mode<synchronous>, transform_indices = @transform_3, window_bounds = array<i64: 64, 128>}, {pipeline_mode = #tpu.pipeline_mode<synchronous>, transform_indices = @transform_4, window_bounds = array<i64: 1, 128>}, {pipeline_mode = #tpu.pipeline_mode<synchronous>, transform_indices = @transform_5, window_bounds = array<i64: 128, 1024>}, {pipeline_mode = #tpu.pipeline_mode<synchronous>, transform_indices = @transform_6, window_bounds = array<i64: 1, 1024>}, {pipeline_mode = #tpu.pipeline_mode<synchronous>, transform_indices = @transform_7, window_bounds = array<i64: 1024, 512>}, {pipeline_mode = #tpu.pipeline_mode<synchronous>, transform_indices = @transform_8, window_bounds = array<i64: 1, 512>}, {pipeline_mode = #tpu.pipeline_mode<synchronous>, transform_indices = @transform_9, window_bounds = array<i64: 512, 256>}, {pipeline_mode = #tpu.pipeline_mode<synchronous>, transform_indices = @transform_10, window_bounds = array<i64: 1, 256>}, {pipeline_mode = #tpu.pipeline_mode<synchronous>, transform_indices = @transform_11, window_bounds = array<i64: 256, 9>}, {pipeline_mode = #tpu.pipeline_mode<synchronous>, transform_indices = @transform_12, window_bounds = array<i64: 1, 9>}, {transform_indices = @transform_13, window_bounds = array<i64: 1, 1, 9>}]} {
    %c0 = arith.constant 0 : index
    %c0_0 = arith.constant 0 : index
    %0 = vector.load %arg2[%c0, %c0_0] : memref<16x8xf32, #tpu.memory_space<vmem>>, vector<16x8xf32>
    %c0_1 = arith.constant 0 : index
    %c0_2 = arith.constant 0 : index
    %1 = vector.load %arg3[%c0_1, %c0_2] : memref<8x64xf32, #tpu.memory_space<vmem>>, vector<8x64xf32>
    %2 = arith.truncf %0 : vector<16x8xf32> to vector<16x8xbf16>
    %3 = arith.truncf %1 : vector<8x64xf32> to vector<8x64xbf16>
    %cst = arith.constant dense<0.000000e+00> : vector<16x64xf32>
    %4 = tpu.matmul %2, %3, %cst {dimension_numbers = #tpu.dot_dimension_numbers<[1], [0], [0], [1], [0, 0, 1, 1], [], []>} : vector<16x8xbf16>, vector<8x64xbf16>, vector<16x64xf32> -> vector<16x64xf32>
    %c0_3 = arith.constant 0 : index
    %c0_4 = arith.constant 0 : index
    %5 = vector.load %arg4[%c0_3, %c0_4] : memref<1x64xf32, #tpu.memory_space<vmem>>, vector<1x64xf32>
    %6 = vector.broadcast %5 : vector<1x64xf32> to vector<16x64xf32>
    %7 = arith.addf %4, %6 : vector<16x64xf32>
    %cst_5 = arith.constant 0.000000e+00 : f32
    %8 = vector.broadcast %cst_5 : f32 to vector<16x64xf32>
    %9 = arith.maximumf %7, %8 : vector<16x64xf32>
    %c0_6 = arith.constant 0 : index
    %c0_7 = arith.constant 0 : index
    %10 = vector.load %arg5[%c0_6, %c0_7] : memref<64x128xbf16, #tpu.memory_space<vmem>>, vector<64x128xbf16>
    %11 = arith.truncf %9 : vector<16x64xf32> to vector<16x64xbf16>
    %cst_8 = arith.constant dense<0.000000e+00> : vector<16x128xf32>
    %12 = tpu.matmul %11, %10, %cst_8 {dimension_numbers = #tpu.dot_dimension_numbers<[1], [0], [0], [1], [0, 0, 1, 1], [], []>} : vector<16x64xbf16>, vector<64x128xbf16>, vector<16x128xf32> -> vector<16x128xf32>
    %c0_9 = arith.constant 0 : index
    %c0_10 = arith.constant 0 : index
    %13 = vector.load %arg6[%c0_9, %c0_10] : memref<1x128xf32, #tpu.memory_space<vmem>>, vector<1x128xf32>
    %14 = vector.broadcast %13 : vector<1x128xf32> to vector<16x128xf32>
    %15 = arith.addf %12, %14 : vector<16x128xf32>
    %cst_11 = arith.constant 0.000000e+00 : f32
    %16 = vector.broadcast %cst_11 : f32 to vector<16x128xf32>
    %17 = arith.maximumf %15, %16 : vector<16x128xf32>
    %c0_12 = arith.constant 0 : index
    %c0_13 = arith.constant 0 : index
    %18 = vector.load %arg7[%c0_12, %c0_13] : memref<128x1024xbf16, #tpu.memory_space<vmem>>, vector<128x1024xbf16>
    %19 = arith.truncf %17 : vector<16x128xf32> to vector<16x128xbf16>
    %cst_14 = arith.constant dense<0.000000e+00> : vector<16x1024xf32>
    %20 = tpu.matmul %19, %18, %cst_14 {dimension_numbers = #tpu.dot_dimension_numbers<[1], [0], [0], [1], [0, 0, 1, 1], [], []>} : vector<16x128xbf16>, vector<128x1024xbf16>, vector<16x1024xf32> -> vector<16x1024xf32>
    %c0_15 = arith.constant 0 : index
    %c0_16 = arith.constant 0 : index
    %21 = vector.load %arg8[%c0_15, %c0_16] : memref<1x1024xf32, #tpu.memory_space<vmem>>, vector<1x1024xf32>
    %22 = vector.broadcast %21 : vector<1x1024xf32> to vector<16x1024xf32>
    %23 = arith.addf %20, %22 : vector<16x1024xf32>
    %cst_17 = arith.constant 0.000000e+00 : f32
    %24 = vector.broadcast %cst_17 : f32 to vector<16x1024xf32>
    %25 = arith.maximumf %23, %24 : vector<16x1024xf32>
    %26 = vector.shape_cast %25 : vector<16x1024xf32> to vector<2x8x1024xf32>
    %cst_18 = arith.constant dense<0xFF800000> : vector<8x1024xf32>
    %27 = vector.multi_reduction <maximumf>, %26, %cst_18 [0] : vector<2x8x1024xf32> to vector<8x1024xf32>
    %c0_i32 = arith.constant 0 : i32
    %28 = arith.cmpi eq, %arg1, %c0_i32 : i32
    %29 = arith.extui %28 : i1 to i32
    %c0_i32_19 = arith.constant 0 : i32
    %30 = arith.cmpi ne, %29, %c0_i32_19 : i32
    scf.if %30 {
      %c0_24 = arith.constant 0 : index
      %c0_25 = arith.constant 0 : index
      %37 = vector.load %arg16[%c0_24, %c0_25] : memref<8x1024xf32, #tpu.memory_space<vmem>>, vector<8x1024xf32>
      tpu.vector_store %arg16[%c0_24, %c0_25], %27 {strides = array<i32>} : memref<8x1024xf32, #tpu.memory_space<vmem>>, vector<8x1024xf32>,
    } else {
    }
    %c0_i32_20 = arith.constant 0 : i32
    %31 = arith.cmpi sgt, %arg1, %c0_i32_20 : i32
    %32 = arith.extui %31 : i1 to i32
    %c0_i32_21 = arith.constant 0 : i32
    %33 = arith.cmpi ne, %32, %c0_i32_21 : i32
    scf.if %33 {
      %c0_24 = arith.constant 0 : index
      %c0_25 = arith.constant 0 : index
      %37 = vector.load %arg16[%c0_24, %c0_25] : memref<8x1024xf32, #tpu.memory_space<vmem>>, vector<8x1024xf32>
      %38 = arith.maximumf %37, %27 : vector<8x1024xf32>
      %c0_26 = arith.constant 0 : index
      %c0_27 = arith.constant 0 : index
      %39 = vector.load %arg16[%c0_26, %c0_27] : memref<8x1024xf32, #tpu.memory_space<vmem>>, vector<8x1024xf32>
      tpu.vector_store %arg16[%c0_26, %c0_27], %38 {strides = array<i32>} : memref<8x1024xf32, #tpu.memory_space<vmem>>, vector<8x1024xf32>,
    } else {
    }
    %c0_i32_22 = arith.constant 0 : i32
    %34 = arith.cmpi eq, %arg1, %c0_i32_22 : i32
    %35 = arith.extui %34 : i1 to i32
    %c0_i32_23 = arith.constant 0 : i32
    %36 = arith.cmpi ne, %35, %c0_i32_23 : i32
    scf.if %36 {
      %c0_24 = arith.constant 0 : index
      %c0_25 = arith.constant 0 : index
      %37 = vector.load %arg16[%c0_24, %c0_25] : memref<8x1024xf32, #tpu.memory_space<vmem>>, vector<8x1024xf32>
      %cst_26 = arith.constant dense<0xFF800000> : vector<1024xf32>
      %38 = vector.multi_reduction <maximumf>, %37, %cst_26 [0] : vector<8x1024xf32> to vector<1024xf32>
      %39 = vector.shape_cast %38 : vector<1024xf32> to vector<1x1024xf32>
      %40 = arith.truncf %39 : vector<1x1024xf32> to vector<1x1024xbf16>
      %c0_27 = arith.constant 0 : index
      %c0_28 = arith.constant 0 : index
      %41 = vector.load %arg9[%c0_27, %c0_28] : memref<1024x512xbf16, #tpu.memory_space<vmem>>, vector<1024x512xbf16>
      %cst_29 = arith.constant dense<0.000000e+00> : vector<1x512xf32>
      %42 = tpu.matmul %40, %41, %cst_29 {dimension_numbers = #tpu.dot_dimension_numbers<[1], [0], [0], [1], [0, 0, 1, 1], [], []>} : vector<1x1024xbf16>, vector<1024x512xbf16>, vector<1x512xf32> -> vector<1x512xf32>
      %c0_30 = arith.constant 0 : index
      %c0_31 = arith.constant 0 : index
      %43 = vector.load %arg10[%c0_30, %c0_31] : memref<1x512xf32, #tpu.memory_space<vmem>>, vector<1x512xf32>
      %44 = arith.addf %42, %43 : vector<1x512xf32>
      %cst_32 = arith.constant 0.000000e+00 : f32
      %45 = vector.broadcast %cst_32 : f32 to vector<1x512xf32>
      %46 = arith.maximumf %44, %45 : vector<1x512xf32>
      %47 = arith.truncf %46 : vector<1x512xf32> to vector<1x512xbf16>
      %c0_33 = arith.constant 0 : index
      %c0_34 = arith.constant 0 : index
      %48 = vector.load %arg11[%c0_33, %c0_34] : memref<512x256xbf16, #tpu.memory_space<vmem>>, vector<512x256xbf16>
      %cst_35 = arith.constant dense<0.000000e+00> : vector<1x256xf32>
      %49 = tpu.matmul %47, %48, %cst_35 {dimension_numbers = #tpu.dot_dimension_numbers<[1], [0], [0], [1], [0, 0, 1, 1], [], []>} : vector<1x512xbf16>, vector<512x256xbf16>, vector<1x256xf32> -> vector<1x256xf32>
      %c0_36 = arith.constant 0 : index
      %c0_37 = arith.constant 0 : index
      %50 = vector.load %arg12[%c0_36, %c0_37] : memref<1x256xf32, #tpu.memory_space<vmem>>, vector<1x256xf32>
      %51 = arith.addf %49, %50 : vector<1x256xf32>
      %cst_38 = arith.constant 0.000000e+00 : f32
      %52 = vector.broadcast %cst_38 : f32 to vector<1x256xf32>
      %53 = arith.maximumf %51, %52 : vector<1x256xf32>
      %54 = arith.truncf %53 : vector<1x256xf32> to vector<1x256xbf16>
      %c0_39 = arith.constant 0 : index
      %c0_40 = arith.constant 0 : index
      %55 = vector.load %arg13[%c0_39, %c0_40] : memref<256x9xbf16, #tpu.memory_space<vmem>>, vector<256x9xbf16>
      %cst_41 = arith.constant dense<0.000000e+00> : vector<1x9xf32>
      %56 = tpu.matmul %54, %55, %cst_41 {dimension_numbers = #tpu.dot_dimension_numbers<[1], [0], [0], [1], [0, 0, 1, 1], [], []>} : vector<1x256xbf16>, vector<256x9xbf16>, vector<1x9xf32> -> vector<1x9xf32>
      %c0_42 = arith.constant 0 : index
      %c0_43 = arith.constant 0 : index
      %57 = vector.load %arg14[%c0_42, %c0_43] : memref<1x9xf32, #tpu.memory_space<vmem>>, vector<1x9xf32>
      %58 = arith.addf %56, %57 : vector<1x9xf32>
      %c0_44 = arith.constant 0 : index
      %c0_45 = arith.constant 0 : index
      %c0_46 = arith.constant 0 : index
      %59 = vector.load %arg15[%c0_44, %c0_45, %c0_46] : memref<1x1x9xf32, #tpu.memory_space<vmem>>, vector<1x1x9xf32>
      %60 = vector.shape_cast %59 : vector<1x1x9xf32> to vector<1x9xf32>
      %61 = vector.shape_cast %58 : vector<1x9xf32> to vector<1x1x9xf32>
      tpu.vector_store %arg15[%c0_44, %c0_45, %c0_46], %61 {strides = array<i32>} : memref<1x1x9xf32, #tpu.memory_space<vmem>>, vector<1x1x9xf32>,
    } else {
    }
    return
  }
  func.func @transform_0(%arg0: i32, %arg1: i32) -> (i32, i32) {
    %c1_i32 = arith.constant 1 : i32
    %0 = arith.muli %arg0, %c1_i32 : i32
    %1 = arith.addi %0, %arg1 : i32
    %c0_i32 = arith.constant 0 : i32
    %c0_i32_0 = arith.constant 0 : i32
    return %1, %c0_i32 : i32, i32
  }
  func.func @transform_1(%arg0: i32, %arg1: i32) -> (i32, i32) {
    %c0_i32 = arith.constant 0 : i32
    %c0_i32_0 = arith.constant 0 : i32
    %c0_i32_1 = arith.constant 0 : i32
    return %c0_i32, %c0_i32_0 : i32, i32
  }
  func.func @transform_2(%arg0: i32, %arg1: i32) -> (i32, i32) {
    %c0_i32 = arith.constant 0 : i32
    %c0_i32_0 = arith.constant 0 : i32
    %c0_i32_1 = arith.constant 0 : i32
    return %c0_i32, %c0_i32_0 : i32, i32
  }
  func.func @transform_3(%arg0: i32, %arg1: i32) -> (i32, i32) {
    %c0_i32 = arith.constant 0 : i32
    %c0_i32_0 = arith.constant 0 : i32
    %c0_i32_1 = arith.constant 0 : i32
    return %c0_i32, %c0_i32_0 : i32, i32
  }
  func.func @transform_4(%arg0: i32, %arg1: i32) -> (i32, i32) {
    %c0_i32 = arith.constant 0 : i32
    %c0_i32_0 = arith.constant 0 : i32
    %c0_i32_1 = arith.constant 0 : i32
    return %c0_i32, %c0_i32_0 : i32, i32
  }
  func.func @transform_5(%arg0: i32, %arg1: i32) -> (i32, i32) {
    %c0_i32 = arith.constant 0 : i32
    %c0_i32_0 = arith.constant 0 : i32
    %c0_i32_1 = arith.constant 0 : i32
    return %c0_i32, %c0_i32_0 : i32, i32
  }
  func.func @transform_6(%arg0: i32, %arg1: i32) -> (i32, i32) {
    %c0_i32 = arith.constant 0 : i32
    %c0_i32_0 = arith.constant 0 : i32
    %c0_i32_1 = arith.constant 0 : i32
    return %c0_i32, %c0_i32_0 : i32, i32
  }
  func.func @transform_7(%arg0: i32, %arg1: i32) -> (i32, i32) {
    %c0_i32 = arith.constant 0 : i32
    %c0_i32_0 = arith.constant 0 : i32
    %c0_i32_1 = arith.constant 0 : i32
    return %c0_i32, %c0_i32_0 : i32, i32
  }
  func.func @transform_8(%arg0: i32, %arg1: i32) -> (i32, i32) {
    %c0_i32 = arith.constant 0 : i32
    %c0_i32_0 = arith.constant 0 : i32
    %c0_i32_1 = arith.constant 0 : i32
    return %c0_i32, %c0_i32_0 : i32, i32
  }
  func.func @transform_9(%arg0: i32, %arg1: i32) -> (i32, i32) {
    %c0_i32 = arith.constant 0 : i32
    %c0_i32_0 = arith.constant 0 : i32
    %c0_i32_1 = arith.constant 0 : i32
    return %c0_i32, %c0_i32_0 : i32, i32
  }
  func.func @transform_10(%arg0: i32, %arg1: i32) -> (i32, i32) {
    %c0_i32 = arith.constant 0 : i32
    %c0_i32_0 = arith.constant 0 : i32
    %c0_i32_1 = arith.constant 0 : i32
    return %c0_i32, %c0_i32_0 : i32, i32
  }
  func.func @transform_11(%arg0: i32, %arg1: i32) -> (i32, i32) {
    %c0_i32 = arith.constant 0 : i32
    %c0_i32_0 = arith.constant 0 : i32
    %c0_i32_1 = arith.constant 0 : i32
    return %c0_i32, %c0_i32_0 : i32, i32
  }
  func.func @transform_12(%arg0: i32, %arg1: i32) -> (i32, i32) {
    %c0_i32 = arith.constant 0 : i32
    %c0_i32_0 = arith.constant 0 : i32
    %c0_i32_1 = arith.constant 0 : i32
    return %c0_i32, %c0_i32_0 : i32, i32
  }
  func.func @transform_13(%arg0: i32, %arg1: i32) -> (i32, i32, i32) {
    %c0_i32 = arith.constant 0 : i32
    %c0_i32_0 = arith.constant 0 : i32
    %c0_i32_1 = arith.constant 0 : i32
    return %arg0, %c0_i32, %c0_i32_0 : i32, i32, i32
  }
}

module attributes {stable_mosaic.version = 11 : i64} {
  func.func @_pointnet_stack_kernel(%arg0: i32, %arg1: i32, %arg2: memref<16x8xf32, #tpu.memory_space<vmem>>, %arg3: memref<1x8x64xf32, #tpu.memory_space<vmem>>, %arg4: memref<1x64xf32, #tpu.memory_space<vmem>>, %arg5: memref<64x64xbf16, #tpu.memory_space<vmem>>, %arg6: memref<1x64xf32, #tpu.memory_space<vmem>>, %arg7: memref<64x64xbf16, #tpu.memory_space<vmem>>, %arg8: memref<1x64xf32, #tpu.memory_space<vmem>>, %arg9: memref<64x128xbf16, #tpu.memory_space<vmem>>, %arg10: memref<1x128xf32, #tpu.memory_space<vmem>>, %arg11: memref<128x1024xbf16, #tpu.memory_space<vmem>>, %arg12: memref<1x1024xf32, #tpu.memory_space<vmem>>, %arg13: memref<1024x512xbf16, #tpu.memory_space<vmem>>, %arg14: memref<1x512xf32, #tpu.memory_space<vmem>>, %arg15: memref<512x256xbf16, #tpu.memory_space<vmem>>, %arg16: memref<1x256xf32, #tpu.memory_space<vmem>>, %arg17: memref<256x2xbf16, #tpu.memory_space<vmem>>, %arg18: memref<1x2xf32, #tpu.memory_space<vmem>>, %arg19: memref<1x1x2xf32, #tpu.memory_space<vmem>>, %arg20: memref<8x1024xf32, #tpu.memory_space<vmem>>) attributes {dimension_semantics = [#tpu.dimension_semantics<parallel>, #tpu.dimension_semantics<arbitrary>], iteration_bounds = array<i64: 2, 1>, scalar_prefetch = 0 : i64, scratch_operands = 1 : i64, tpu.core_type = #tpu.core_type<tc>, window_params = [{transform_indices = @transform_0, window_bounds = array<i64: 16, 8>}, {transform_indices = @transform_1, window_bounds = array<i64: 1, 8, 64>}, {pipeline_mode = #tpu.pipeline_mode<synchronous>, transform_indices = @transform_2, window_bounds = array<i64: 1, 64>}, {pipeline_mode = #tpu.pipeline_mode<synchronous>, transform_indices = @transform_3, window_bounds = array<i64: 64, 64>}, {pipeline_mode = #tpu.pipeline_mode<synchronous>, transform_indices = @transform_4, window_bounds = array<i64: 1, 64>}, {pipeline_mode = #tpu.pipeline_mode<synchronous>, transform_indices = @transform_5, window_bounds = array<i64: 64, 64>}, {pipeline_mode = #tpu.pipeline_mode<synchronous>, transform_indices = @transform_6, window_bounds = array<i64: 1, 64>}, {pipeline_mode = #tpu.pipeline_mode<synchronous>, transform_indices = @transform_7, window_bounds = array<i64: 64, 128>}, {pipeline_mode = #tpu.pipeline_mode<synchronous>, transform_indices = @transform_8, window_bounds = array<i64: 1, 128>}, {pipeline_mode = #tpu.pipeline_mode<synchronous>, transform_indices = @transform_9, window_bounds = array<i64: 128, 1024>}, {pipeline_mode = #tpu.pipeline_mode<synchronous>, transform_indices = @transform_10, window_bounds = array<i64: 1, 1024>}, {pipeline_mode = #tpu.pipeline_mode<synchronous>, transform_indices = @transform_11, window_bounds = array<i64: 1024, 512>}, {pipeline_mode = #tpu.pipeline_mode<synchronous>, transform_indices = @transform_12, window_bounds = array<i64: 1, 512>}, {pipeline_mode = #tpu.pipeline_mode<synchronous>, transform_indices = @transform_13, window_bounds = array<i64: 512, 256>}, {pipeline_mode = #tpu.pipeline_mode<synchronous>, transform_indices = @transform_14, window_bounds = array<i64: 1, 256>}, {pipeline_mode = #tpu.pipeline_mode<synchronous>, transform_indices = @transform_15, window_bounds = array<i64: 256, 2>}, {pipeline_mode = #tpu.pipeline_mode<synchronous>, transform_indices = @transform_16, window_bounds = array<i64: 1, 2>}, {transform_indices = @transform_17, window_bounds = array<i64: 1, 1, 2>}]} {
    %c0 = arith.constant 0 : index
    %c0_0 = arith.constant 0 : index
    %0 = vector.load %arg2[%c0, %c0_0] : memref<16x8xf32, #tpu.memory_space<vmem>>, vector<16x8xf32>
    %c0_1 = arith.constant 0 : index
    %c0_2 = arith.constant 0 : index
    %c0_3 = arith.constant 0 : index
    %1 = vector.load %arg3[%c0_1, %c0_2, %c0_3] : memref<1x8x64xf32, #tpu.memory_space<vmem>>, vector<1x8x64xf32>
    %2 = vector.shape_cast %1 : vector<1x8x64xf32> to vector<8x64xf32>
    %3 = arith.truncf %0 : vector<16x8xf32> to vector<16x8xbf16>
    %4 = arith.truncf %2 : vector<8x64xf32> to vector<8x64xbf16>
    %cst = arith.constant dense<0.000000e+00> : vector<16x64xf32>
    %5 = tpu.matmul %3, %4, %cst {dimension_numbers = #tpu.dot_dimension_numbers<[1], [0], [0], [1], [0, 0, 1, 1], [], []>} : vector<16x8xbf16>, vector<8x64xbf16>, vector<16x64xf32> -> vector<16x64xf32>
    %c0_4 = arith.constant 0 : index
    %c0_5 = arith.constant 0 : index
    %6 = vector.load %arg4[%c0_4, %c0_5] : memref<1x64xf32, #tpu.memory_space<vmem>>, vector<1x64xf32>
    %7 = vector.broadcast %6 : vector<1x64xf32> to vector<16x64xf32>
    %8 = arith.addf %5, %7 : vector<16x64xf32>
    %cst_6 = arith.constant 0.000000e+00 : f32
    %9 = vector.broadcast %cst_6 : f32 to vector<16x64xf32>
    %10 = arith.maximumf %8, %9 : vector<16x64xf32>
    %c0_7 = arith.constant 0 : index
    %c0_8 = arith.constant 0 : index
    %11 = vector.load %arg5[%c0_7, %c0_8] : memref<64x64xbf16, #tpu.memory_space<vmem>>, vector<64x64xbf16>
    %12 = arith.truncf %10 : vector<16x64xf32> to vector<16x64xbf16>
    %cst_9 = arith.constant dense<0.000000e+00> : vector<16x64xf32>
    %13 = tpu.matmul %12, %11, %cst_9 {dimension_numbers = #tpu.dot_dimension_numbers<[1], [0], [0], [1], [0, 0, 1, 1], [], []>} : vector<16x64xbf16>, vector<64x64xbf16>, vector<16x64xf32> -> vector<16x64xf32>
    %c0_10 = arith.constant 0 : index
    %c0_11 = arith.constant 0 : index
    %14 = vector.load %arg6[%c0_10, %c0_11] : memref<1x64xf32, #tpu.memory_space<vmem>>, vector<1x64xf32>
    %15 = vector.broadcast %14 : vector<1x64xf32> to vector<16x64xf32>
    %16 = arith.addf %13, %15 : vector<16x64xf32>
    %cst_12 = arith.constant 0.000000e+00 : f32
    %17 = vector.broadcast %cst_12 : f32 to vector<16x64xf32>
    %18 = arith.maximumf %16, %17 : vector<16x64xf32>
    %c0_13 = arith.constant 0 : index
    %c0_14 = arith.constant 0 : index
    %19 = vector.load %arg7[%c0_13, %c0_14] : memref<64x64xbf16, #tpu.memory_space<vmem>>, vector<64x64xbf16>
    %20 = arith.truncf %18 : vector<16x64xf32> to vector<16x64xbf16>
    %cst_15 = arith.constant dense<0.000000e+00> : vector<16x64xf32>
    %21 = tpu.matmul %20, %19, %cst_15 {dimension_numbers = #tpu.dot_dimension_numbers<[1], [0], [0], [1], [0, 0, 1, 1], [], []>} : vector<16x64xbf16>, vector<64x64xbf16>, vector<16x64xf32> -> vector<16x64xf32>
    %c0_16 = arith.constant 0 : index
    %c0_17 = arith.constant 0 : index
    %22 = vector.load %arg8[%c0_16, %c0_17] : memref<1x64xf32, #tpu.memory_space<vmem>>, vector<1x64xf32>
    %23 = vector.broadcast %22 : vector<1x64xf32> to vector<16x64xf32>
    %24 = arith.addf %21, %23 : vector<16x64xf32>
    %cst_18 = arith.constant 0.000000e+00 : f32
    %25 = vector.broadcast %cst_18 : f32 to vector<16x64xf32>
    %26 = arith.maximumf %24, %25 : vector<16x64xf32>
    %c0_19 = arith.constant 0 : index
    %c0_20 = arith.constant 0 : index
    %27 = vector.load %arg9[%c0_19, %c0_20] : memref<64x128xbf16, #tpu.memory_space<vmem>>, vector<64x128xbf16>
    %28 = arith.truncf %26 : vector<16x64xf32> to vector<16x64xbf16>
    %cst_21 = arith.constant dense<0.000000e+00> : vector<16x128xf32>
    %29 = tpu.matmul %28, %27, %cst_21 {dimension_numbers = #tpu.dot_dimension_numbers<[1], [0], [0], [1], [0, 0, 1, 1], [], []>} : vector<16x64xbf16>, vector<64x128xbf16>, vector<16x128xf32> -> vector<16x128xf32>
    %c0_22 = arith.constant 0 : index
    %c0_23 = arith.constant 0 : index
    %30 = vector.load %arg10[%c0_22, %c0_23] : memref<1x128xf32, #tpu.memory_space<vmem>>, vector<1x128xf32>
    %31 = vector.broadcast %30 : vector<1x128xf32> to vector<16x128xf32>
    %32 = arith.addf %29, %31 : vector<16x128xf32>
    %cst_24 = arith.constant 0.000000e+00 : f32
    %33 = vector.broadcast %cst_24 : f32 to vector<16x128xf32>
    %34 = arith.maximumf %32, %33 : vector<16x128xf32>
    %c0_25 = arith.constant 0 : index
    %c0_26 = arith.constant 0 : index
    %35 = vector.load %arg11[%c0_25, %c0_26] : memref<128x1024xbf16, #tpu.memory_space<vmem>>, vector<128x1024xbf16>
    %36 = arith.truncf %34 : vector<16x128xf32> to vector<16x128xbf16>
    %cst_27 = arith.constant dense<0.000000e+00> : vector<16x1024xf32>
    %37 = tpu.matmul %36, %35, %cst_27 {dimension_numbers = #tpu.dot_dimension_numbers<[1], [0], [0], [1], [0, 0, 1, 1], [], []>} : vector<16x128xbf16>, vector<128x1024xbf16>, vector<16x1024xf32> -> vector<16x1024xf32>
    %c0_28 = arith.constant 0 : index
    %c0_29 = arith.constant 0 : index
    %38 = vector.load %arg12[%c0_28, %c0_29] : memref<1x1024xf32, #tpu.memory_space<vmem>>, vector<1x1024xf32>
    %39 = vector.broadcast %38 : vector<1x1024xf32> to vector<16x1024xf32>
    %40 = arith.addf %37, %39 : vector<16x1024xf32>
    %41 = vector.shape_cast %40 : vector<16x1024xf32> to vector<2x8x1024xf32>
    %cst_30 = arith.constant dense<0xFF800000> : vector<8x1024xf32>
    %42 = vector.multi_reduction <maximumf>, %41, %cst_30 [0] : vector<2x8x1024xf32> to vector<8x1024xf32>
    %c0_i32 = arith.constant 0 : i32
    %43 = arith.cmpi eq, %arg1, %c0_i32 : i32
    %44 = arith.extui %43 : i1 to i32
    %c0_i32_31 = arith.constant 0 : i32
    %45 = arith.cmpi ne, %44, %c0_i32_31 : i32
    scf.if %45 {
      %c0_36 = arith.constant 0 : index
      %c0_37 = arith.constant 0 : index
      %52 = vector.load %arg20[%c0_36, %c0_37] : memref<8x1024xf32, #tpu.memory_space<vmem>>, vector<8x1024xf32>
      tpu.vector_store %arg20[%c0_36, %c0_37], %42 {strides = array<i32>} : memref<8x1024xf32, #tpu.memory_space<vmem>>, vector<8x1024xf32>,
    } else {
    }
    %c0_i32_32 = arith.constant 0 : i32
    %46 = arith.cmpi sgt, %arg1, %c0_i32_32 : i32
    %47 = arith.extui %46 : i1 to i32
    %c0_i32_33 = arith.constant 0 : i32
    %48 = arith.cmpi ne, %47, %c0_i32_33 : i32
    scf.if %48 {
      %c0_36 = arith.constant 0 : index
      %c0_37 = arith.constant 0 : index
      %52 = vector.load %arg20[%c0_36, %c0_37] : memref<8x1024xf32, #tpu.memory_space<vmem>>, vector<8x1024xf32>
      %53 = arith.maximumf %52, %42 : vector<8x1024xf32>
      %c0_38 = arith.constant 0 : index
      %c0_39 = arith.constant 0 : index
      %54 = vector.load %arg20[%c0_38, %c0_39] : memref<8x1024xf32, #tpu.memory_space<vmem>>, vector<8x1024xf32>
      tpu.vector_store %arg20[%c0_38, %c0_39], %53 {strides = array<i32>} : memref<8x1024xf32, #tpu.memory_space<vmem>>, vector<8x1024xf32>,
    } else {
    }
    %c0_i32_34 = arith.constant 0 : i32
    %49 = arith.cmpi eq, %arg1, %c0_i32_34 : i32
    %50 = arith.extui %49 : i1 to i32
    %c0_i32_35 = arith.constant 0 : i32
    %51 = arith.cmpi ne, %50, %c0_i32_35 : i32
    scf.if %51 {
      %c0_36 = arith.constant 0 : index
      %c0_37 = arith.constant 0 : index
      %52 = vector.load %arg20[%c0_36, %c0_37] : memref<8x1024xf32, #tpu.memory_space<vmem>>, vector<8x1024xf32>
      %cst_38 = arith.constant dense<0xFF800000> : vector<1024xf32>
      %53 = vector.multi_reduction <maximumf>, %52, %cst_38 [0] : vector<8x1024xf32> to vector<1024xf32>
      %54 = vector.shape_cast %53 : vector<1024xf32> to vector<1x1024xf32>
      %55 = arith.truncf %54 : vector<1x1024xf32> to vector<1x1024xbf16>
      %c0_39 = arith.constant 0 : index
      %c0_40 = arith.constant 0 : index
      %56 = vector.load %arg13[%c0_39, %c0_40] : memref<1024x512xbf16, #tpu.memory_space<vmem>>, vector<1024x512xbf16>
      %cst_41 = arith.constant dense<0.000000e+00> : vector<1x512xf32>
      %57 = tpu.matmul %55, %56, %cst_41 {dimension_numbers = #tpu.dot_dimension_numbers<[1], [0], [0], [1], [0, 0, 1, 1], [], []>} : vector<1x1024xbf16>, vector<1024x512xbf16>, vector<1x512xf32> -> vector<1x512xf32>
      %c0_42 = arith.constant 0 : index
      %c0_43 = arith.constant 0 : index
      %58 = vector.load %arg14[%c0_42, %c0_43] : memref<1x512xf32, #tpu.memory_space<vmem>>, vector<1x512xf32>
      %59 = arith.addf %57, %58 : vector<1x512xf32>
      %cst_44 = arith.constant 0.000000e+00 : f32
      %60 = vector.broadcast %cst_44 : f32 to vector<1x512xf32>
      %61 = arith.maximumf %59, %60 : vector<1x512xf32>
      %62 = arith.truncf %61 : vector<1x512xf32> to vector<1x512xbf16>
      %c0_45 = arith.constant 0 : index
      %c0_46 = arith.constant 0 : index
      %63 = vector.load %arg15[%c0_45, %c0_46] : memref<512x256xbf16, #tpu.memory_space<vmem>>, vector<512x256xbf16>
      %cst_47 = arith.constant dense<0.000000e+00> : vector<1x256xf32>
      %64 = tpu.matmul %62, %63, %cst_47 {dimension_numbers = #tpu.dot_dimension_numbers<[1], [0], [0], [1], [0, 0, 1, 1], [], []>} : vector<1x512xbf16>, vector<512x256xbf16>, vector<1x256xf32> -> vector<1x256xf32>
      %c0_48 = arith.constant 0 : index
      %c0_49 = arith.constant 0 : index
      %65 = vector.load %arg16[%c0_48, %c0_49] : memref<1x256xf32, #tpu.memory_space<vmem>>, vector<1x256xf32>
      %66 = arith.addf %64, %65 : vector<1x256xf32>
      %cst_50 = arith.constant 0.000000e+00 : f32
      %67 = vector.broadcast %cst_50 : f32 to vector<1x256xf32>
      %68 = arith.maximumf %66, %67 : vector<1x256xf32>
      %69 = arith.truncf %68 : vector<1x256xf32> to vector<1x256xbf16>
      %c0_51 = arith.constant 0 : index
      %c0_52 = arith.constant 0 : index
      %70 = vector.load %arg17[%c0_51, %c0_52] : memref<256x2xbf16, #tpu.memory_space<vmem>>, vector<256x2xbf16>
      %cst_53 = arith.constant dense<0.000000e+00> : vector<1x2xf32>
      %71 = tpu.matmul %69, %70, %cst_53 {dimension_numbers = #tpu.dot_dimension_numbers<[1], [0], [0], [1], [0, 0, 1, 1], [], []>} : vector<1x256xbf16>, vector<256x2xbf16>, vector<1x2xf32> -> vector<1x2xf32>
      %c0_54 = arith.constant 0 : index
      %c0_55 = arith.constant 0 : index
      %72 = vector.load %arg18[%c0_54, %c0_55] : memref<1x2xf32, #tpu.memory_space<vmem>>, vector<1x2xf32>
      %73 = arith.addf %71, %72 : vector<1x2xf32>
      %cst_56 = arith.constant dense<0xFF800000> : vector<1xf32>
      %74 = vector.multi_reduction <maximumf>, %73, %cst_56 [1] : vector<1x2xf32> to vector<1xf32>
      %75 = vector.shape_cast %74 : vector<1xf32> to vector<1x1xf32>
      %76 = vector.broadcast %75 : vector<1x1xf32> to vector<1x2xf32>
      %77 = arith.subf %73, %76 : vector<1x2xf32>
      %78 = math.exp %77 : vector<1x2xf32>
      %cst_57 = arith.constant dense<0.000000e+00> : vector<1xf32>
      %79 = vector.multi_reduction <add>, %78, %cst_57 [1] : vector<1x2xf32> to vector<1xf32>
      %80 = vector.shape_cast %79 : vector<1xf32> to vector<1x1xf32>
      %81 = math.log %80 : vector<1x1xf32>
      %82 = vector.broadcast %81 : vector<1x1xf32> to vector<1x2xf32>
      %83 = arith.subf %77, %82 : vector<1x2xf32>
      %c0_58 = arith.constant 0 : index
      %c0_59 = arith.constant 0 : index
      %c0_60 = arith.constant 0 : index
      %84 = vector.load %arg19[%c0_58, %c0_59, %c0_60] : memref<1x1x2xf32, #tpu.memory_space<vmem>>, vector<1x1x2xf32>
      %85 = vector.shape_cast %84 : vector<1x1x2xf32> to vector<1x2xf32>
      %86 = vector.shape_cast %83 : vector<1x2xf32> to vector<1x1x2xf32>
      tpu.vector_store %arg19[%c0_58, %c0_59, %c0_60], %86 {strides = array<i32>} : memref<1x1x2xf32, #tpu.memory_space<vmem>>, vector<1x1x2xf32>,
    } else {
    }
    return
  }
  func.func @transform_0(%arg0: i32, %arg1: i32) -> (i32, i32) {
    %c1_i32 = arith.constant 1 : i32
    %0 = arith.muli %arg0, %c1_i32 : i32
    %1 = arith.addi %0, %arg1 : i32
    %c0_i32 = arith.constant 0 : i32
    %c0_i32_0 = arith.constant 0 : i32
    return %1, %c0_i32 : i32, i32
  }
  func.func @transform_1(%arg0: i32, %arg1: i32) -> (i32, i32, i32) {
    %c0_i32 = arith.constant 0 : i32
    %c0_i32_0 = arith.constant 0 : i32
    %c0_i32_1 = arith.constant 0 : i32
    return %arg0, %c0_i32, %c0_i32_0 : i32, i32, i32
  }
  func.func @transform_2(%arg0: i32, %arg1: i32) -> (i32, i32) {
    %c0_i32 = arith.constant 0 : i32
    %c0_i32_0 = arith.constant 0 : i32
    %c0_i32_1 = arith.constant 0 : i32
    return %c0_i32, %c0_i32_0 : i32, i32
  }
  func.func @transform_3(%arg0: i32, %arg1: i32) -> (i32, i32) {
    %c0_i32 = arith.constant 0 : i32
    %c0_i32_0 = arith.constant 0 : i32
    %c0_i32_1 = arith.constant 0 : i32
    return %c0_i32, %c0_i32_0 : i32, i32
  }
  func.func @transform_4(%arg0: i32, %arg1: i32) -> (i32, i32) {
    %c0_i32 = arith.constant 0 : i32
    %c0_i32_0 = arith.constant 0 : i32
    %c0_i32_1 = arith.constant 0 : i32
    return %c0_i32, %c0_i32_0 : i32, i32
  }
  func.func @transform_5(%arg0: i32, %arg1: i32) -> (i32, i32) {
    %c0_i32 = arith.constant 0 : i32
    %c0_i32_0 = arith.constant 0 : i32
    %c0_i32_1 = arith.constant 0 : i32
    return %c0_i32, %c0_i32_0 : i32, i32
  }
  func.func @transform_6(%arg0: i32, %arg1: i32) -> (i32, i32) {
    %c0_i32 = arith.constant 0 : i32
    %c0_i32_0 = arith.constant 0 : i32
    %c0_i32_1 = arith.constant 0 : i32
    return %c0_i32, %c0_i32_0 : i32, i32
  }
  func.func @transform_7(%arg0: i32, %arg1: i32) -> (i32, i32) {
    %c0_i32 = arith.constant 0 : i32
    %c0_i32_0 = arith.constant 0 : i32
    %c0_i32_1 = arith.constant 0 : i32
    return %c0_i32, %c0_i32_0 : i32, i32
  }
  func.func @transform_8(%arg0: i32, %arg1: i32) -> (i32, i32) {
    %c0_i32 = arith.constant 0 : i32
    %c0_i32_0 = arith.constant 0 : i32
    %c0_i32_1 = arith.constant 0 : i32
    return %c0_i32, %c0_i32_0 : i32, i32
  }
  func.func @transform_9(%arg0: i32, %arg1: i32) -> (i32, i32) {
    %c0_i32 = arith.constant 0 : i32
    %c0_i32_0 = arith.constant 0 : i32
    %c0_i32_1 = arith.constant 0 : i32
    return %c0_i32, %c0_i32_0 : i32, i32
  }
  func.func @transform_10(%arg0: i32, %arg1: i32) -> (i32, i32) {
    %c0_i32 = arith.constant 0 : i32
    %c0_i32_0 = arith.constant 0 : i32
    %c0_i32_1 = arith.constant 0 : i32
    return %c0_i32, %c0_i32_0 : i32, i32
  }
  func.func @transform_11(%arg0: i32, %arg1: i32) -> (i32, i32) {
    %c0_i32 = arith.constant 0 : i32
    %c0_i32_0 = arith.constant 0 : i32
    %c0_i32_1 = arith.constant 0 : i32
    return %c0_i32, %c0_i32_0 : i32, i32
  }
  func.func @transform_12(%arg0: i32, %arg1: i32) -> (i32, i32) {
    %c0_i32 = arith.constant 0 : i32
    %c0_i32_0 = arith.constant 0 : i32
    %c0_i32_1 = arith.constant 0 : i32
    return %c0_i32, %c0_i32_0 : i32, i32
  }
  func.func @transform_13(%arg0: i32, %arg1: i32) -> (i32, i32) {
    %c0_i32 = arith.constant 0 : i32
    %c0_i32_0 = arith.constant 0 : i32
    %c0_i32_1 = arith.constant 0 : i32
    return %c0_i32, %c0_i32_0 : i32, i32
  }
  func.func @transform_14(%arg0: i32, %arg1: i32) -> (i32, i32) {
    %c0_i32 = arith.constant 0 : i32
    %c0_i32_0 = arith.constant 0 : i32
    %c0_i32_1 = arith.constant 0 : i32
    return %c0_i32, %c0_i32_0 : i32, i32
  }
  func.func @transform_15(%arg0: i32, %arg1: i32) -> (i32, i32) {
    %c0_i32 = arith.constant 0 : i32
    %c0_i32_0 = arith.constant 0 : i32
    %c0_i32_1 = arith.constant 0 : i32
    return %c0_i32, %c0_i32_0 : i32, i32
  }
  func.func @transform_16(%arg0: i32, %arg1: i32) -> (i32, i32) {
    %c0_i32 = arith.constant 0 : i32
    %c0_i32_0 = arith.constant 0 : i32
    %c0_i32_1 = arith.constant 0 : i32
    return %c0_i32, %c0_i32_0 : i32, i32
  }
  func.func @transform_17(%arg0: i32, %arg1: i32) -> (i32, i32, i32) {
    %c0_i32 = arith.constant 0 : i32
    %c0_i32_0 = arith.constant 0 : i32
    %c0_i32_1 = arith.constant 0 : i32
    return %arg0, %c0_i32, %c0_i32_0 : i32, i32, i32
  }
}

</mosaic_0001>

<bundles_post_ra>
// kernel: _lambda_.2
= control target key start
LH: loop header
LB: loop body
LE: loop exit
PB: predicated region body
PF: predicated region fallthrough
CT: control target
= control target key end

     0   :  { %s5063_s25 = smov 0   ;;  %s5065_s26 = smov 0   ;;  %s6413_s0 = inlined_call_operand.vmem [shape: f32[32,8], index: 0, kind: input, shape index: {}]   ;;  %s6414_s1 = inlined_call_operand.vmem [shape: f32[8,64], index: 1, kind: input, shape index: {}]   ;;  %s6415_s2 = inlined_call_operand.vmem [shape: f32[1,64], index: 2, kind: input, shape index: {}]   ;;  %s6416_s3 = inlined_call_operand.vmem [shape: bf16[64,128], index: 3, kind: input, shape index: {}]   ;;  %s6417_s4 = inlined_call_operand.vmem [shape: f32[1,128], index: 4, kind: input, shape index: {}]   ;;  %s6418_s5 = inlined_call_operand.vmem [shape: bf16[128,1024], index: 5, kind: input, shape index: {}]   ;;  %s6419_s6 = inlined_call_operand.vmem [shape: f32[1,1024], index: 6, kind: input, shape index: {}]   ;;  %s6420_s7 = inlined_call_operand.vmem [shape: bf16[1024,512], index: 7, kind: input, shape index: {}]   ;;  %s6421_s8 = inlined_call_operand.vmem [shape: f32[1,512], index: 8, kind: input, shape index: {}]   ;;  %s6422_s9 = inlined_call_operand.vmem [shape: bf16[512,256], index: 9, kind: input, shape index: {}]   ;;  %s6423_s10 = inlined_call_operand.vmem [shape: f32[1,256], index: 10, kind: input, shape index: {}]   ;;  %s6424_s11 = inlined_call_operand.vmem [shape: bf16[256,9], index: 11, kind: input, shape index: {}]   ;;  %s6425_s12 = inlined_call_operand.vmem [shape: f32[1,9], index: 12, kind: input, shape index: {}]   ;;  %s6426_s13 = inlined_call_operand.vmem [shape: f32[2,1,9], index: 13, kind: output, shape index: {}]  }
   0x1   :  { %s5067_s27 = smov 0  }
   0x2 LB: > { %s35_s28 = sadd.s32 1, %s4984_s26  ;;  %p3945_p0 = scmp.ge.s32.totalorder %s4988_s27, 1  ;;  %s4988_s27 = sphi %s5067_s27, %s23_s27   ;;  %s4984_s26 = sphi %s5065_s26, %s6428_s26   ;;  %s4980_s25 = sphi %s5063_s25, %s6427_s25  }
   0x3   : > { %p37_p1 = scmp.ge.s32.totalorder %s35_s28, 2  ;;  %p404_p2 = scmp.lt.s32.totalorder %s4988_s27, 3 }
   0x5   : > { %s6430_s28 = smov (%p37_p1, %s35_s28), 0  ;;  %p405_p3 = pnand %p3945_p0, %p404_p2 }
   0x6   : > { %v461_v0 = vld [vmem:[%s6414_s1] sm:$0xff] (!%p405_p3)  ;;  %vm475_vm0 = vcmask (!%p405_p3), 1043456   ;;  %s3946_s14 = sshll.u32 (!%p405_p3), %s4980_s25, 1  ;;  %v4990_v1 = vmov (!%p405_p3), 0.0   ;;  %vm4991_vm1 = vmmov (!%p405_p3), 0   ;;  %vm471_vm2 = vcmask (!%p405_p3), 64512  }
   0x7   : > { %408 = sbr.rel (%p405_p3) target bundleno = 1610 (0x64a), region = 72  ;;  %4387 = vmatprep.subr.bf16.mxu1 (!%p405_p3), %v4990_v1  ;;  %v463_v2 = vpack.c.bf16 (!%p405_p3), %v461_v0, %v461_v0  ;;  %4389 = vmatprep.mubr.msk.bf16.mxu1 (!%p405_p3), %vm4991_vm1, %v4990_v1  ;;  %p449_p4 = scmp.lt.s32.totalorder (!%p405_p3), %s3946_s14, 3  ;;  %v4466_v4 = vld [vmem:[%s6416_s3] sm:$0xff] (!%p405_p3)   ;;  %v4467_v8 = vld [vmem:[%s6416_s3 + $0x8] sm:$0xff] (!%p405_p3)   ;;  %v4468_v9 = vld [vmem:[%s6416_s3 + $0x10] sm:$0xff] (!%p405_p3)   ;;  %vm562_vm3 = vcmask (!%p405_p3), 523264  }
   0x8   : > { %v4469_v10 = vld [vmem:[%s6416_s3 + $0x18] sm:$0xff] (!%p405_p3)   ;;  %v609_v11 = vld [vmem:[%s6418_s5] sm:$0xff] (!%p405_p3)  ;;  %v611_v15 = vld [vmem:[%s6418_s5 + $0x10] sm:$0xff] (!%p405_p3)  ;;  %p455_p5 = scmp.lt.s32.totalorder (!%p405_p3), %s4980_s25, 1  ;;  %vm3884_vm4 = vcmask (!%p405_p3), 65536  }
   0x9   : > { %v477_v3 = vsel (!%p405_p3), %vm475_vm0, %v463_v2, 0  ;;  %v613_v12 = vld [vmem:[%s6418_s5 + $0x20] sm:$0xff] (!%p405_p3)  ;;  %v615_v16 = vld [vmem:[%s6418_s5 + $0x30] sm:$0xff] (!%p405_p3) }
   0xa   : > { %4388 = vmatpush3.bf16.msra.mxu1 (!%p405_p3), %v477_v3  ;;  %v3956_v13 = vcombine.low (!%p405_p3), %v609_v11, %v613_v12  ;;  %v3957_v14 = vcombine.high (!%p405_p3), %v609_v11, %v613_v12  ;;  %v3961_v17 = vcombine.high (!%p405_p3), %v611_v15, %v615_v16  ;;  %v3960_v18 = vcombine.low (!%p405_p3), %v611_v15, %v615_v16  ;;  %v619_v19 = vld [vmem:[%s6418_s5 + $0x50] sm:$0xff] (!%p405_p3)  ;;  %v3948_v39 = vld [vmem:[%s6415_s2] ss:$0 sm:$0xff] (!%p405_p3) }
   0xb   : > { %4393 = vmatprep.subr.bf16.mxu1 (!%p405_p3), %v4990_v1  ;;  %v623_v20 = vld [vmem:[%s6418_s5 + $0x70] sm:$0xff] (!%p405_p3)  ;;  %v617_v46 = vld [vmem:[%s6418_s5 + $0x40] sm:$0xff] (!%p405_p3) }
   0xc   : > { %1122 = vmatprep.subr.bf16.mxu0 (!%p405_p3), %v3961_v17  ;;  %v3969_v21 = vcombine.high (!%p405_p3), %v619_v19, %v623_v20  ;;  %v3968_v22 = vcombine.low (!%p405_p3), %v619_v19, %v623_v20  ;;  %v627_v23 = vld [vmem:[%s6418_s5 + $0x90] sm:$0xff] (!%p405_p3)  ;;  %v621_v47 = vld [vmem:[%s6418_s5 + $0x60] sm:$0xff] (!%p405_p3) }
   0xd   : > { %1123 = vmatpush1.bf16.msra.mxu0 (!%p405_p3), %v3960_v18  ;;  %v631_v24 = vld [vmem:[%s6418_s5 + $0xb0] sm:$0xff] (!%p405_p3)  ;;  %v3965_v51 = vcombine.high (!%p405_p3), %v617_v46, %v621_v47  ;;  %v625_v52 = vld [vmem:[%s6418_s5 + $0x80] sm:$0xff] (!%p405_p3)  ;;  %v3964_v54 = vcombine.low (!%p405_p3), %v617_v46, %v621_v47  ;;  %v634_v47 = vld [vmem:[%s6418_s5 + $0xc8] sm:$0xff] (!%p405_p3) }
   0xe   : > { %s6432_s14 = smov (!%p449_p4, %s3946_s14), 3  ;;  %1124 = vmatprep.subr.bf16.mxu0 %v3969_v21  ;;  %v3977_v25 = vcombine.high %v627_v23, %v631_v24  ;;  %v3976_v26 = vcombine.low %v627_v23, %v631_v24  ;;  %v635_v27 = vld [vmem:[%s6418_s5 + $0xd0] sm:$0xff]  ;;  %v629_v53 = vld [vmem:[%s6418_s5 + $0xa0] sm:$0xff]  ;;  %v610_v21 = vld [vmem:[%s6418_s5 + $0x8] sm:$0xff]  ;;  %s6434_s25 = smov (!%p455_p5, %s4980_s25), 1 }
   0xf   : > { %s3947_s15 = sshll.u32 %s6432_s14, 3  ;;  %v639_v28 = vld [vmem:[%s6418_s5 + $0xf0] sm:$0xff]  ;;  %v3973_v55 = vcombine.high %v625_v52, %v629_v53  ;;  %v633_v56 = vld [vmem:[%s6418_s5 + $0xc0] sm:$0xff]  ;;  %v3972_v58 = vcombine.low %v625_v52, %v629_v53  ;;  %v642_v53 = vld [vmem:[%s6418_s5 + $0x108] sm:$0xff]  ;;  %s457_s22 = scalar_lea.vmem %s6426_s13, %s6434_s25 }
  0x10   : > { %s452_s20 = scalar_lea.vmem %s6413_s0, %s3947_s15  ;;  %v3985_v29 = vcombine.high %v635_v27, %v639_v28  ;;  %v3984_v30 = vcombine.low %v635_v27, %v639_v28  ;;  %v643_v31 = vld [vmem:[%s6418_s5 + $0x110] sm:$0xff]  ;;  %v637_v57 = vld [vmem:[%s6418_s5 + $0xe0] sm:$0xff] }
  0x11   : > { %v459_v5 = vld [vmem:[%s452_s20] sm:$0xff]  ;;  %v460_v6 = vld [vmem:[%s452_s20 + $0x8] sm:$0xff]  ;;  %1125 = vmatpush1.bf16.msra.mxu0 %v3968_v22  ;;  %v647_v32 = vld [vmem:[%s6418_s5 + $0x130] sm:$0xff]  ;;  %v3981_v59 = vcombine.high %v633_v56, %v637_v57  ;;  %v3980_v62 = vcombine.low %v633_v56, %v637_v57 }
  0x12   : > { %v462_v7 = vpack.c.bf16 %v460_v6, %v459_v5  ;;  %1126 = vmatprep.subr.bf16.mxu0 %v3977_v25  ;;  %v3993_v33 = vcombine.high %v643_v31, %v647_v32  ;;  %v3992_v34 = vcombine.low %v643_v31, %v647_v32  ;;  %v651_v35 = vld [vmem:[%s6418_s5 + $0x150] sm:$0xff]  ;;  %v641_v60 = vld [vmem:[%s6418_s5 + $0x100] sm:$0xff]  ;;  %v614_v22 = vld [vmem:[%s6418_s5 + $0x28] sm:$0xff]  ;;  %v4992_v25 = vmov 0  }
  0x13   : > { %v655_v36 = vld [vmem:[%s6418_s5 + $0x170] sm:$0xff]  ;;  %v645_v61 = vld [vmem:[%s6418_s5 + $0x120] sm:$0xff]  ;;  %v3959_v23 = vcombine.high %v610_v21, %v614_v22  ;;  %v3958_v24 = vcombine.low %v610_v21, %v614_v22  ;;  %1154 = vmatprep.mubr.bf16.mxu0 %v4992_v25 }
  0x14   : > { %4390 = vmatmul.mubr.msk.bf16.vlgmr.msra.gmra.mrb[0].mxu1 %vm471_vm2, %v462_v7  ;;  %v4001_v37 = vcombine.high %v651_v35, %v655_v36  ;;  %v4000_v38 = vcombine.low %v651_v35, %v655_v36  ;;  %v3989_v63 = vcombine.high %v641_v60, %v645_v61  ;;  %v649_v0 = vld [vmem:[%s6418_s5 + $0x140] sm:$0xff]  ;;  %v3988_v2 = vcombine.low %v641_v60, %v645_v61  ;;  %v667_v16 = vld [vmem:[%s6418_s5 + $0x1d0] sm:$0xff]  ;;  %v622_v35 = vld [vmem:[%s6418_s5 + $0x68] sm:$0xff] }
  0x15   : > { %4394 = vmatpush3.bf16.msra.mxu1 %v4466_v4  ;;  %4401 = vmatprep.mubr.msk.bf16.mxu1 %vm4991_vm1, %v4990_v1  ;;  %v657_v5 = vld [vmem:[%s6418_s5 + $0x180] sm:$0xff]  ;;  %v671_v17 = vld [vmem:[%s6418_s5 + $0x1f0] sm:$0xff]  ;;  %v654_v60 = vld [vmem:[%s6418_s5 + $0x168] sm:$0xff] }
  0x16   : > { %4395 = vmatprep.subr.bf16.mxu1 %v4990_v1  ;;  %1127 = vmatpush1.bf16.msra.mxu0 %v3976_v26  ;;  %v661_v6 = vld [vmem:[%s6418_s5 + $0x1a0] sm:$0xff]  ;;  %v4017_v19 = vcombine.high %v667_v16, %v671_v17  ;;  %v4016_v20 = vcombine.low %v667_v16, %v671_v17 }
  0x17   : > { %1128 = vmatprep.subr.bf16.mxu0 %v3985_v29  ;;  %v4005_v7 = vcombine.high %v657_v5, %v661_v6  ;;  %v4472_v26 = vld [vmem:[%s6420_s7 + $0x4] ss:$16 sps:$4 sm:$0xff]   ;;  %v3950_v27 = vld [vmem:[%s6417_s4] ss:$0 sm:$0xff] }
  0x18   : > { %v4476_v46 = vld [vmem:[%s6420_s7 + $0x20] ss:$16 sps:$4 sm:$0xff]   ;;  %v4496_v61 = vld [vmem:[%s6420_s7 + $0x84] ss:$16 sps:$4 sm:$0xff]  }
  0x19   : > { %4396 = vmatpush3.bf16.msra.mxu1 %v4467_v8  ;;  %v659_v8 = vld [vmem:[%s6418_s5 + $0x190] sm:$0xff] }
  0x1a   : > { %4397 = vmatprep.subr.bf16.mxu1 %v4990_v1  ;;  %1129 = vmatpush1.bf16.msra.mxu0 %v3984_v30  ;;  %v4482_v52 = vld [vmem:[%s6420_s7 + $0x40] ss:$16 sps:$4 sm:$0xff]   ;;  %v4520_v21 = vld [vmem:[%s6420_s7 + $0x104] ss:$16 sps:$4 sm:$0xff]  }
  0x1b   : > { %1130 = vmatprep.subr.bf16.mxu0 %v3993_v33 }
  0x1d   : > { %4398 = vmatpush3.bf16.msra.mxu1 %v4468_v9  ;;  %v663_v9 = vld [vmem:[%s6418_s5 + $0x1b0] sm:$0xff] }
  0x1e   : > { %4399 = vmatprep.subr.bf16.mxu1 %v4990_v1  ;;  %1131 = vmatpush1.bf16.msra.mxu0 %v3992_v34  ;;  %v653_v1 = vld [vmem:[%s6418_s5 + $0x160] sm:$0xff]  ;;  %v4009_v11 = vcombine.high %v659_v8, %v663_v9  ;;  %v4008_v12 = vcombine.low %v659_v8, %v663_v9  ;;  %v618_v34 = vld [vmem:[%s6418_s5 + $0x48] sm:$0xff] }
  0x1f   : > { %1132 = vmatprep.subr.bf16.mxu0 %v4001_v37  ;;  %v3997_v3 = vcombine.high %v649_v0, %v653_v1  ;;  %v3996_v4 = vcombine.low %v649_v0, %v653_v1  ;;  %v4494_v0 = vld [vmem:[%s6420_s7 + $0x80] ss:$16 sps:$4 sm:$0xff]   ;;  %v658_v1 = vld [vmem:[%s6418_s5 + $0x188] sm:$0xff]  ;;  %v4508_v9 = vld [vmem:[%s6420_s7 + $0xc4] ss:$16 sps:$4 sm:$0xff]  }
  0x20   : > { %v670_v8 = vld [vmem:[%s6418_s5 + $0x1e8] sm:$0xff] }
  0x21   : > { %4400 = vmatpush3.bf16.msra.mxu1 %v4469_v10  ;;  %v4004_v10 = vcombine.low %v657_v5, %v661_v6  ;;  %v4500_v6 = vld [vmem:[%s6420_s7 + $0xa0] ss:$16 sps:$4 sm:$0xff]  }
  0x22   : > { %1036 = vmatprep.subr.bf16.mxu1 %v3957_v14  ;;  %1133 = vmatpush1.bf16.msra.mxu0 %v4000_v38  ;;  %v669_v14 = vld [vmem:[%s6418_s5 + $0x1e0] sm:$0xff] }
  0x23   : > { %1134 = vmatprep.subr.bf16.mxu0 %v4009_v11 }
  0x26   : > { %1135 = vmatpush1.bf16.msra.mxu0 %v4008_v12  ;;  %v4506_v12 = vld [vmem:[%s6420_s7 + $0xc0] ss:$16 sps:$4 sm:$0xff]  }
  0x27   : > { %1136 = vmatprep.subr.bf16.mxu0 %v4017_v19  ;;  %v620_v19 = vld [vmem:[%s6418_s5 + $0x58] sm:$0xff] }
  0x2a   : > { %1137 = vmatpush1.bf16.msra.mxu0 %v4016_v20  ;;  %v624_v20 = vld [vmem:[%s6418_s5 + $0x78] sm:$0xff] }
  0x2b   : > { %2897 = vmatprep.subr.bf16.mxu0 %v4472_v26  ;;  %v628_v26 = vld [vmem:[%s6418_s5 + $0x98] sm:$0xff] }
  0xe7   : > { %v513_v40 = vpop.f32.mrb[0].mxu1 }
  0xe8   : > { %v514_v41 = vadd.f32 %v3948_v39, %v513_v40  ;;  %v4391_v42 = vpop.f32.mrb[1].mxu1  ;;  %v4470_v40 = vld [vmem:[%s6420_s7] ss:$16 sps:$4 sm:$0xff]  }
  0xe9   : > { %v516_v43 = vpop.f32.mrb[2].mxu1  ;;  %v630_v42 = vld [vmem:[%s6418_s5 + $0xa8] sm:$0xff] }
  0xea   : > { %v517_v44 = vadd.f32 %v3948_v39, %v516_v43  ;;  %v4392_v45 = vpop.f32.mrb[3].mxu1  ;;  %v520_v48 = vmax.f32 %v514_v41, 0.0  ;;  %v3967_v39 = vcombine.high %v618_v34, %v622_v35  ;;  %v626_v41 = vld [vmem:[%s6418_s5 + $0x88] sm:$0xff]  ;;  %v4478_v43 = vld [vmem:[%s6420_s7 + $0x24] ss:$16 sps:$4 sm:$0xff]  }
  0xeb   : > { %v3975_v45 = vcombine.high %v626_v41, %v630_v42 }
  0xec   : > { %v521_v49 = vmax.f32 %v517_v44, 0.0  ;;  %v3966_v44 = vcombine.low %v618_v34, %v622_v35  ;;  %v644_v35 = vld [vmem:[%s6418_s5 + $0x118] sm:$0xff] }
  0xee   : > { %v530_v50 = vpack.c.bf16 %v521_v49, %v520_v48  ;;  %v638_v48 = vld [vmem:[%s6418_s5 + $0xe8] sm:$0xff]  ;;  %v4484_v49 = vld [vmem:[%s6420_s7 + $0x44] ss:$16 sps:$4 sm:$0xff]  }
  0xef   : > { %v3982_v56 = vcombine.low %v634_v47, %v638_v48 }
  0xf0   : > { %4402 = vmatmul.mubr.msk.bf16.vlgmr.msra.gmra.mrb[4].mxu1 %vm562_vm3, %v530_v50  ;;  %v3974_v50 = vcombine.low %v626_v41, %v630_v42  ;;  %v656_v41 = vld [vmem:[%s6418_s5 + $0x178] sm:$0xff] }
  0xf1   : > { %1037 = vmatpush1.bf16.msra.mxu1 %v3956_v13  ;;  %v665_v13 = vld [vmem:[%s6418_s5 + $0x1c0] sm:$0xff]  ;;  %1068 = vmatprep.mubr.bf16.mxu1 %v4992_v25 }
  0xf2   : > { %1038 = vmatprep.subr.bf16.mxu1 %v3965_v51  ;;  %v4013_v15 = vcombine.high %v665_v13, %v669_v14  ;;  %v4012_v18 = vcombine.low %v665_v13, %v669_v14  ;;  %v3983_v51 = vcombine.high %v634_v47, %v638_v48  ;;  %v612_v13 = vld [vmem:[%s6418_s5 + $0x18] sm:$0xff] }
  0xf3   : > { %v616_v14 = vld [vmem:[%s6418_s5 + $0x38] sm:$0xff] }
  0xf4   : > { %v3963_v17 = vcombine.high %v612_v13, %v616_v14  ;;  %v3962_v22 = vcombine.low %v612_v13, %v616_v14  ;;  %v668_v48 = vld [vmem:[%s6418_s5 + $0x1d8] sm:$0xff]  ;;  %v4550_v13 = vld [vmem:[%s6420_s7 + $0x1a4] ss:$16 sps:$4 sm:$0xff]   ;;  %v4548_v14 = vld [vmem:[%s6420_s7 + $0x1a0] ss:$16 sps:$4 sm:$0xff]  }
  0xf5   : > { %1039 = vmatpush1.bf16.msra.mxu1 %v3964_v54  ;;  %v646_v54 = vld [vmem:[%s6418_s5 + $0x128] sm:$0xff] }
  0xf6   : > { %1040 = vmatprep.subr.bf16.mxu1 %v3973_v55  ;;  %v4490_v55 = vld [vmem:[%s6420_s7 + $0x64] ss:$16 sps:$4 sm:$0xff]   ;;  %v3991_v57 = vcombine.high %v642_v53, %v646_v54 }
  0xf9   : > { %1041 = vmatpush1.bf16.msra.mxu1 %v3972_v58  ;;  %v4488_v58 = vld [vmem:[%s6420_s7 + $0x60] ss:$16 sps:$4 sm:$0xff]  }
  0xfa   : > { %1042 = vmatprep.subr.bf16.mxu1 %v3981_v59  ;;  %v650_v59 = vld [vmem:[%s6418_s5 + $0x148] sm:$0xff] }
  0xfd   : > { %1043 = vmatpush1.bf16.msra.mxu1 %v3980_v62  ;;  %v3990_v62 = vcombine.low %v642_v53, %v646_v54  ;;  %v4475_v53 = vld [vmem:[%s6420_s7 + $0xc] ss:$16 sps:$4 sm:$0xff]   ;;  %v4473_v54 = vld [vmem:[%s6420_s7 + $0x8] ss:$16 sps:$4 sm:$0xff]  }
  0xfe   : > { %1044 = vmatprep.subr.bf16.mxu1 %v3989_v63  ;;  %v3999_v63 = vcombine.high %v650_v59, %v654_v60 }
 0x101   : > { %1045 = vmatpush1.bf16.msra.mxu1 %v3988_v2  ;;  %v662_v2 = vld [vmem:[%s6418_s5 + $0x1a8] sm:$0xff] }
 0x102   : > { %1046 = vmatprep.subr.bf16.mxu1 %v3997_v3  ;;  %v4502_v3 = vld [vmem:[%s6420_s7 + $0xa4] ss:$16 sps:$4 sm:$0xff]   ;;  %v4007_v5 = vcombine.high %v658_v1, %v662_v2 }
 0x105   : > { %1047 = vmatpush1.bf16.msra.mxu1 %v3996_v4  ;;  %v3998_v4 = vcombine.low %v650_v59, %v654_v60  ;;  %v4491_v59 = vld [vmem:[%s6420_s7 + $0x68] ss:$16 sps:$4 sm:$0xff]   ;;  %v4499_v60 = vld [vmem:[%s6420_s7 + $0x8c] ss:$16 sps:$4 sm:$0xff]  }
 0x106   : > { %1048 = vmatprep.subr.bf16.mxu1 %v4005_v7  ;;  %v666_v7 = vld [vmem:[%s6418_s5 + $0x1c8] sm:$0xff] }
 0x107   : > { %v4015_v11 = vcombine.high %v666_v7, %v670_v8  ;;  %v4014_v16 = vcombine.low %v666_v7, %v670_v8  ;;  %v4515_v7 = vld [vmem:[%s6420_s7 + $0xe8] ss:$16 sps:$4 sm:$0xff]   ;;  %v4523_v8 = vld [vmem:[%s6420_s7 + $0x10c] ss:$16 sps:$4 sm:$0xff]  }
 0x109   : > { %1049 = vmatpush1.bf16.msra.mxu1 %v4004_v10  ;;  %v4006_v10 = vcombine.low %v658_v1, %v662_v2  ;;  %v4532_v1 = vld [vmem:[%s6420_s7 + $0x144] ss:$16 sps:$4 sm:$0xff]   ;;  %v4530_v2 = vld [vmem:[%s6420_s7 + $0x140] ss:$16 sps:$4 sm:$0xff]  }
 0x10a   : > { %1050 = vmatprep.subr.bf16.mxu1 %v4013_v15  ;;  %v4514_v15 = vld [vmem:[%s6420_s7 + $0xe4] ss:$16 sps:$4 sm:$0xff]  }
 0x10d   : > { %1051 = vmatpush1.bf16.msra.mxu1 %v4012_v18  ;;  %v4512_v18 = vld [vmem:[%s6420_s7 + $0xe0] ss:$16 sps:$4 sm:$0xff]  }
 0x10e   : > { %1079 = vmatprep.subr.bf16.mxu1 %v3959_v23  ;;  %v3971_v23 = vcombine.high %v620_v19, %v624_v20 }
 0x1c3   : > { %v600_v28 = vpop.f32.mrb[4].mxu1 }
 0x1c4   : > { %v601_v29 = vadd.f32 %v3950_v27, %v600_v28  ;;  %v4403_v30 = vpop.f32.mrb[5].mxu1  ;;  %v4526_v28 = vld [vmem:[%s6420_s7 + $0x124] ss:$16 sps:$4 sm:$0xff]  }
 0x1c5   : > { %v603_v31 = vpop.f32.mrb[6].mxu1 }
 0x1c6   : > { %v604_v32 = vadd.f32 %v3950_v27, %v603_v31  ;;  %v4404_v33 = vpop.f32.mrb[7].mxu1  ;;  %v607_v36 = vmax.f32 %v601_v29, 0.0  ;;  %v632_v27 = vld [vmem:[%s6418_s5 + $0xb8] sm:$0xff]  ;;  %v3970_v29 = vcombine.low %v620_v19, %v624_v20  ;;  %v4524_v31 = vld [vmem:[%s6420_s7 + $0x120] ss:$16 sps:$4 sm:$0xff]  }
 0x1c7   : > { %v3979_v30 = vcombine.high %v628_v26, %v632_v27  ;;  %v640_v33 = vld [vmem:[%s6418_s5 + $0xf8] sm:$0xff]  ;;  %v3978_v34 = vcombine.low %v628_v26, %v632_v27  ;;  %v4562_v19 = vld [vmem:[%s6420_s7 + $0x1e4] ss:$16 sps:$4 sm:$0xff]  }
 0x1c8   : > { %v608_v37 = vmax.f32 %v604_v32, 0.0  ;;  %v636_v32 = vld [vmem:[%s6418_s5 + $0xd8] sm:$0xff]  ;;  %v4568_v26 = vld [vmem:[%s6420_s7 + $0x204] ss:$16 sps:$4 sm:$0xff]  }
 0x1c9   : > { %v4533_v20 = vld [vmem:[%s6420_s7 + $0x148] ss:$16 sps:$4 sm:$0xff]  }
 0x1ca   : > { %v5223_v38 = vpack.c.bf16 %v608_v37, %v607_v36  ;;  %v648_v36 = vld [vmem:[%s6418_s5 + $0x138] sm:$0xff]  ;;  %v3986_v37 = vcombine.low %v636_v32, %v640_v33 }
 0x1cb   : > { %v3994_v42 = vcombine.low %v644_v35, %v648_v36  ;;  %v4545_v27 = vld [vmem:[%s6420_s7 + $0x188] ss:$16 sps:$4 sm:$0xff]  }
 0x1cc   : > { %1069 = vmatmul.mubr.bf16.vlgmr.msra.gmra.mrb[8].mxu1 %v5223_v38  ;;  %1155 = vmatmul.mubr.bf16.vlgmr.msra.gmra.mrb[0].mxu0 %v5223_v38 }
 0x1cd   : > { %1080 = vmatpush1.bf16.msra.mxu1 %v3958_v24  ;;  %1111 = vmatprep.mubr.bf16.mxu1 %v4992_v25  ;;  %v4518_v24 = vld [vmem:[%s6420_s7 + $0x100] ss:$16 sps:$4 sm:$0xff]  }
 0x1ce   : > { %1081 = vmatprep.subr.bf16.mxu1 %v3967_v39  ;;  %2898 = vmatpush1.bf16.msra.mxu0 %v4470_v40  ;;  %v3995_v39 = vcombine.high %v644_v35, %v648_v36  ;;  %v652_v40 = vld [vmem:[%s6418_s5 + $0x158] sm:$0xff] }
 0x1cf   : > { %2899 = vmatprep.subr.bf16.mxu0 %v4478_v43  ;;  %v4003_v43 = vcombine.high %v652_v40, %v656_v41 }
 0x1d1   : > { %1082 = vmatpush1.bf16.msra.mxu1 %v3966_v44  ;;  %v660_v44 = vld [vmem:[%s6418_s5 + $0x198] sm:$0xff] }
 0x1d2   : > { %1083 = vmatprep.subr.bf16.mxu1 %v3975_v45  ;;  %2900 = vmatpush1.bf16.msra.mxu0 %v4476_v46  ;;  %v664_v45 = vld [vmem:[%s6418_s5 + $0x1b8] sm:$0xff]  ;;  %v4002_v46 = vcombine.low %v652_v40, %v656_v41 }
 0x1d3   : > { %2901 = vmatprep.subr.bf16.mxu0 %v4484_v49  ;;  %v4011_v47 = vcombine.high %v660_v44, %v664_v45  ;;  %v672_v49 = vld [vmem:[%s6418_s5 + $0x1f8] sm:$0xff] }
 0x1d5   : > { %1084 = vmatpush1.bf16.msra.mxu1 %v3974_v50  ;;  %v4010_v50 = vcombine.low %v660_v44, %v664_v45 }
 0x1d6   : > { %1085 = vmatprep.subr.bf16.mxu1 %v3983_v51  ;;  %2902 = vmatpush1.bf16.msra.mxu0 %v4482_v52  ;;  %v4019_v51 = vcombine.high %v668_v48, %v672_v49  ;;  %v4018_v52 = vcombine.low %v668_v48, %v672_v49 }
 0x1d7   : > { %2903 = vmatprep.subr.bf16.mxu0 %v4490_v55  ;;  %v4481_v55 = vld [vmem:[%s6420_s7 + $0x2c] ss:$16 sps:$4 sm:$0xff]  }
 0x1d9   : > { %1086 = vmatpush1.bf16.msra.mxu1 %v3982_v56  ;;  %v4479_v56 = vld [vmem:[%s6420_s7 + $0x28] ss:$16 sps:$4 sm:$0xff]  }
 0x1da   : > { %1087 = vmatprep.subr.bf16.mxu1 %v3991_v57  ;;  %2904 = vmatpush1.bf16.msra.mxu0 %v4488_v58  ;;  %v4487_v57 = vld [vmem:[%s6420_s7 + $0x4c] ss:$16 sps:$4 sm:$0xff]   ;;  %v4485_v58 = vld [vmem:[%s6420_s7 + $0x48] ss:$16 sps:$4 sm:$0xff]  }
 0x1db   : > { %2905 = vmatprep.subr.bf16.mxu0 %v4496_v61  ;;  %v4497_v61 = vld [vmem:[%s6420_s7 + $0x88] ss:$16 sps:$4 sm:$0xff]  }
 0x1dd   : > { %1088 = vmatpush1.bf16.msra.mxu1 %v3990_v62  ;;  %v4505_v62 = vld [vmem:[%s6420_s7 + $0xac] ss:$16 sps:$4 sm:$0xff]  }
 0x1de   : > { %1089 = vmatprep.subr.bf16.mxu1 %v3999_v63  ;;  %2906 = vmatpush1.bf16.msra.mxu0 %v4494_v0  ;;  %v4503_v63 = vld [vmem:[%s6420_s7 + $0xa8] ss:$16 sps:$4 sm:$0xff]   ;;  %v4511_v0 = vld [vmem:[%s6420_s7 + $0xcc] ss:$16 sps:$4 sm:$0xff]  }
 0x1df   : > { %2907 = vmatprep.subr.bf16.mxu0 %v4502_v3  ;;  %v4509_v3 = vld [vmem:[%s6420_s7 + $0xc8] ss:$16 sps:$4 sm:$0xff]  }
 0x1e1   : > { %1090 = vmatpush1.bf16.msra.mxu1 %v3998_v4  ;;  %v4517_v4 = vld [vmem:[%s6420_s7 + $0xec] ss:$16 sps:$4 sm:$0xff]  }
 0x1e2   : > { %1091 = vmatprep.subr.bf16.mxu1 %v4007_v5  ;;  %2908 = vmatpush1.bf16.msra.mxu0 %v4500_v6  ;;  %v4538_v5 = vld [vmem:[%s6420_s7 + $0x164] ss:$16 sps:$4 sm:$0xff]   ;;  %v4536_v6 = vld [vmem:[%s6420_s7 + $0x160] ss:$16 sps:$4 sm:$0xff]  }
 0x1e3   : > { %2909 = vmatprep.subr.bf16.mxu0 %v4508_v9  ;;  %v4544_v9 = vld [vmem:[%s6420_s7 + $0x184] ss:$16 sps:$4 sm:$0xff]  }
 0x1e5   : > { %1092 = vmatpush1.bf16.msra.mxu1 %v4006_v10  ;;  %v4542_v10 = vld [vmem:[%s6420_s7 + $0x180] ss:$16 sps:$4 sm:$0xff]  }
 0x1e6   : > { %1093 = vmatprep.subr.bf16.mxu1 %v4015_v11  ;;  %2910 = vmatpush1.bf16.msra.mxu0 %v4506_v12  ;;  %v4521_v11 = vld [vmem:[%s6420_s7 + $0x108] ss:$16 sps:$4 sm:$0xff]   ;;  %v4529_v12 = vld [vmem:[%s6420_s7 + $0x12c] ss:$16 sps:$4 sm:$0xff]  }
 0x1e7   : > { %2911 = vmatprep.subr.bf16.mxu0 %v4514_v15  ;;  %v4527_v15 = vld [vmem:[%s6420_s7 + $0x128] ss:$16 sps:$4 sm:$0xff]  }
 0x1e9   : > { %1094 = vmatpush1.bf16.msra.mxu1 %v4014_v16  ;;  %v4535_v16 = vld [vmem:[%s6420_s7 + $0x14c] ss:$16 sps:$4 sm:$0xff]  }
 0x1ea   : > { %1165 = vmatprep.subr.bf16.mxu1 %v3963_v17  ;;  %2912 = vmatpush1.bf16.msra.mxu0 %v4512_v18  ;;  %v4556_v17 = vld [vmem:[%s6420_s7 + $0x1c4] ss:$16 sps:$4 sm:$0xff]   ;;  %v4554_v18 = vld [vmem:[%s6420_s7 + $0x1c0] ss:$16 sps:$4 sm:$0xff]  }
 0x1eb   : > { %2913 = vmatprep.subr.bf16.mxu0 %v4520_v21  ;;  %v4560_v21 = vld [vmem:[%s6420_s7 + $0x1e0] ss:$16 sps:$4 sm:$0xff]  }
 0x1ec   : > { %1112 = vmatmul.mubr.bf16.vlgmr.msra.gmra.mrb[12].mxu1 %v5223_v38 }
 0x1ed   : > { %1166 = vmatpush1.bf16.msra.mxu1 %v3962_v22  ;;  %1197 = vmatprep.mubr.bf16.mxu1 %v4992_v25  ;;  %v3987_v25 = vcombine.high %v636_v32, %v640_v33  ;;  %v4541_v22 = vld [vmem:[%s6420_s7 + $0x16c] ss:$16 sps:$4 sm:$0xff]   ;;  %v4563_v33 = vld [vmem:[%s6420_s7 + $0x1e8] ss:$16 sps:$4 sm:$0xff]  }
 0x1ee   : > { %1167 = vmatprep.subr.bf16.mxu1 %v3971_v23  ;;  %2914 = vmatpush1.bf16.msra.mxu0 %v4518_v24  ;;  %v4539_v23 = vld [vmem:[%s6420_s7 + $0x168] ss:$16 sps:$4 sm:$0xff]   ;;  %v4547_v24 = vld [vmem:[%s6420_s7 + $0x18c] ss:$16 sps:$4 sm:$0xff]  }
 0x1ef   : > { %2915 = vmatprep.subr.bf16.mxu0 %v4526_v28  ;;  %v4553_v28 = vld [vmem:[%s6420_s7 + $0x1ac] ss:$16 sps:$4 sm:$0xff]  }
 0x1f0   : > { %v4565_v32 = vld [vmem:[%s6420_s7 + $0x1ec] ss:$16 sps:$4 sm:$0xff]  }
 0x1f1   : > { %1168 = vmatpush1.bf16.msra.mxu1 %v3970_v29  ;;  %v4551_v29 = vld [vmem:[%s6420_s7 + $0x1a8] ss:$16 sps:$4 sm:$0xff]  }
 0x1f2   : > { %1169 = vmatprep.subr.bf16.mxu1 %v3979_v30  ;;  %2916 = vmatpush1.bf16.msra.mxu0 %v4524_v31  ;;  %v4559_v30 = vld [vmem:[%s6420_s7 + $0x1cc] ss:$16 sps:$4 sm:$0xff]   ;;  %v4557_v31 = vld [vmem:[%s6420_s7 + $0x1c8] ss:$16 sps:$4 sm:$0xff]  }
 0x1f3   : > { %2917 = vmatprep.subr.bf16.mxu0 %v4532_v1 }
 0x1f5   : > { %1170 = vmatpush1.bf16.msra.mxu1 %v3978_v34  ;;  %v4571_v34 = vld [vmem:[%s6420_s7 + $0x20c] ss:$16 sps:$4 sm:$0xff]  }
 0x1f6   : > { %1171 = vmatprep.subr.bf16.mxu1 %v3987_v25  ;;  %2918 = vmatpush1.bf16.msra.mxu0 %v4530_v2  ;;  %v676_v25 = vlaneseq }
 0x1f7   : > { %2919 = vmatprep.subr.bf16.mxu0 %v4538_v5 }
 0x1f8   : > { %v5510_v35 = vshrl.u32 %v676_v25, 7 }
 0x1f9   : > { %1172 = vmatpush1.bf16.msra.mxu1 %v3986_v37 }
 0x1fa   : > { %1173 = vmatprep.subr.bf16.mxu1 %v3995_v39  ;;  %2920 = vmatpush1.bf16.msra.mxu0 %v4536_v6  ;;  %v5513_v36 = vsub.s32 0, %v5510_v35  ;;  %v694_v37 = vsub.s32 4, %v5510_v35  ;;  %v5519_v39 = vld [vmem:[%s6419_s6] sm:$0xff]  ;;  %v5522_v40 = vsub.s32 1, %v5510_v35  ;;  %v698_v41 = vsub.s32 5, %v5510_v35 }
 0x1fb   : > { %2921 = vmatprep.subr.bf16.mxu0 %v4544_v9 }
 0x1fc   : > { %v683_v44 = vrot.slane %v5519_v39, %v5522_v40  ;;  %v699_v45 = vrot.slane %v5519_v39, %v698_v41  ;;  %v4581_v41 = vld [vmem:[%s6420_s7 + $0x248] ss:$16 sps:$4 sm:$0xff]  }
 0x1fd   : > { %1174 = vmatpush1.bf16.msra.mxu1 %v3994_v42  ;;  %v679_v42 = vrot.slane %v5519_v39, %v5513_v36 }
 0x1fe   : > { %1175 = vmatprep.subr.bf16.mxu1 %v4003_v43  ;;  %2922 = vmatpush1.bf16.msra.mxu0 %v4542_v10  ;;  %v695_v43 = vrot.slane %v5519_v39, %v694_v37  ;;  %v4578_v37 = vld [vmem:[%s6420_s7 + $0x240] ss:$16 sps:$4 sm:$0xff]  }
 0x1ff   : > { %2923 = vmatprep.subr.bf16.mxu0 %v4550_v13 }
 0x201   : > { %1176 = vmatpush1.bf16.msra.mxu1 %v4002_v46 }
 0x202   : > { %1177 = vmatprep.subr.bf16.mxu1 %v4011_v47  ;;  %2924 = vmatpush1.bf16.msra.mxu0 %v4548_v14 }
 0x203   : > { %2925 = vmatprep.subr.bf16.mxu0 %v4556_v17 }
 0x205   : > { %1178 = vmatpush1.bf16.msra.mxu1 %v4010_v50 }
 0x206   : > { %1179 = vmatprep.subr.bf16.mxu1 %v4019_v51  ;;  %2926 = vmatpush1.bf16.msra.mxu0 %v4554_v18 }
 0x207   : > { %2927 = vmatprep.subr.bf16.mxu0 %v4562_v19 }
 0x209   : > { %1180 = vmatpush1.bf16.msra.mxu1 %v4018_v52 }
 0x20a   : > { %3061 = vmatprep.subr.bf16.mxu1 %v4475_v53  ;;  %2928 = vmatpush1.bf16.msra.mxu0 %v4560_v21 }
 0x20b   : > { %2938 = vmatprep.subr.bf16.mxu0 %v4568_v26  ;;  %v4574_v26 = vld [vmem:[%s6420_s7 + $0x224] ss:$16 sps:$4 sm:$0xff]  }
 0x20c   : > { %1198 = vmatmul.mubr.bf16.vlgmr.msra.gmra.mrb[16].mxu1 %v5223_v38  ;;  %v4493_v38 = vld [vmem:[%s6420_s7 + $0x6c] ss:$16 sps:$4 sm:$0xff]  }
 0x20d   : > { %3062 = vmatpush1.bf16.msra.mxu1 %v4473_v54 }
 0x20e   : > { %3063 = vmatprep.subr.bf16.mxu1 %v4481_v55 }
 0x211   : > { %3064 = vmatpush1.bf16.msra.mxu1 %v4479_v56 }
 0x212   : > { %3065 = vmatprep.subr.bf16.mxu1 %v4487_v57 }
 0x215   : > { %3066 = vmatpush1.bf16.msra.mxu1 %v4485_v58 }
 0x216   : > { %3067 = vmatprep.subr.bf16.mxu1 %v4493_v38 }
 0x219   : > { %3068 = vmatpush1.bf16.msra.mxu1 %v4491_v59 }
 0x21a   : > { %3069 = vmatprep.subr.bf16.mxu1 %v4499_v60 }
 0x21d   : > { %3070 = vmatpush1.bf16.msra.mxu1 %v4497_v61 }
 0x21e   : > { %3071 = vmatprep.subr.bf16.mxu1 %v4505_v62 }
 0x221   : > { %3072 = vmatpush1.bf16.msra.mxu1 %v4503_v63 }
 0x222   : > { %3073 = vmatprep.subr.bf16.mxu1 %v4511_v0 }
 0x225   : > { %3074 = vmatpush1.bf16.msra.mxu1 %v4509_v3 }
 0x226   : > { %3075 = vmatprep.subr.bf16.mxu1 %v4517_v4 }
 0x229   : > { %3076 = vmatpush1.bf16.msra.mxu1 %v4515_v7 }
 0x22a   : > { %3077 = vmatprep.subr.bf16.mxu1 %v4523_v8 }
 0x22d   : > { %3078 = vmatpush1.bf16.msra.mxu1 %v4521_v11 }
 0x22e   : > { %3079 = vmatprep.subr.bf16.mxu1 %v4529_v12 }
 0x231   : > { %3080 = vmatpush1.bf16.msra.mxu1 %v4527_v15 }
 0x232   : > { %3081 = vmatprep.subr.bf16.mxu1 %v4535_v16 }
 0x235   : > { %3082 = vmatpush1.bf16.msra.mxu1 %v4533_v20 }
 0x236   : > { %3083 = vmatprep.subr.bf16.mxu1 %v4541_v22  ;;  %v4566_v22 = vld [vmem:[%s6420_s7 + $0x200] ss:$16 sps:$4 sm:$0xff]  }
 0x239   : > { %3084 = vmatpush1.bf16.msra.mxu1 %v4539_v23  ;;  %v4569_v23 = vld [vmem:[%s6420_s7 + $0x208] ss:$16 sps:$4 sm:$0xff]  }
 0x23a   : > { %3085 = vmatprep.subr.bf16.mxu1 %v4547_v24 }
 0x23d   : > { %3086 = vmatpush1.bf16.msra.mxu1 %v4545_v27  ;;  %v4577_v27 = vld [vmem:[%s6420_s7 + $0x22c] ss:$16 sps:$4 sm:$0xff]  }
 0x23e   : > { %3087 = vmatprep.subr.bf16.mxu1 %v4553_v28  ;;  %v686_v28 = vsub.s32 2, %v5510_v35 }
 0x241   : > { %3088 = vmatpush1.bf16.msra.mxu1 %v4551_v29  ;;  %v4572_v29 = vld [vmem:[%s6420_s7 + $0x220] ss:$16 sps:$4 sm:$0xff]  }
 0x242   : > { %3089 = vmatprep.subr.bf16.mxu1 %v4559_v30  ;;  %v4575_v30 = vld [vmem:[%s6420_s7 + $0x228] ss:$16 sps:$4 sm:$0xff]  }
 0x245   : > { %3090 = vmatpush1.bf16.msra.mxu1 %v4557_v31  ;;  %v690_v31 = vsub.s32 3, %v5510_v35 }
 0x246   : > { %3091 = vmatprep.subr.bf16.mxu1 %v4565_v32  ;;  %v4580_v32 = vld [vmem:[%s6420_s7 + $0x244] ss:$16 sps:$4 sm:$0xff]  }
 0x247   : > { %v691_v25 = vrot.slane %v5519_v39, %v690_v31 }
 0x249   : > { %3092 = vmatpush1.bf16.msra.mxu1 %v4563_v33  ;;  %v4583_v33 = vld [vmem:[%s6420_s7 + $0x24c] ss:$16 sps:$4 sm:$0xff]  }
 0x24a   : > { %3102 = vmatprep.subr.bf16.mxu1 %v4571_v34  ;;  %v687_v34 = vrot.slane %v5519_v39, %v686_v28 }
 0x29f   : > { %v1070_v46 = vpop.f32.mrb[8].mxu1  ;;  %v1156_v47 = vpop.f32.mrb[0].mxu0 }
 0x2a0   : > { %v1071_v48 = vadd.f32 %v1070_v46, %v679_v42  ;;  %v1157_v49 = vadd.f32 %v1156_v47, %v695_v43  ;;  %v1072_v50 = vpop.f32.mrb[9].mxu1  ;;  %v1158_v51 = vpop.f32.mrb[1].mxu0 }
 0x2a1   : > { %v1073_v52 = vadd.f32 %v1072_v50, %v683_v44  ;;  %v1159_v53 = vadd.f32 %v1158_v51, %v699_v45  ;;  %v1074_v54 = vpop.f32.mrb[10].mxu1  ;;  %v1160_v55 = vpop.f32.mrb[2].mxu0  ;;  %v4587_v50 = vld [vmem:[%s6420_s7 + $0x268] ss:$16 sps:$4 sm:$0xff]  }
 0x2a2   : > { %v1075_v56 = vadd.f32 %v1074_v54, %v679_v42  ;;  %v1161_v57 = vadd.f32 %v1160_v55, %v695_v43  ;;  %v1076_v58 = vpop.f32.mrb[11].mxu1  ;;  %v1162_v38 = vpop.f32.mrb[3].mxu0  ;;  %v1208_v61 = vmax.f32 %v1071_v48, 0.0  ;;  %v1212_v62 = vmax.f32 %v1157_v49, 0.0  ;;  %v4586_v42 = vld [vmem:[%s6420_s7 + $0x264] ss:$16 sps:$4 sm:$0xff]  }
 0x2a3   : > { %v1077_v59 = vadd.f32 %v1076_v58, %v683_v44  ;;  %v1163_v60 = vadd.f32 %v1162_v38, %v699_v45  ;;  %v1209_v1 = vmax.f32 %v1073_v52, 0.0  ;;  %v1213_v2 = vmax.f32 %v1159_v53, 0.0  ;;  %v4589_v43 = vld [vmem:[%s6420_s7 + $0x26c] ss:$16 sps:$4 sm:$0xff]   ;;  %v4584_v49 = vld [vmem:[%s6420_s7 + $0x260] ss:$16 sps:$4 sm:$0xff]  }
 0x2a4   : > { %v1216_v63 = vmax.f32 %v1075_v56, 0.0  ;;  %v1220_v0 = vmax.f32 %v1161_v57, 0.0  ;;  %v4592_v53 = vld [vmem:[%s6420_s7 + $0x284] ss:$16 sps:$4 sm:$0xff]   ;;  %v4595_v54 = vld [vmem:[%s6420_s7 + $0x28c] ss:$16 sps:$4 sm:$0xff]  }
 0x2a5   : > { %v1217_v3 = vmax.f32 %v1077_v59, 0.0  ;;  %v1221_v4 = vmax.f32 %v1163_v60, 0.0  ;;  %v4590_v59 = vld [vmem:[%s6420_s7 + $0x280] ss:$16 sps:$4 sm:$0xff]   ;;  %v4593_v60 = vld [vmem:[%s6420_s7 + $0x288] ss:$16 sps:$4 sm:$0xff]  }
 0x2a6   : > { %v1224_v5 = vmax.f32 %v1208_v61, %v1216_v63  ;;  %v5531_v6 = vmax.f32 %v1212_v62, %v1220_v0  ;;  %v4598_v62 = vld [vmem:[%s6420_s7 + $0x2a4] ss:$16 sps:$4 sm:$0xff]   ;;  %v4601_v63 = vld [vmem:[%s6420_s7 + $0x2ac] ss:$16 sps:$4 sm:$0xff]  }
 0x2a7   : > { %v1225_v7 = vmax.f32 %v1209_v1, %v1217_v3  ;;  %v5533_v8 = vmax.f32 %v1213_v2, %v1221_v4  ;;  %v4596_v2 = vld [vmem:[%s6420_s7 + $0x2a0] ss:$16 sps:$4 sm:$0xff]   ;;  %v4599_v3 = vld [vmem:[%s6420_s7 + $0x2a8] ss:$16 sps:$4 sm:$0xff]   ;;  %v4604_v4 = vld [vmem:[%s6420_s7 + $0x2c4] ss:$16 sps:$4 sm:$0xff]  }
 0x2a8   : > { %v1283_v9 = vrot.slane %v1224_v5, 4 }
 0x2a9   : > { %v1289_v10 = vrot.slane %v1225_v7, 4 }
 0x2aa   : > { %v1284_v11 = vmax.f32 %v1224_v5, %v1283_v9  ;;  %v4607_v5 = vld [vmem:[%s6420_s7 + $0x2cc] ss:$16 sps:$4 sm:$0xff]  }
 0x2ab   : > { %v1290_v12 = vmax.f32 %v1225_v7, %v1289_v10  ;;  %v4602_v10 = vld [vmem:[%s6420_s7 + $0x2c0] ss:$16 sps:$4 sm:$0xff]  }
 0x2ac   : > { %v1285_v13 = vrot.slane %v1284_v11, 2 }
 0x2ad   : > { %v1291_v14 = vrot.slane %v1290_v12, 2 }
 0x2ae   : > { %v1286_v15 = vmax.f32 %v1284_v11, %v1285_v13  ;;  %v4605_v11 = vld [vmem:[%s6420_s7 + $0x2c8] ss:$16 sps:$4 sm:$0xff]   ;;  %v4613_v13 = vld [vmem:[%s6420_s7 + $0x2ec] ss:$16 sps:$4 sm:$0xff]  }
 0x2af   : > { %v1292_v16 = vmax.f32 %v1290_v12, %v1291_v14  ;;  %v4610_v12 = vld [vmem:[%s6420_s7 + $0x2e4] ss:$16 sps:$4 sm:$0xff]  }
 0x2b0   : > { %v1287_v17 = vrot.slane %v1286_v15, 1 }
 0x2b1   : > { %v1293_v18 = vrot.slane %v1292_v16, 1 }
 0x2b2   : > { %v1288_v19 = vmax.f32 %v1286_v15, %v1287_v17  ;;  %v4608_v15 = vld [vmem:[%s6420_s7 + $0x2e0] ss:$16 sps:$4 sm:$0xff]  }
 0x2b3   : > { %v1294_v20 = vmax.f32 %v1292_v16, %v1293_v18  ;;  %v4611_v16 = vld [vmem:[%s6420_s7 + $0x2e8] ss:$16 sps:$4 sm:$0xff]   ;;  %v4616_v18 = vld [vmem:[%s6420_s7 + $0x304] ss:$16 sps:$4 sm:$0xff]  }
 0x2b4   : > { %v1331_v24 = vpack.c.bf16 %v1288_v19, %v1288_v19  ;;  %v4619_v19 = vld [vmem:[%s6420_s7 + $0x30c] ss:$16 sps:$4 sm:$0xff]  }
 0x2b5   : > { %v1332_v21 = vpack.c.bf16 %v1294_v20, %v1294_v20 }
 0x2b7   : > { %2929 = vmatprep.mubr.bf16.mxu0 %v1332_v21  ;;  %3093 = vmatprep.mubr.bf16.mxu1 %v1332_v21 }
 0x2b8   : > { %2930 = vmatmul.mubr.bf16.vlgmr.msra.gmra.mrb[4].mxu0 %v1331_v24  ;;  %3094 = vmatmul.mubr.bf16.vlgmr.msra.gmra.mrb[20].mxu1 %v1331_v24  ;;  %v4622_v24 = vld [vmem:[%s6420_s7 + $0x324] ss:$16 sps:$4 sm:$0xff]  }
 0x2b9   : > { %2939 = vmatpush1.bf16.msra.mxu0 %v4566_v22  ;;  %3103 = vmatpush1.bf16.msra.mxu1 %v4569_v23  ;;  %v4614_v22 = vld [vmem:[%s6420_s7 + $0x300] ss:$16 sps:$4 sm:$0xff]   ;;  %v4617_v23 = vld [vmem:[%s6420_s7 + $0x308] ss:$16 sps:$4 sm:$0xff]  }
 0x2ba   : > { %2940 = vmatprep.subr.bf16.mxu0 %v4574_v26  ;;  %3104 = vmatprep.subr.bf16.mxu1 %v4577_v27  ;;  %v4625_v26 = vld [vmem:[%s6420_s7 + $0x32c] ss:$16 sps:$4 sm:$0xff]   ;;  %v702_v27 = vsub.s32 6, %v5510_v35 }
 0x2bd   : > { %2941 = vmatpush1.bf16.msra.mxu0 %v4572_v29  ;;  %3105 = vmatpush1.bf16.msra.mxu1 %v4575_v30  ;;  %v4620_v29 = vld [vmem:[%s6420_s7 + $0x320] ss:$16 sps:$4 sm:$0xff]   ;;  %v4623_v30 = vld [vmem:[%s6420_s7 + $0x328] ss:$16 sps:$4 sm:$0xff]  }
 0x2be   : > { %2942 = vmatprep.subr.bf16.mxu0 %v4580_v32  ;;  %3106 = vmatprep.subr.bf16.mxu1 %v4583_v33  ;;  %v706_v32 = vsub.s32 7, %v5510_v35  ;;  %v4628_v33 = vld [vmem:[%s6420_s7 + $0x344] ss:$16 sps:$4 sm:$0xff]   ;;  %v4947_v35 = vld [vmem:[%s6422_s9 + $0x1f0] ss:$8 sps:$4 sm:$0xff]  }
 0x2bf   : > { %v1113_v44 = vpop.f32.mrb[12].mxu1 }
 0x2c0   : > { %v1114_v45 = vadd.f32 %v1113_v44, %v687_v34  ;;  %v1115_v46 = vpop.f32.mrb[13].mxu1  ;;  %v4634_v44 = vld [vmem:[%s6420_s7 + $0x364] ss:$16 sps:$4 sm:$0xff]  }
 0x2c1   : > { %v1116_v47 = vadd.f32 %v1115_v46, %v691_v25  ;;  %v1117_v48 = vpop.f32.mrb[14].mxu1  ;;  %2943 = vmatpush1.bf16.msra.mxu0 %v4578_v37  ;;  %3107 = vmatpush1.bf16.msra.mxu1 %v4581_v41  ;;  %v707_v37 = vrot.slane %v5519_v39, %v706_v32  ;;  %v4626_v41 = vld [vmem:[%s6420_s7 + $0x340] ss:$16 sps:$4 sm:$0xff]  }
 0x2c2   : > { %v1118_v51 = vadd.f32 %v1117_v48, %v687_v34  ;;  %v1119_v52 = vpop.f32.mrb[15].mxu1  ;;  %2944 = vmatprep.subr.bf16.mxu0 %v4586_v42  ;;  %3108 = vmatprep.subr.bf16.mxu1 %v4589_v43  ;;  %v1210_v56 = vmax.f32 %v1114_v45, 0.0  ;;  %v4631_v34 = vld [vmem:[%s6420_s7 + $0x34c] ss:$16 sps:$4 sm:$0xff]   ;;  %v4629_v42 = vld [vmem:[%s6420_s7 + $0x348] ss:$16 sps:$4 sm:$0xff]  }
 0x2c3   : > { %v1120_v55 = vadd.f32 %v1119_v52, %v691_v25  ;;  %v1211_v58 = vmax.f32 %v1116_v47, 0.0  ;;  %v703_v25 = vrot.slane %v5519_v39, %v702_v27  ;;  %v4637_v39 = vld [vmem:[%s6420_s7 + $0x36c] ss:$16 sps:$4 sm:$0xff]   ;;  %v1313_v45 = vrot.slane %v5533_v8, 4  ;;  %v4635_v52 = vld [vmem:[%s6420_s7 + $0x368] ss:$16 sps:$4 sm:$0xff]  }
 0x2c4   : > { %v1218_v57 = vmax.f32 %v1118_v51, 0.0  ;;  %v4632_v51 = vld [vmem:[%s6420_s7 + $0x360] ss:$16 sps:$4 sm:$0xff]  }
 0x2c5   : > { %v1219_v38 = vmax.f32 %v1120_v55, 0.0  ;;  %2945 = vmatpush1.bf16.msra.mxu0 %v4584_v49  ;;  %3109 = vmatpush1.bf16.msra.mxu1 %v4587_v50  ;;  %v4662_v27 = vld [vmem:[%s6420_s7 + $0x400] ss:$16 sps:$4 sm:$0xff]  }
 0x2c6   : > { %v5597_v61 = vmax.f32 %v1210_v56, %v1218_v57  ;;  %2946 = vmatprep.subr.bf16.mxu0 %v4592_v53  ;;  %3110 = vmatprep.subr.bf16.mxu1 %v4595_v54  ;;  %v4640_v56 = vld [vmem:[%s6420_s7 + $0x384] ss:$16 sps:$4 sm:$0xff]   ;;  %v4643_v57 = vld [vmem:[%s6420_s7 + $0x38c] ss:$16 sps:$4 sm:$0xff]  }
 0x2c7   : > { %v1227_v0 = vmax.f32 %v1211_v58, %v1219_v38  ;;  %v1314_v58 = vmax.f32 %v5533_v8, %v1313_v45  ;;  %v4646_v8 = vld [vmem:[%s6420_s7 + $0x3a4] ss:$16 sps:$4 sm:$0xff]   ;;  %v4685_v45 = vld [vmem:[%s6420_s7 + $0x46c] ss:$16 sps:$4 sm:$0xff]  }
 0x2c8   : > { %v1295_v43 = vrot.slane %v5597_v61, 4 }
 0x2c9   : > { %v1301_v1 = vrot.slane %v1227_v0, 4  ;;  %2947 = vmatpush1.bf16.msra.mxu0 %v4590_v59  ;;  %3111 = vmatpush1.bf16.msra.mxu1 %v4593_v60 }
 0x2ca   : > { %2948 = vmatprep.subr.bf16.mxu0 %v4598_v62  ;;  %3112 = vmatprep.subr.bf16.mxu1 %v4601_v63  ;;  %v1296_v53 = vmax.f32 %v5597_v61, %v1295_v43  ;;  %v4638_v61 = vld [vmem:[%s6420_s7 + $0x380] ss:$16 sps:$4 sm:$0xff]  }
 0x2cb   : > { %v1302_v7 = vmax.f32 %v1227_v0, %v1301_v1  ;;  %v4641_v0 = vld [vmem:[%s6420_s7 + $0x388] ss:$16 sps:$4 sm:$0xff]   ;;  %v4674_v43 = vld [vmem:[%s6420_s7 + $0x440] ss:$16 sps:$4 sm:$0xff]  }
 0x2cc   : > { %v1297_v1 = vrot.slane %v1296_v53, 2 }
 0x2cd   : > { %v1303_v9 = vrot.slane %v1302_v7, 2  ;;  %2949 = vmatpush1.bf16.msra.mxu0 %v4596_v2  ;;  %3113 = vmatpush1.bf16.msra.mxu1 %v4599_v3  ;;  %v4649_v3 = vld [vmem:[%s6420_s7 + $0x3ac] ss:$16 sps:$4 sm:$0xff]  }
 0x2ce   : > { %2950 = vmatprep.subr.bf16.mxu0 %v4604_v4  ;;  %3114 = vmatprep.subr.bf16.mxu1 %v4607_v5  ;;  %v1315_v4 = vrot.slane %v1314_v58, 2 }
 0x2cf   : > { %v1304_v14 = vmax.f32 %v1302_v7, %v1303_v9  ;;  %v4644_v7 = vld [vmem:[%s6420_s7 + $0x3a0] ss:$16 sps:$4 sm:$0xff]   ;;  %v4647_v9 = vld [vmem:[%s6420_s7 + $0x3a8] ss:$16 sps:$4 sm:$0xff]  }
 0x2d1   : > { %2951 = vmatpush1.bf16.msra.mxu0 %v4602_v10  ;;  %3115 = vmatpush1.bf16.msra.mxu1 %v4605_v11  ;;  %v1305_v17 = vrot.slane %v1304_v14, 1  ;;  %v1298_v10 = vmax.f32 %v1296_v53, %v1297_v1  ;;  %v4652_v11 = vld [vmem:[%s6420_s7 + $0x3c4] ss:$16 sps:$4 sm:$0xff]   ;;  %v4697_v53 = vld [vmem:[%s6420_s7 + $0x4ac] ss:$16 sps:$4 sm:$0xff]  }
 0x2d2   : > { %2952 = vmatprep.subr.bf16.mxu0 %v4610_v12  ;;  %3116 = vmatprep.subr.bf16.mxu1 %v4613_v13  ;;  %v4655_v12 = vld [vmem:[%s6420_s7 + $0x3cc] ss:$16 sps:$4 sm:$0xff]   ;;  %v1316_v13 = vmax.f32 %v1314_v58, %v1315_v4  ;;  %v4698_v58 = vld [vmem:[%s6420_s7 + $0x4c0] ss:$16 sps:$4 sm:$0xff]  }
 0x2d3   : > { %v1306_v20 = vmax.f32 %v1304_v14, %v1305_v17  ;;  %v4650_v14 = vld [vmem:[%s6420_s7 + $0x3c0] ss:$16 sps:$4 sm:$0xff]   ;;  %v4658_v17 = vld [vmem:[%s6420_s7 + $0x3e4] ss:$16 sps:$4 sm:$0xff]   ;;  %v4721_v4 = vld [vmem:[%s6420_s7 + $0x52c] ss:$16 sps:$4 sm:$0xff]  }
 0x2d4   : > { %v4710_v1 = vld [vmem:[%s6420_s7 + $0x500] ss:$16 sps:$4 sm:$0xff]  }
 0x2d5   : > { %2953 = vmatpush1.bf16.msra.mxu0 %v4608_v15  ;;  %3117 = vmatpush1.bf16.msra.mxu1 %v4611_v16  ;;  %v1334_v21 = vpack.c.bf16 %v1306_v20, %v1306_v20  ;;  %v4653_v15 = vld [vmem:[%s6420_s7 + $0x3c8] ss:$16 sps:$4 sm:$0xff]   ;;  %v1299_v16 = vrot.slane %v1298_v10, 1  ;;  %v4656_v20 = vld [vmem:[%s6420_s7 + $0x3e0] ss:$16 sps:$4 sm:$0xff]  }
 0x2d6   : > { %2954 = vmatprep.subr.bf16.mxu0 %v4616_v18  ;;  %3118 = vmatprep.subr.bf16.mxu1 %v4619_v19  ;;  %v4661_v18 = vld [vmem:[%s6420_s7 + $0x3ec] ss:$16 sps:$4 sm:$0xff]   ;;  %v1317_v19 = vrot.slane %v1316_v13, 1 }
 0x2d7   : > { %2970 = vmatprep.mubr.bf16.mxu0 %v1334_v21  ;;  %3134 = vmatprep.mubr.bf16.mxu1 %v1334_v21  ;;  %v4659_v21 = vld [vmem:[%s6420_s7 + $0x3e8] ss:$16 sps:$4 sm:$0xff]  }
 0x2d9   : > { %2955 = vmatpush1.bf16.msra.mxu0 %v4614_v22  ;;  %3119 = vmatpush1.bf16.msra.mxu1 %v4617_v23  ;;  %v1300_v22 = vmax.f32 %v1298_v10, %v1299_v16  ;;  %v4664_v23 = vld [vmem:[%s6420_s7 + $0x404] ss:$16 sps:$4 sm:$0xff]   ;;  %v4733_v16 = vld [vmem:[%s6420_s7 + $0x56c] ss:$16 sps:$4 sm:$0xff]  }
 0x2da   : > { %2956 = vmatprep.subr.bf16.mxu0 %v4622_v24  ;;  %3120 = vmatprep.subr.bf16.mxu1 %v4625_v26  ;;  %v4667_v24 = vld [vmem:[%s6420_s7 + $0x40c] ss:$16 sps:$4 sm:$0xff]   ;;  %v1318_v26 = vmax.f32 %v1316_v13, %v1317_v19  ;;  %v4724_v10 = vld [vmem:[%s6420_s7 + $0x544] ss:$16 sps:$4 sm:$0xff]   ;;  %v1307_v13 = vrot.slane %v5531_v6, 4 }
 0x2dc   : > { %v1336_v32 = vpack.c.bf16 %v1318_v26, %v1318_v26  ;;  %v1308_v19 = vmax.f32 %v5531_v6, %v1307_v13  ;;  %v4734_v6 = vld [vmem:[%s6420_s7 + $0x580] ss:$16 sps:$4 sm:$0xff]   ;;  %v4737_v26 = vld [vmem:[%s6420_s7 + $0x588] ss:$16 sps:$4 sm:$0xff]  }
 0x2dd   : > { %2957 = vmatpush1.bf16.msra.mxu0 %v4620_v29  ;;  %3121 = vmatpush1.bf16.msra.mxu1 %v4623_v30  ;;  %v1333_v29 = vpack.c.bf16 %v1300_v22, %v1300_v22  ;;  %v4665_v30 = vld [vmem:[%s6420_s7 + $0x408] ss:$16 sps:$4 sm:$0xff]   ;;  %v4739_v22 = vld [vmem:[%s6420_s7 + $0x58c] ss:$16 sps:$4 sm:$0xff]  }
 0x2de   : > { %2958 = vmatprep.subr.bf16.mxu0 %v4628_v33  ;;  %3122 = vmatprep.subr.bf16.mxu1 %v4631_v34  ;;  %v4670_v33 = vld [vmem:[%s6420_s7 + $0x424] ss:$16 sps:$4 sm:$0xff]   ;;  %v4673_v34 = vld [vmem:[%s6420_s7 + $0x42c] ss:$16 sps:$4 sm:$0xff]   ;;  %v4791_v13 = vld [vmem:[%s6420_s7 + $0x6a8] ss:$16 sps:$4 sm:$0xff]  }
 0x2df   : > { %v1199_v46 = vpop.f32.mrb[16].mxu1 }
 0x2e0   : > { %v1200_v47 = vadd.f32 %v1199_v46, %v703_v25  ;;  %v1201_v48 = vpop.f32.mrb[17].mxu1  ;;  %v4680_v46 = vld [vmem:[%s6420_s7 + $0x460] ss:$16 sps:$4 sm:$0xff]  }
 0x2e1   : > { %v1202_v49 = vadd.f32 %v1201_v48, %v707_v37  ;;  %v1203_v50 = vpop.f32.mrb[18].mxu1  ;;  %2959 = vmatpush1.bf16.msra.mxu0 %v4626_v41  ;;  %3123 = vmatpush1.bf16.msra.mxu1 %v4629_v42  ;;  %v4676_v41 = vld [vmem:[%s6420_s7 + $0x444] ss:$16 sps:$4 sm:$0xff]   ;;  %v4679_v42 = vld [vmem:[%s6420_s7 + $0x44c] ss:$16 sps:$4 sm:$0xff]  }
 0x2e2   : > { %v1204_v54 = vadd.f32 %v1203_v50, %v703_v25  ;;  %v1205_v55 = vpop.f32.mrb[19].mxu1  ;;  %2960 = vmatprep.subr.bf16.mxu0 %v4634_v44  ;;  %3124 = vmatprep.subr.bf16.mxu1 %v4637_v39  ;;  %v1214_v59 = vmax.f32 %v1200_v47, 0.0  ;;  %v4668_v25 = vld [vmem:[%s6420_s7 + $0x420] ss:$16 sps:$4 sm:$0xff]   ;;  %v4677_v44 = vld [vmem:[%s6420_s7 + $0x448] ss:$16 sps:$4 sm:$0xff]  }
 0x2e3   : > { %v1206_v38 = vadd.f32 %v1205_v55, %v707_v37  ;;  %v1215_v62 = vmax.f32 %v1202_v49, 0.0  ;;  %v4671_v37 = vld [vmem:[%s6420_s7 + $0x428] ss:$16 sps:$4 sm:$0xff]   ;;  %v4682_v39 = vld [vmem:[%s6420_s7 + $0x464] ss:$16 sps:$4 sm:$0xff]  }
 0x2e4   : > { %v1222_v60 = vmax.f32 %v1204_v54, 0.0  ;;  %v4683_v47 = vld [vmem:[%s6420_s7 + $0x468] ss:$16 sps:$4 sm:$0xff]   ;;  %v4688_v48 = vld [vmem:[%s6420_s7 + $0x484] ss:$16 sps:$4 sm:$0xff]  }
 0x2e5   : > { %v1223_v63 = vmax.f32 %v1206_v38, 0.0  ;;  %2961 = vmatpush1.bf16.msra.mxu0 %v4632_v51  ;;  %3125 = vmatpush1.bf16.msra.mxu1 %v4635_v52  ;;  %v4691_v49 = vld [vmem:[%s6420_s7 + $0x48c] ss:$16 sps:$4 sm:$0xff]   ;;  %v4686_v50 = vld [vmem:[%s6420_s7 + $0x480] ss:$16 sps:$4 sm:$0xff]  }
 0x2e6   : > { %v5703_v2 = vmax.f32 %v1214_v59, %v1222_v60  ;;  %2962 = vmatprep.subr.bf16.mxu0 %v4640_v56  ;;  %3126 = vmatprep.subr.bf16.mxu1 %v4643_v57  ;;  %v4689_v51 = vld [vmem:[%s6420_s7 + $0x488] ss:$16 sps:$4 sm:$0xff]   ;;  %v4694_v52 = vld [vmem:[%s6420_s7 + $0x4a4] ss:$16 sps:$4 sm:$0xff]   ;;  %v4692_v54 = vld [vmem:[%s6420_s7 + $0x4a0] ss:$16 sps:$4 sm:$0xff]  }
 0x2e7   : > { %v5711_v5 = vmax.f32 %v1215_v62, %v1223_v63  ;;  %v4695_v55 = vld [vmem:[%s6420_s7 + $0x4a8] ss:$16 sps:$4 sm:$0xff]   ;;  %v4700_v56 = vld [vmem:[%s6420_s7 + $0x4c4] ss:$16 sps:$4 sm:$0xff]   ;;  %v4703_v57 = vld [vmem:[%s6420_s7 + $0x4cc] ss:$16 sps:$4 sm:$0xff]  }
 0x2e8   : > { %v4701_v38 = vld [vmem:[%s6420_s7 + $0x4c8] ss:$16 sps:$4 sm:$0xff]   ;;  %v4706_v59 = vld [vmem:[%s6420_s7 + $0x4e4] ss:$16 sps:$4 sm:$0xff]   ;;  %v4709_v60 = vld [vmem:[%s6420_s7 + $0x4ec] ss:$16 sps:$4 sm:$0xff]  }
 0x2e9   : > { %2963 = vmatpush1.bf16.msra.mxu0 %v4638_v61  ;;  %3127 = vmatpush1.bf16.msra.mxu1 %v4641_v0  ;;  %v4704_v62 = vld [vmem:[%s6420_s7 + $0x4e0] ss:$16 sps:$4 sm:$0xff]   ;;  %v4707_v63 = vld [vmem:[%s6420_s7 + $0x4e8] ss:$16 sps:$4 sm:$0xff]   ;;  %v4712_v61 = vld [vmem:[%s6420_s7 + $0x504] ss:$16 sps:$4 sm:$0xff]  }
 0x2ea   : > { %2964 = vmatprep.subr.bf16.mxu0 %v4646_v8  ;;  %3128 = vmatprep.subr.bf16.mxu1 %v4649_v3  ;;  %v4715_v0 = vld [vmem:[%s6420_s7 + $0x50c] ss:$16 sps:$4 sm:$0xff]   ;;  %v4713_v8 = vld [vmem:[%s6420_s7 + $0x508] ss:$16 sps:$4 sm:$0xff]   ;;  %v4718_v3 = vld [vmem:[%s6420_s7 + $0x524] ss:$16 sps:$4 sm:$0xff]  }
 0x2ed   : > { %2965 = vmatpush1.bf16.msra.mxu0 %v4644_v7  ;;  %3129 = vmatpush1.bf16.msra.mxu1 %v4647_v9  ;;  %v4716_v7 = vld [vmem:[%s6420_s7 + $0x520] ss:$16 sps:$4 sm:$0xff]   ;;  %v4719_v9 = vld [vmem:[%s6420_s7 + $0x528] ss:$16 sps:$4 sm:$0xff]  }
 0x2ee   : > { %2966 = vmatprep.subr.bf16.mxu0 %v4652_v11  ;;  %3130 = vmatprep.subr.bf16.mxu1 %v4655_v12  ;;  %v4727_v11 = vld [vmem:[%s6420_s7 + $0x54c] ss:$16 sps:$4 sm:$0xff]   ;;  %v4722_v12 = vld [vmem:[%s6420_s7 + $0x540] ss:$16 sps:$4 sm:$0xff]  }
 0x2f1   : > { %2967 = vmatpush1.bf16.msra.mxu0 %v4650_v14  ;;  %3131 = vmatpush1.bf16.msra.mxu1 %v4653_v15  ;;  %v4725_v14 = vld [vmem:[%s6420_s7 + $0x548] ss:$16 sps:$4 sm:$0xff]   ;;  %v4730_v15 = vld [vmem:[%s6420_s7 + $0x564] ss:$16 sps:$4 sm:$0xff]  }
 0x2f2   : > { %2968 = vmatprep.subr.bf16.mxu0 %v4658_v17  ;;  %3132 = vmatprep.subr.bf16.mxu1 %v4661_v18  ;;  %v1325_v17 = vrot.slane %v5711_v5, 4  ;;  %v4728_v18 = vld [vmem:[%s6420_s7 + $0x560] ss:$16 sps:$4 sm:$0xff]  }
 0x2f5   : > { %2969 = vmatpush1.bf16.msra.mxu0 %v4656_v20  ;;  %3133 = vmatpush1.bf16.msra.mxu1 %v4659_v21  ;;  %v4731_v20 = vld [vmem:[%s6420_s7 + $0x568] ss:$16 sps:$4 sm:$0xff]   ;;  %v4736_v21 = vld [vmem:[%s6420_s7 + $0x584] ss:$16 sps:$4 sm:$0xff]  }
 0x2f6   : > { %2979 = vmatprep.subr.bf16.mxu0 %v4664_v23  ;;  %3143 = vmatprep.subr.bf16.mxu1 %v4667_v24  ;;  %v1326_v23 = vmax.f32 %v5711_v5, %v1325_v17  ;;  %v1309_v24 = vrot.slane %v1308_v19, 2  ;;  %v4745_v5 = vld [vmem:[%s6420_s7 + $0x5ac] ss:$16 sps:$4 sm:$0xff]   ;;  %v4797_v17 = vld [vmem:[%s6420_s7 + $0x6c8] ss:$16 sps:$4 sm:$0xff]  }
 0x2f8   : > { %2971 = vmatmul.mubr.bf16.vlgmr.msra.gmra.mrb[4].mxu0 %v1333_v29  ;;  %3135 = vmatmul.mubr.bf16.vlgmr.msra.gmra.mrb[20].mxu1 %v1333_v29  ;;  %v1327_v29 = vrot.slane %v1326_v23, 2 }
 0x2f9   : > { %2980 = vmatpush1.bf16.msra.mxu0 %v4662_v27  ;;  %3011 = vmatprep.mubr.bf16.mxu0 %v1336_v32  ;;  %v4742_v27 = vld [vmem:[%s6420_s7 + $0x5a4] ss:$16 sps:$4 sm:$0xff]  }
 0x2fa   : > { %3144 = vmatpush1.bf16.msra.mxu1 %v4665_v30  ;;  %3175 = vmatprep.mubr.bf16.mxu1 %v1336_v32  ;;  %v4740_v30 = vld [vmem:[%s6420_s7 + $0x5a0] ss:$16 sps:$4 sm:$0xff]   ;;  %v1310_v32 = vmax.f32 %v1308_v19, %v1309_v24  ;;  %v4805_v19 = vld [vmem:[%s6420_s7 + $0x6ec] ss:$16 sps:$4 sm:$0xff]   ;;  %v4809_v24 = vld [vmem:[%s6420_s7 + $0x708] ss:$16 sps:$4 sm:$0xff]  }
 0x2fb   : > { %2981 = vmatprep.subr.bf16.mxu0 %v4670_v33  ;;  %3145 = vmatprep.subr.bf16.mxu1 %v4673_v34  ;;  %v4743_v33 = vld [vmem:[%s6420_s7 + $0x5a8] ss:$16 sps:$4 sm:$0xff]   ;;  %v4748_v34 = vld [vmem:[%s6420_s7 + $0x5c4] ss:$16 sps:$4 sm:$0xff]  }
 0x2fd   : > { %2982 = vmatpush1.bf16.msra.mxu0 %v4668_v25  ;;  %v4751_v25 = vld [vmem:[%s6420_s7 + $0x5cc] ss:$16 sps:$4 sm:$0xff]  }
 0x2fe   : > { %3146 = vmatpush1.bf16.msra.mxu1 %v4671_v37  ;;  %2983 = vmatprep.subr.bf16.mxu0 %v4676_v41  ;;  %v1328_v37 = vmax.f32 %v1326_v23, %v1327_v29  ;;  %v4746_v41 = vld [vmem:[%s6420_s7 + $0x5c0] ss:$16 sps:$4 sm:$0xff]   ;;  %v4811_v23 = vld [vmem:[%s6420_s7 + $0x70c] ss:$16 sps:$4 sm:$0xff]   ;;  %v4815_v29 = vld [vmem:[%s6420_s7 + $0x728] ss:$16 sps:$4 sm:$0xff]  }
 0x2ff   : > { %3147 = vmatprep.subr.bf16.mxu1 %v4679_v42  ;;  %v1311_v42 = vrot.slane %v1310_v32, 1 }
 0x301   : > { %2984 = vmatpush1.bf16.msra.mxu0 %v4674_v43  ;;  %v4749_v43 = vld [vmem:[%s6420_s7 + $0x5c8] ss:$16 sps:$4 sm:$0xff]  }
 0x302   : > { %3148 = vmatpush1.bf16.msra.mxu1 %v4677_v44  ;;  %2985 = vmatprep.subr.bf16.mxu0 %v4682_v39  ;;  %v4754_v44 = vld [vmem:[%s6420_s7 + $0x5e4] ss:$16 sps:$4 sm:$0xff]   ;;  %v4757_v39 = vld [vmem:[%s6420_s7 + $0x5ec] ss:$16 sps:$4 sm:$0xff]  }
 0x303   : > { %3149 = vmatprep.subr.bf16.mxu1 %v4685_v45  ;;  %v1329_v45 = vrot.slane %v1328_v37, 1 }
 0x305   : > { %2986 = vmatpush1.bf16.msra.mxu0 %v4680_v46  ;;  %v4752_v46 = vld [vmem:[%s6420_s7 + $0x5e0] ss:$16 sps:$4 sm:$0xff]  }
 0x306   : > { %3150 = vmatpush1.bf16.msra.mxu1 %v4683_v47  ;;  %2987 = vmatprep.subr.bf16.mxu0 %v4688_v48  ;;  %v4755_v47 = vld [vmem:[%s6420_s7 + $0x5e8] ss:$16 sps:$4 sm:$0xff]   ;;  %v1312_v48 = vmax.f32 %v1310_v32, %v1311_v42  ;;  %v4823_v32 = vld [vmem:[%s6420_s7 + $0x74c] ss:$16 sps:$4 sm:$0xff]   ;;  %v4824_v42 = vld [vmem:[%s6420_s7 + $0x760] ss:$16 sps:$4 sm:$0xff]  }
 0x307   : > { %3151 = vmatprep.subr.bf16.mxu1 %v4691_v49  ;;  %v4760_v49 = vld [vmem:[%s6420_s7 + $0x604] ss:$16 sps:$4 sm:$0xff]  }
 0x309   : > { %2988 = vmatpush1.bf16.msra.mxu0 %v4686_v50  ;;  %v4763_v50 = vld [vmem:[%s6420_s7 + $0x60c] ss:$16 sps:$4 sm:$0xff]  }
 0x30a   : > { %3152 = vmatpush1.bf16.msra.mxu1 %v4689_v51  ;;  %2989 = vmatprep.subr.bf16.mxu0 %v4694_v52  ;;  %v1330_v51 = vmax.f32 %v1328_v37, %v1329_v45  ;;  %v4758_v52 = vld [vmem:[%s6420_s7 + $0x600] ss:$16 sps:$4 sm:$0xff]   ;;  %v4826_v37 = vld [vmem:[%s6420_s7 + $0x764] ss:$16 sps:$4 sm:$0xff]   ;;  %v4835_v45 = vld [vmem:[%s6420_s7 + $0x78c] ss:$16 sps:$4 sm:$0xff]  }
 0x30b   : > { %3153 = vmatprep.subr.bf16.mxu1 %v4697_v53  ;;  %v1335_v53 = vpack.c.bf16 %v1312_v48, %v1312_v48  ;;  %v4838_v48 = vld [vmem:[%s6420_s7 + $0x7a4] ss:$16 sps:$4 sm:$0xff]  }
 0x30d   : > { %2990 = vmatpush1.bf16.msra.mxu0 %v4692_v54  ;;  %v4761_v54 = vld [vmem:[%s6420_s7 + $0x608] ss:$16 sps:$4 sm:$0xff]  }
 0x30e   : > { %3154 = vmatpush1.bf16.msra.mxu1 %v4695_v55  ;;  %2991 = vmatprep.subr.bf16.mxu0 %v4700_v56  ;;  %v4766_v55 = vld [vmem:[%s6420_s7 + $0x624] ss:$16 sps:$4 sm:$0xff]   ;;  %v1338_v56 = vpack.c.bf16 %v1330_v51, %v1330_v51 }
 0x30f   : > { %3155 = vmatprep.subr.bf16.mxu1 %v4703_v57  ;;  %v4769_v57 = vld [vmem:[%s6420_s7 + $0x62c] ss:$16 sps:$4 sm:$0xff]  }
 0x311   : > { %2992 = vmatpush1.bf16.msra.mxu0 %v4698_v58  ;;  %v4764_v58 = vld [vmem:[%s6420_s7 + $0x620] ss:$16 sps:$4 sm:$0xff]  }
 0x312   : > { %3156 = vmatpush1.bf16.msra.mxu1 %v4701_v38  ;;  %2993 = vmatprep.subr.bf16.mxu0 %v4706_v59  ;;  %v4767_v38 = vld [vmem:[%s6420_s7 + $0x628] ss:$16 sps:$4 sm:$0xff]   ;;  %v4772_v59 = vld [vmem:[%s6420_s7 + $0x644] ss:$16 sps:$4 sm:$0xff]  }
 0x313   : > { %3157 = vmatprep.subr.bf16.mxu1 %v4709_v60  ;;  %v4775_v60 = vld [vmem:[%s6420_s7 + $0x64c] ss:$16 sps:$4 sm:$0xff]  }
 0x315   : > { %2994 = vmatpush1.bf16.msra.mxu0 %v4704_v62  ;;  %v4770_v62 = vld [vmem:[%s6420_s7 + $0x640] ss:$16 sps:$4 sm:$0xff]  }
 0x316   : > { %3158 = vmatpush1.bf16.msra.mxu1 %v4707_v63  ;;  %2995 = vmatprep.subr.bf16.mxu0 %v4712_v61  ;;  %v4773_v63 = vld [vmem:[%s6420_s7 + $0x648] ss:$16 sps:$4 sm:$0xff]   ;;  %v4778_v61 = vld [vmem:[%s6420_s7 + $0x664] ss:$16 sps:$4 sm:$0xff]  }
 0x317   : > { %3159 = vmatprep.subr.bf16.mxu1 %v4715_v0  ;;  %v4781_v0 = vld [vmem:[%s6420_s7 + $0x66c] ss:$16 sps:$4 sm:$0xff]  }
 0x319   : > { %2996 = vmatpush1.bf16.msra.mxu0 %v4710_v1  ;;  %v4776_v1 = vld [vmem:[%s6420_s7 + $0x660] ss:$16 sps:$4 sm:$0xff]  }
 0x31a   : > { %3160 = vmatpush1.bf16.msra.mxu1 %v4713_v8  ;;  %2997 = vmatprep.subr.bf16.mxu0 %v4718_v3  ;;  %v4779_v8 = vld [vmem:[%s6420_s7 + $0x668] ss:$16 sps:$4 sm:$0xff]   ;;  %v4784_v3 = vld [vmem:[%s6420_s7 + $0x684] ss:$16 sps:$4 sm:$0xff]  }
 0x31b   : > { %3161 = vmatprep.subr.bf16.mxu1 %v4721_v4  ;;  %v4787_v4 = vld [vmem:[%s6420_s7 + $0x68c] ss:$16 sps:$4 sm:$0xff]  }
 0x31d   : > { %2998 = vmatpush1.bf16.msra.mxu0 %v4716_v7  ;;  %v4782_v7 = vld [vmem:[%s6420_s7 + $0x680] ss:$16 sps:$4 sm:$0xff]  }
 0x31e   : > { %3162 = vmatpush1.bf16.msra.mxu1 %v4719_v9  ;;  %2999 = vmatprep.subr.bf16.mxu0 %v4724_v10  ;;  %v4785_v9 = vld [vmem:[%s6420_s7 + $0x688] ss:$16 sps:$4 sm:$0xff]   ;;  %v4790_v10 = vld [vmem:[%s6420_s7 + $0x6a4] ss:$16 sps:$4 sm:$0xff]  }
 0x31f   : > { %3163 = vmatprep.subr.bf16.mxu1 %v4727_v11  ;;  %v4793_v11 = vld [vmem:[%s6420_s7 + $0x6ac] ss:$16 sps:$4 sm:$0xff]  }
 0x321   : > { %3000 = vmatpush1.bf16.msra.mxu0 %v4722_v12  ;;  %v4788_v12 = vld [vmem:[%s6420_s7 + $0x6a0] ss:$16 sps:$4 sm:$0xff]  }
 0x322   : > { %3164 = vmatpush1.bf16.msra.mxu1 %v4725_v14  ;;  %3001 = vmatprep.subr.bf16.mxu0 %v4730_v15  ;;  %v4796_v14 = vld [vmem:[%s6420_s7 + $0x6c4] ss:$16 sps:$4 sm:$0xff]   ;;  %v4799_v15 = vld [vmem:[%s6420_s7 + $0x6cc] ss:$16 sps:$4 sm:$0xff]  }
 0x323   : > { %3165 = vmatprep.subr.bf16.mxu1 %v4733_v16  ;;  %v4794_v16 = vld [vmem:[%s6420_s7 + $0x6c0] ss:$16 sps:$4 sm:$0xff]  }
 0x325   : > { %3002 = vmatpush1.bf16.msra.mxu0 %v4728_v18  ;;  %v4802_v18 = vld [vmem:[%s6420_s7 + $0x6e4] ss:$16 sps:$4 sm:$0xff]  }
 0x326   : > { %3166 = vmatpush1.bf16.msra.mxu1 %v4731_v20  ;;  %3003 = vmatprep.subr.bf16.mxu0 %v4736_v21  ;;  %v4800_v20 = vld [vmem:[%s6420_s7 + $0x6e0] ss:$16 sps:$4 sm:$0xff]   ;;  %v4803_v21 = vld [vmem:[%s6420_s7 + $0x6e8] ss:$16 sps:$4 sm:$0xff]  }
 0x327   : > { %3167 = vmatprep.subr.bf16.mxu1 %v4739_v22  ;;  %v4808_v22 = vld [vmem:[%s6420_s7 + $0x704] ss:$16 sps:$4 sm:$0xff]  }
 0x329   : > { %3004 = vmatpush1.bf16.msra.mxu0 %v4734_v6  ;;  %v4806_v6 = vld [vmem:[%s6420_s7 + $0x700] ss:$16 sps:$4 sm:$0xff]  }
 0x32a   : > { %3168 = vmatpush1.bf16.msra.mxu1 %v4737_v26  ;;  %3005 = vmatprep.subr.bf16.mxu0 %v4742_v27  ;;  %v4814_v26 = vld [vmem:[%s6420_s7 + $0x724] ss:$16 sps:$4 sm:$0xff]   ;;  %v4817_v27 = vld [vmem:[%s6420_s7 + $0x72c] ss:$16 sps:$4 sm:$0xff]  }
 0x32b   : > { %3169 = vmatprep.subr.bf16.mxu1 %v4745_v5  ;;  %v4812_v5 = vld [vmem:[%s6420_s7 + $0x720] ss:$16 sps:$4 sm:$0xff]  }
 0x32d   : > { %3006 = vmatpush1.bf16.msra.mxu0 %v4740_v30  ;;  %v4820_v30 = vld [vmem:[%s6420_s7 + $0x744] ss:$16 sps:$4 sm:$0xff]  }
 0x32e   : > { %3170 = vmatpush1.bf16.msra.mxu1 %v4743_v33  ;;  %3007 = vmatprep.subr.bf16.mxu0 %v4748_v34  ;;  %v4818_v33 = vld [vmem:[%s6420_s7 + $0x740] ss:$16 sps:$4 sm:$0xff]   ;;  %v1319_v34 = vrot.slane %v5703_v2, 4 }
 0x32f   : > { %3171 = vmatprep.subr.bf16.mxu1 %v4751_v25  ;;  %v4821_v25 = vld [vmem:[%s6420_s7 + $0x748] ss:$16 sps:$4 sm:$0xff]  }
 0x331   : > { %3008 = vmatpush1.bf16.msra.mxu0 %v4746_v41  ;;  %v4829_v41 = vld [vmem:[%s6420_s7 + $0x76c] ss:$16 sps:$4 sm:$0xff]  }
 0x332   : > { %3172 = vmatpush1.bf16.msra.mxu1 %v4749_v43  ;;  %3009 = vmatprep.subr.bf16.mxu0 %v4754_v44  ;;  %v1320_v43 = vmax.f32 %v5703_v2, %v1319_v34  ;;  %v4827_v44 = vld [vmem:[%s6420_s7 + $0x768] ss:$16 sps:$4 sm:$0xff]   ;;  %v4830_v2 = vld [vmem:[%s6420_s7 + $0x780] ss:$16 sps:$4 sm:$0xff]  }
 0x333   : > { %3173 = vmatprep.subr.bf16.mxu1 %v4757_v39  ;;  %v4832_v39 = vld [vmem:[%s6420_s7 + $0x784] ss:$16 sps:$4 sm:$0xff]   ;;  %v4899_v34 = vld [vmem:[%s6422_s9 + $0xf0] ss:$8 sps:$4 sm:$0xff]  }
 0x335   : > { %3010 = vmatpush1.bf16.msra.mxu0 %v4752_v46  ;;  %v1321_v46 = vrot.slane %v1320_v43, 2 }
 0x336   : > { %3174 = vmatpush1.bf16.msra.mxu1 %v4755_v47  ;;  %3020 = vmatprep.subr.bf16.mxu0 %v4760_v49  ;;  %v4833_v47 = vld [vmem:[%s6420_s7 + $0x788] ss:$16 sps:$4 sm:$0xff]   ;;  %v4841_v49 = vld [vmem:[%s6420_s7 + $0x7ac] ss:$16 sps:$4 sm:$0xff]  }
 0x337   : > { %3184 = vmatprep.subr.bf16.mxu1 %v4763_v50  ;;  %v4836_v50 = vld [vmem:[%s6420_s7 + $0x7a0] ss:$16 sps:$4 sm:$0xff]   ;;  %v1322_v51 = vmax.f32 %v1320_v43, %v1321_v46  ;;  %v4953_v43 = vld [vmem:[%s6424_s11 + $0x8] sm:$0xff]  }
 0x338   : > { %3012 = vmatmul.mubr.bf16.vlgmr.msra.gmra.mrb[4].mxu0 %v1335_v53  ;;  %v4958_v46 = vld [vmem:[%s6424_s11 + $0x60] sm:$0xff]  }
 0x339   : > { %3176 = vmatmul.mubr.bf16.vlgmr.msra.gmra.mrb[20].mxu1 %v1335_v53  ;;  %3021 = vmatpush1.bf16.msra.mxu0 %v4758_v52  ;;  %v4839_v52 = vld [vmem:[%s6420_s7 + $0x7a8] ss:$16 sps:$4 sm:$0xff]   ;;  %v4844_v53 = vld [vmem:[%s6420_s7 + $0x7c4] ss:$16 sps:$4 sm:$0xff]  }
 0x33a   : > { %3052 = vmatprep.mubr.bf16.mxu0 %v1338_v56  ;;  %3185 = vmatpush1.bf16.msra.mxu1 %v4761_v54  ;;  %v4847_v54 = vld [vmem:[%s6420_s7 + $0x7cc] ss:$16 sps:$4 sm:$0xff]  }
 0x33b   : > { %3216 = vmatprep.mubr.bf16.mxu1 %v1338_v56  ;;  %3022 = vmatprep.subr.bf16.mxu0 %v4766_v55  ;;  %v4842_v55 = vld [vmem:[%s6420_s7 + $0x7c0] ss:$16 sps:$4 sm:$0xff]   ;;  %v1323_v56 = vrot.slane %v1322_v51, 1 }
 0x33c   : > { %3186 = vmatprep.subr.bf16.mxu1 %v4769_v57  ;;  %v4845_v57 = vld [vmem:[%s6420_s7 + $0x7c8] ss:$16 sps:$4 sm:$0xff]  }
 0x33d   : > { %3023 = vmatpush1.bf16.msra.mxu0 %v4764_v58  ;;  %v4850_v58 = vld [vmem:[%s6420_s7 + $0x7e4] ss:$16 sps:$4 sm:$0xff]  }
 0x33e   : > { %3187 = vmatpush1.bf16.msra.mxu1 %v4767_v38  ;;  %3024 = vmatprep.subr.bf16.mxu0 %v4772_v59  ;;  %v4853_v38 = vld [vmem:[%s6420_s7 + $0x7ec] ss:$16 sps:$4 sm:$0xff]   ;;  %v4848_v59 = vld [vmem:[%s6420_s7 + $0x7e0] ss:$16 sps:$4 sm:$0xff]  }
 0x33f   : > { %3188 = vmatprep.subr.bf16.mxu1 %v4775_v60  ;;  %v4851_v60 = vld [vmem:[%s6420_s7 + $0x7e8] ss:$16 sps:$4 sm:$0xff]  }
 0x341   : > { %3025 = vmatpush1.bf16.msra.mxu0 %v4770_v62  ;;  %v1324_v62 = vmax.f32 %v1322_v51, %v1323_v56 }
 0x342   : > { %3189 = vmatpush1.bf16.msra.mxu1 %v4773_v63  ;;  %3026 = vmatprep.subr.bf16.mxu0 %v4778_v61  ;;  %v4856_v63 = vld [vmem:[%s6422_s9 + $0x4] ss:$8 sps:$4 sm:$0xff]   ;;  %v4854_v61 = vld [vmem:[%s6422_s9] ss:$8 sps:$4 sm:$0xff]  }
 0x343   : > { %3190 = vmatprep.subr.bf16.mxu1 %v4781_v0  ;;  %v1337_v0 = vpack.c.bf16 %v1324_v62, %v1324_v62 }
 0x345   : > { %3027 = vmatpush1.bf16.msra.mxu0 %v4776_v1  ;;  %v4859_v1 = vld [vmem:[%s6422_s9 + $0x14] ss:$8 sps:$4 sm:$0xff]  }
 0x346   : > { %3191 = vmatpush1.bf16.msra.mxu1 %v4779_v8  ;;  %3028 = vmatprep.subr.bf16.mxu0 %v4784_v3  ;;  %v4857_v8 = vld [vmem:[%s6422_s9 + $0x10] ss:$8 sps:$4 sm:$0xff]   ;;  %v4862_v3 = vld [vmem:[%s6422_s9 + $0x24] ss:$8 sps:$4 sm:$0xff]  }
 0x347   : > { %3192 = vmatprep.subr.bf16.mxu1 %v4787_v4  ;;  %v4860_v4 = vld [vmem:[%s6422_s9 + $0x20] ss:$8 sps:$4 sm:$0xff]  }
 0x349   : > { %3029 = vmatpush1.bf16.msra.mxu0 %v4782_v7  ;;  %v4865_v7 = vld [vmem:[%s6422_s9 + $0x34] ss:$8 sps:$4 sm:$0xff]  }
 0x34a   : > { %3193 = vmatpush1.bf16.msra.mxu1 %v4785_v9  ;;  %3030 = vmatprep.subr.bf16.mxu0 %v4790_v10  ;;  %v4863_v9 = vld [vmem:[%s6422_s9 + $0x30] ss:$8 sps:$4 sm:$0xff]   ;;  %v4868_v10 = vld [vmem:[%s6422_s9 + $0x44] ss:$8 sps:$4 sm:$0xff]  }
 0x34b   : > { %3194 = vmatprep.subr.bf16.mxu1 %v4793_v11  ;;  %v4866_v11 = vld [vmem:[%s6422_s9 + $0x40] ss:$8 sps:$4 sm:$0xff]  }
 0x34d   : > { %3031 = vmatpush1.bf16.msra.mxu0 %v4788_v12  ;;  %v4871_v12 = vld [vmem:[%s6422_s9 + $0x54] ss:$8 sps:$4 sm:$0xff]  }
 0x34e   : > { %3195 = vmatpush1.bf16.msra.mxu1 %v4791_v13  ;;  %3032 = vmatprep.subr.bf16.mxu0 %v4796_v14  ;;  %v4869_v13 = vld [vmem:[%s6422_s9 + $0x50] ss:$8 sps:$4 sm:$0xff]   ;;  %v4874_v14 = vld [vmem:[%s6422_s9 + $0x64] ss:$8 sps:$4 sm:$0xff]  }
 0x34f   : > { %3196 = vmatprep.subr.bf16.mxu1 %v4799_v15  ;;  %v4872_v15 = vld [vmem:[%s6422_s9 + $0x60] ss:$8 sps:$4 sm:$0xff]  }
 0x351   : > { %3033 = vmatpush1.bf16.msra.mxu0 %v4794_v16  ;;  %v4877_v16 = vld [vmem:[%s6422_s9 + $0x74] ss:$8 sps:$4 sm:$0xff]  }
 0x352   : > { %3197 = vmatpush1.bf16.msra.mxu1 %v4797_v17  ;;  %3034 = vmatprep.subr.bf16.mxu0 %v4802_v18  ;;  %v4875_v17 = vld [vmem:[%s6422_s9 + $0x70] ss:$8 sps:$4 sm:$0xff]   ;;  %v4880_v18 = vld [vmem:[%s6422_s9 + $0x84] ss:$8 sps:$4 sm:$0xff]  }
 0x353   : > { %3198 = vmatprep.subr.bf16.mxu1 %v4805_v19  ;;  %v4878_v19 = vld [vmem:[%s6422_s9 + $0x80] ss:$8 sps:$4 sm:$0xff]  }
 0x355   : > { %3035 = vmatpush1.bf16.msra.mxu0 %v4800_v20  ;;  %v4883_v20 = vld [vmem:[%s6422_s9 + $0x94] ss:$8 sps:$4 sm:$0xff]  }
 0x356   : > { %3199 = vmatpush1.bf16.msra.mxu1 %v4803_v21  ;;  %3036 = vmatprep.subr.bf16.mxu0 %v4808_v22  ;;  %v4881_v21 = vld [vmem:[%s6422_s9 + $0x90] ss:$8 sps:$4 sm:$0xff]   ;;  %v4886_v22 = vld [vmem:[%s6422_s9 + $0xa4] ss:$8 sps:$4 sm:$0xff]  }
 0x357   : > { %3200 = vmatprep.subr.bf16.mxu1 %v4811_v23  ;;  %v4884_v23 = vld [vmem:[%s6422_s9 + $0xa0] ss:$8 sps:$4 sm:$0xff]  }
 0x359   : > { %3037 = vmatpush1.bf16.msra.mxu0 %v4806_v6  ;;  %v4889_v6 = vld [vmem:[%s6422_s9 + $0xb4] ss:$8 sps:$4 sm:$0xff]  }
 0x35a   : > { %3201 = vmatpush1.bf16.msra.mxu1 %v4809_v24  ;;  %3038 = vmatprep.subr.bf16.mxu0 %v4814_v26  ;;  %v4887_v24 = vld [vmem:[%s6422_s9 + $0xb0] ss:$8 sps:$4 sm:$0xff]   ;;  %v4892_v26 = vld [vmem:[%s6422_s9 + $0xc4] ss:$8 sps:$4 sm:$0xff]  }
 0x35b   : > { %3202 = vmatprep.subr.bf16.mxu1 %v4817_v27  ;;  %v4890_v27 = vld [vmem:[%s6422_s9 + $0xc0] ss:$8 sps:$4 sm:$0xff]  }
 0x35d   : > { %3039 = vmatpush1.bf16.msra.mxu0 %v4812_v5  ;;  %v4895_v5 = vld [vmem:[%s6422_s9 + $0xd4] ss:$8 sps:$4 sm:$0xff]  }
 0x35e   : > { %3203 = vmatpush1.bf16.msra.mxu1 %v4815_v29  ;;  %3040 = vmatprep.subr.bf16.mxu0 %v4820_v30  ;;  %v4893_v29 = vld [vmem:[%s6422_s9 + $0xd0] ss:$8 sps:$4 sm:$0xff]   ;;  %v4898_v30 = vld [vmem:[%s6422_s9 + $0xe4] ss:$8 sps:$4 sm:$0xff]  }
 0x35f   : > { %3204 = vmatprep.subr.bf16.mxu1 %v4823_v32  ;;  %v4896_v32 = vld [vmem:[%s6422_s9 + $0xe0] ss:$8 sps:$4 sm:$0xff]  }
 0x361   : > { %3041 = vmatpush1.bf16.msra.mxu0 %v4818_v33  ;;  %v4901_v33 = vld [vmem:[%s6422_s9 + $0xf4] ss:$8 sps:$4 sm:$0xff]  }
 0x362   : > { %3205 = vmatpush1.bf16.msra.mxu1 %v4821_v25  ;;  %3042 = vmatprep.subr.bf16.mxu0 %v4826_v37  ;;  %v4904_v25 = vld [vmem:[%s6422_s9 + $0x104] ss:$8 sps:$4 sm:$0xff]  }
 0x363   : > { %3206 = vmatprep.subr.bf16.mxu1 %v4829_v41  ;;  %v4950_v37 = vld [vmem:[%s6424_s11 + $0x40] sm:$0xff]  }
 0x364   : > { %v4951_v41 = vld [vmem:[%s6424_s11] sm:$0xff]  }
 0x365   : > { %3043 = vmatpush1.bf16.msra.mxu0 %v4824_v42  ;;  %v4952_v42 = vld [vmem:[%s6424_s11 + $0x48] sm:$0xff]  }
 0x366   : > { %3207 = vmatpush1.bf16.msra.mxu1 %v4827_v44  ;;  %3044 = vmatprep.subr.bf16.mxu0 %v4832_v39  ;;  %v4954_v44 = vld [vmem:[%s6424_s11 + $0x50] sm:$0xff]  }
 0x367   : > { %3208 = vmatprep.subr.bf16.mxu1 %v4835_v45  ;;  %v4955_v39 = vld [vmem:[%s6424_s11 + $0x10] sm:$0xff]   ;;  %v4956_v45 = vld [vmem:[%s6424_s11 + $0x58] sm:$0xff]  }
 0x369   : > { %3045 = vmatpush1.bf16.msra.mxu0 %v4830_v2  ;;  %v4957_v2 = vld [vmem:[%s6424_s11 + $0x18] sm:$0xff]  }
 0x36a   : > { %3209 = vmatpush1.bf16.msra.mxu1 %v4833_v47  ;;  %3046 = vmatprep.subr.bf16.mxu0 %v4838_v48  ;;  %v4959_v47 = vld [vmem:[%s6424_s11 + $0x20] sm:$0xff]   ;;  %v4960_v48 = vld [vmem:[%s6424_s11 + $0x68] sm:$0xff]  }
 0x36b   : > { %3210 = vmatprep.subr.bf16.mxu1 %v4841_v49  ;;  %v4961_v49 = vld [vmem:[%s6424_s11 + $0x28] sm:$0xff]  }
 0x36d   : > { %3047 = vmatpush1.bf16.msra.mxu0 %v4836_v50  ;;  %v6271_v50 = vld [vmem:[%s6421_s8] sm:$0xf] }
 0x36e   : > { %3211 = vmatpush1.bf16.msra.mxu1 %v4839_v52  ;;  %3048 = vmatprep.subr.bf16.mxu0 %v4844_v53  ;;  %v2880_v51 = vrot.slane %v6271_v50, %v5513_v36  ;;  %v2884_v52 = vrot.slane %v6271_v50, %v5522_v40  ;;  %v2892_v53 = vrot.slane %v6271_v50, %v690_v31  ;;  %v4902_v31 = vld [vmem:[%s6422_s9 + $0x100] ss:$8 sps:$4 sm:$0xff]  }
 0x36f   : > { %3212 = vmatprep.subr.bf16.mxu1 %v4847_v54 }
 0x371   : > { %3049 = vmatpush1.bf16.msra.mxu0 %v4842_v55 }
 0x372   : > { %3213 = vmatpush1.bf16.msra.mxu1 %v4845_v57  ;;  %3050 = vmatprep.subr.bf16.mxu0 %v4850_v58 }
 0x373   : > { %3214 = vmatprep.subr.bf16.mxu1 %v4853_v38 }
 0x375   : > { %3051 = vmatpush1.bf16.msra.mxu0 %v4848_v59 }
 0x376   : > { %3215 = vmatpush1.bf16.msra.mxu1 %v4851_v60  ;;  %3629 = vmatprep.subr.bf16.mxu0 %v4856_v63 }
 0x377   : > { %4365 = vmatprep.subr.bf16.mxu1 %v4950_v37  ;;  %v2888_v37 = vrot.slane %v6271_v50, %v686_v28 }
 0x378   : > { %3053 = vmatmul.mubr.bf16.vlgmr.msra.gmra.mrb[4].mxu0 %v1337_v0 }
 0x379   : > { %3217 = vmatmul.mubr.bf16.vlgmr.msra.gmra.mrb[20].mxu1 %v1337_v0  ;;  %3630 = vmatpush1.bf16.msra.mxu0 %v4854_v61 }
 0x37a   : > { %3631 = vmatprep.subr.bf16.mxu0 %v4859_v1  ;;  %4366 = vmatpush3.bf16.msra.mxu1 %v4951_v41  ;;  %v4946_v41 = vld [vmem:[%s6422_s9 + $0x1e4] ss:$8 sps:$4 sm:$0xff]  }
 0x37b   : > { %4367 = vmatprep.subr.bf16.mxu1 %v4952_v42  ;;  %v4944_v42 = vld [vmem:[%s6422_s9 + $0x1e0] ss:$8 sps:$4 sm:$0xff]  }
 0x37d   : > { %3632 = vmatpush1.bf16.msra.mxu0 %v4857_v8 }
 0x37e   : > { %3633 = vmatprep.subr.bf16.mxu0 %v4862_v3  ;;  %4368 = vmatpush3.bf16.msra.mxu1 %v4953_v43 }
 0x37f   : > { %4369 = vmatprep.subr.bf16.mxu1 %v4954_v44  ;;  %v4949_v44 = vld [vmem:[%s6422_s9 + $0x1f4] ss:$8 sps:$4 sm:$0xff]  }
 0x381   : > { %3634 = vmatpush1.bf16.msra.mxu0 %v4860_v4 }
 0x382   : > { %3635 = vmatprep.subr.bf16.mxu0 %v4865_v7  ;;  %4370 = vmatpush3.bf16.msra.mxu1 %v4955_v39  ;;  %v4907_v7 = vld [vmem:[%s6422_s9 + $0x114] ss:$8 sps:$4 sm:$0xff]  }
 0x383   : > { %4371 = vmatprep.subr.bf16.mxu1 %v4956_v45  ;;  %v4962_v45 = vld [vmem:[%s6424_s11 + $0x70] sm:$0xff]  }
 0x385   : > { %3636 = vmatpush1.bf16.msra.mxu0 %v4863_v9 }
 0x386   : > { %3637 = vmatprep.subr.bf16.mxu0 %v4868_v10  ;;  %4372 = vmatpush3.bf16.msra.mxu1 %v4957_v2  ;;  %v4905_v10 = vld [vmem:[%s6422_s9 + $0x110] ss:$8 sps:$4 sm:$0xff]  }
 0x387   : > { %4373 = vmatprep.subr.bf16.mxu1 %v4958_v46  ;;  %v4963_v2 = vld [vmem:[%s6424_s11 + $0x30] sm:$0xff]   ;;  %v4964_v46 = vld [vmem:[%s6424_s11 + $0x78] sm:$0xff]  }
 0x389   : > { %3638 = vmatpush1.bf16.msra.mxu0 %v4866_v11  ;;  %v4910_v11 = vld [vmem:[%s6422_s9 + $0x124] ss:$8 sps:$4 sm:$0xff]  }
 0x38a   : > { %3639 = vmatprep.subr.bf16.mxu0 %v4871_v12  ;;  %4374 = vmatpush3.bf16.msra.mxu1 %v4959_v47  ;;  %v4908_v12 = vld [vmem:[%s6422_s9 + $0x120] ss:$8 sps:$4 sm:$0xff]   ;;  %v4965_v47 = vld [vmem:[%s6424_s11 + $0x38] sm:$0xff]  }
 0x38b   : > { %4375 = vmatprep.subr.bf16.mxu1 %v4960_v48  ;;  %v3297_v48 = vld [vmem:[%s6423_s10] sm:$0x3] }
 0x38c   : > { %v3626_v50 = vrot.slane %v3297_v48, %v5522_v40 }
 0x38d   : > { %3640 = vmatpush1.bf16.msra.mxu0 %v4869_v13  ;;  %v4913_v13 = vld [vmem:[%s6422_s9 + $0x134] ss:$8 sps:$4 sm:$0xff]  }
 0x38e   : > { %3641 = vmatprep.subr.bf16.mxu0 %v4874_v14  ;;  %4376 = vmatpush3.bf16.msra.mxu1 %v4961_v49  ;;  %v4911_v14 = vld [vmem:[%s6422_s9 + $0x130] ss:$8 sps:$4 sm:$0xff]   ;;  %v3622_v49 = vrot.slane %v3297_v48, %v5513_v36  ;;  %v3747_v36 = vld [vmem:[%s6425_s12] sm:$0x1] }
 0x38f   : > { %4377 = vmatprep.subr.bf16.mxu1 %v4962_v45 }
 0x391   : > { %3642 = vmatpush1.bf16.msra.mxu0 %v4872_v15  ;;  %v4916_v15 = vld [vmem:[%s6422_s9 + $0x144] ss:$8 sps:$4 sm:$0xff]  }
 0x392   : > { %3643 = vmatprep.subr.bf16.mxu0 %v4877_v16  ;;  %v4914_v16 = vld [vmem:[%s6422_s9 + $0x140] ss:$8 sps:$4 sm:$0xff]   ;;  %4378 = vmatpush3.bf16.msra.mxu1 %v4963_v2 }
 0x393   : > { %4379 = vmatprep.subr.bf16.mxu1 %v4964_v46 }
 0x395   : > { %3644 = vmatpush1.bf16.msra.mxu0 %v4875_v17  ;;  %v4919_v17 = vld [vmem:[%s6422_s9 + $0x154] ss:$8 sps:$4 sm:$0xff]  }
 0x396   : > { %3645 = vmatprep.subr.bf16.mxu0 %v4880_v18  ;;  %v4917_v18 = vld [vmem:[%s6422_s9 + $0x150] ss:$8 sps:$4 sm:$0xff]   ;;  %4380 = vmatpush3.bf16.msra.mxu1 %v4965_v47 }
 0x399   : > { %3646 = vmatpush1.bf16.msra.mxu0 %v4878_v19  ;;  %v4922_v19 = vld [vmem:[%s6422_s9 + $0x164] ss:$8 sps:$4 sm:$0xff]  }
 0x39a   : > { %3647 = vmatprep.subr.bf16.mxu0 %v4883_v20  ;;  %v4920_v20 = vld [vmem:[%s6422_s9 + $0x160] ss:$8 sps:$4 sm:$0xff]  }
 0x39d   : > { %3648 = vmatpush1.bf16.msra.mxu0 %v4881_v21  ;;  %v4925_v21 = vld [vmem:[%s6422_s9 + $0x174] ss:$8 sps:$4 sm:$0xff]  }
 0x39e   : > { %3649 = vmatprep.subr.bf16.mxu0 %v4886_v22  ;;  %v4923_v22 = vld [vmem:[%s6422_s9 + $0x170] ss:$8 sps:$4 sm:$0xff]  }
 0x3a1   : > { %3650 = vmatpush1.bf16.msra.mxu0 %v4884_v23  ;;  %v4928_v23 = vld [vmem:[%s6422_s9 + $0x184] ss:$8 sps:$4 sm:$0xff]  }
 0x3a2   : > { %3651 = vmatprep.subr.bf16.mxu0 %v4889_v6  ;;  %v4926_v6 = vld [vmem:[%s6422_s9 + $0x180] ss:$8 sps:$4 sm:$0xff]  }
 0x3a5   : > { %3652 = vmatpush1.bf16.msra.mxu0 %v4887_v24  ;;  %v4931_v24 = vld [vmem:[%s6422_s9 + $0x194] ss:$8 sps:$4 sm:$0xff]  }
 0x3a6   : > { %3653 = vmatprep.subr.bf16.mxu0 %v4892_v26  ;;  %v4929_v26 = vld [vmem:[%s6422_s9 + $0x190] ss:$8 sps:$4 sm:$0xff]  }
 0x3a9   : > { %3654 = vmatpush1.bf16.msra.mxu0 %v4890_v27  ;;  %v4934_v27 = vld [vmem:[%s6422_s9 + $0x1a4] ss:$8 sps:$4 sm:$0xff]  }
 0x3aa   : > { %3655 = vmatprep.subr.bf16.mxu0 %v4895_v5  ;;  %v4932_v5 = vld [vmem:[%s6422_s9 + $0x1a0] ss:$8 sps:$4 sm:$0xff]  }
 0x3ad   : > { %3656 = vmatpush1.bf16.msra.mxu0 %v4893_v29  ;;  %v4937_v29 = vld [vmem:[%s6422_s9 + $0x1b4] ss:$8 sps:$4 sm:$0xff]  }
 0x3ae   : > { %3657 = vmatprep.subr.bf16.mxu0 %v4898_v30  ;;  %v4935_v30 = vld [vmem:[%s6422_s9 + $0x1b0] ss:$8 sps:$4 sm:$0xff]  }
 0x3b1   : > { %3658 = vmatpush1.bf16.msra.mxu0 %v4896_v32  ;;  %v4940_v32 = vld [vmem:[%s6422_s9 + $0x1c4] ss:$8 sps:$4 sm:$0xff]  }
 0x3b2   : > { %3659 = vmatprep.subr.bf16.mxu0 %v4901_v33  ;;  %v4938_v33 = vld [vmem:[%s6422_s9 + $0x1c0] ss:$8 sps:$4 sm:$0xff]  }
 0x3b5   : > { %3660 = vmatpush1.bf16.msra.mxu0 %v4899_v34  ;;  %v4943_v34 = vld [vmem:[%s6422_s9 + $0x1d4] ss:$8 sps:$4 sm:$0xff]  }
 0x3b6   : > { %3670 = vmatprep.subr.bf16.mxu0 %v4904_v25  ;;  %v4941_v25 = vld [vmem:[%s6422_s9 + $0x1d0] ss:$8 sps:$4 sm:$0xff]  }
 0x44b   : > { %v3054_v54 = vpop.f32.mrb[4].mxu0 }
 0x44c   : > { %v4405_v55 = vadd.f32 %v3054_v54, %v2880_v51  ;;  %v6280_v56 = vpop.f32.mrb[20].mxu1  ;;  %v3056_v57 = vpop.f32.mrb[5].mxu0 }
 0x44d   : > { %v4406_v58 = vadd.f32 %v3056_v57, %v2884_v52  ;;  %v3220_v38 = vpop.f32.mrb[21].mxu1  ;;  %v3058_v59 = vpop.f32.mrb[6].mxu0  ;;  %v4407_v43 = vadd.f32 %v6280_v56, %v2888_v37 }
 0x44e   : > { %v3225_v60 = vmax.f32 %v4405_v55, 0.0  ;;  %v4408_v62 = vadd.f32 %v3220_v38, %v2892_v53  ;;  %v3222_v63 = vpop.f32.mrb[22].mxu1  ;;  %v3059_v61 = vpop.f32.mrb[7].mxu0 }
 0x44f   : > { %v3226_v0 = vmax.f32 %v4406_v58, 0.0  ;;  %v3223_v1 = vpop.f32.mrb[23].mxu1  ;;  %v3227_v28 = vmax.f32 %v4407_v43, 0.0 }
 0x450   : > { %v3228_v8 = vmax.f32 %v4408_v62, 0.0  ;;  %v3229_v4 = vpack.c.bf16 %v3225_v60, %v3225_v60 }
 0x451   : > { %v3230_v3 = vpack.c.bf16 %v3226_v0, %v3226_v0  ;;  %v3231_v39 = vpack.c.bf16 %v3227_v28, %v3227_v28 }
 0x452   : > { %v3232_v9 = vpack.c.bf16 %v3228_v8, %v3228_v8 }
 0x453   : > { %3661 = vmatprep.mubr.bf16.mxu0 %v3230_v3 }
 0x454   : > { %3662 = vmatmul.mubr.bf16.vlgmr.msra.gmra.mrb[8].mxu0 %v3229_v4 }
 0x455   : > { %3671 = vmatpush1.bf16.msra.mxu0 %v4902_v31  ;;  %3702 = vmatprep.mubr.bf16.mxu0 %v3232_v9 }
 0x456   : > { %3672 = vmatprep.subr.bf16.mxu0 %v4907_v7 }
 0x459   : > { %3673 = vmatpush1.bf16.msra.mxu0 %v4905_v10 }
 0x45a   : > { %3674 = vmatprep.subr.bf16.mxu0 %v4910_v11 }
 0x45d   : > { %3675 = vmatpush1.bf16.msra.mxu0 %v4908_v12 }
 0x45e   : > { %3676 = vmatprep.subr.bf16.mxu0 %v4913_v13 }
 0x461   : > { %3677 = vmatpush1.bf16.msra.mxu0 %v4911_v14 }
 0x462   : > { %3678 = vmatprep.subr.bf16.mxu0 %v4916_v15 }
 0x465   : > { %3679 = vmatpush1.bf16.msra.mxu0 %v4914_v16 }
 0x466   : > { %3680 = vmatprep.subr.bf16.mxu0 %v4919_v17 }
 0x469   : > { %3681 = vmatpush1.bf16.msra.mxu0 %v4917_v18 }
 0x46a   : > { %3682 = vmatprep.subr.bf16.mxu0 %v4922_v19 }
 0x46d   : > { %3683 = vmatpush1.bf16.msra.mxu0 %v4920_v20 }
 0x46e   : > { %3684 = vmatprep.subr.bf16.mxu0 %v4925_v21 }
 0x471   : > { %3685 = vmatpush1.bf16.msra.mxu0 %v4923_v22 }
 0x472   : > { %3686 = vmatprep.subr.bf16.mxu0 %v4928_v23 }
 0x475   : > { %3687 = vmatpush1.bf16.msra.mxu0 %v4926_v6 }
 0x476   : > { %3688 = vmatprep.subr.bf16.mxu0 %v4931_v24 }
 0x479   : > { %3689 = vmatpush1.bf16.msra.mxu0 %v4929_v26 }
 0x47a   : > { %3690 = vmatprep.subr.bf16.mxu0 %v4934_v27 }
 0x47d   : > { %3691 = vmatpush1.bf16.msra.mxu0 %v4932_v5 }
 0x47e   : > { %3692 = vmatprep.subr.bf16.mxu0 %v4937_v29 }
 0x481   : > { %3693 = vmatpush1.bf16.msra.mxu0 %v4935_v30 }
 0x482   : > { %3694 = vmatprep.subr.bf16.mxu0 %v4940_v32 }
 0x485   : > { %3695 = vmatpush1.bf16.msra.mxu0 %v4938_v33 }
 0x486   : > { %3696 = vmatprep.subr.bf16.mxu0 %v4943_v34 }
 0x489   : > { %3697 = vmatpush1.bf16.msra.mxu0 %v4941_v25 }
 0x48a   : > { %3698 = vmatprep.subr.bf16.mxu0 %v4946_v41 }
 0x48d   : > { %3699 = vmatpush1.bf16.msra.mxu0 %v4944_v42 }
 0x48e   : > { %3700 = vmatprep.subr.bf16.mxu0 %v4949_v44 }
 0x491   : > { %3701 = vmatpush1.bf16.msra.mxu0 %v4947_v35 }
 0x494   : > { %3703 = vmatmul.mubr.bf16.vlgmr.msra.gmra.mrb[8].mxu0 %v3231_v39 }
 0x567   : > { %v3704_v51 = vpop.f32.mrb[8].mxu0 }
 0x568   : > { %v4409_v52 = vadd.f32 %v3704_v51, %v3622_v49  ;;  %v3706_v53 = vpop.f32.mrb[9].mxu0 }
 0x569   : > { %v4410_v54 = vadd.f32 %v3706_v53, %v3626_v50  ;;  %v3708_v55 = vpop.f32.mrb[10].mxu0 }
 0x56a   : > { %v3711_v56 = vmax.f32 %v4409_v52, 0.0  ;;  %v3709_v57 = vpop.f32.mrb[11].mxu0 }
 0x56b   : > { %v3712_v58 = vmax.f32 %v4410_v54, 0.0 }
 0x56c   : > { %v3713_v59 = vpack.c.bf16 %v3711_v56, %v3711_v56 }
 0x56d   : > { %v3714_v38 = vpack.c.bf16 %v3712_v58, %v3712_v58 }
 0x56f   : > { %3876 = vmatprep.mubr.bf16.mxu1 %v3714_v38 }
 0x570   : > { %3877 = vmatmul.mubr.bf16.vlgmr.msra.gmra.mrb[24].mxu1 %v3713_v59 }
 0x643   : > { %v4381_v60 = vpop.f32.mrb[24].mxu1 }
 0x644   : > { %v4382_v40 = vpop.f32.mrb[25].mxu1 }
 0x645   : > { %v4383_v62 = vadd.f32 %v4382_v40, %v4381_v60  ;;  %v4384_v63 = vpop.f32.mrb[26].mxu1 }
 0x646   : > { %v4385_v61 = vpop.f32.mrb[27].mxu1 }
 0x647   : > { %v3879_v0 = vadd.f32 %v4383_v62, %v3747_v36 }
 0x649   : > { %3885 = vst.msk [vmem:[%s457_s22] sm:$0x1] %vm3884_vm4, %v3879_v0 }
 0x64a PF: > { %s23_s27 = sadd.s32 1, %s4988_s27   ;;  %s6427_s25 = smov %s4984_s26 }
 0x64b   : > { %p20_p6 = scmp.ge.s32.totalorder %s23_s27, 4   ;;  %s6428_s26 = smov %s6430_s28 }
 0x64d   :  { %22 = sbr.rel (!%p20_p6) target bundleno = 2 (0x2), region = 114 }

// kernel: _lambda_.3
= control target key start
LH: loop header
LB: loop body
LE: loop exit
PB: predicated region body
PF: predicated region fallthrough
CT: control target
= control target key end

     0   :  { %s7038_s0 = inlined_call_operand.vmem [shape: f32[32,8], index: 0, kind: input, shape index: {}]   ;;  %s7039_s1 = inlined_call_operand.vmem [shape: f32[2,8,64], index: 1, kind: input, shape index: {}]   ;;  %s7040_s2 = inlined_call_operand.vmem [shape: f32[1,64], index: 2, kind: input, shape index: {}]   ;;  %s7041_s3 = inlined_call_operand.vmem [shape: bf16[64,64], index: 3, kind: input, shape index: {}]   ;;  %s7042_s4 = inlined_call_operand.vmem [shape: f32[1,64], index: 4, kind: input, shape index: {}]   ;;  %s7043_s5 = inlined_call_operand.vmem [shape: bf16[64,64], index: 5, kind: input, shape index: {}]   ;;  %s7044_s6 = inlined_call_operand.vmem [shape: f32[1,64], index: 6, kind: input, shape index: {}]   ;;  %s7045_s7 = inlined_call_operand.vmem [shape: bf16[64,128], index: 7, kind: input, shape index: {}]   ;;  %s7046_s8 = inlined_call_operand.vmem [shape: f32[1,128], index: 8, kind: input, shape index: {}]   ;;  %s7047_s9 = inlined_call_operand.vmem [shape: bf16[128,1024], index: 9, kind: input, shape index: {}]   ;;  %s7048_s10 = inlined_call_operand.vmem [shape: f32[1,1024], index: 10, kind: input, shape index: {}]   ;;  %s7049_s11 = inlined_call_operand.vmem [shape: bf16[1024,512], index: 11, kind: input, shape index: {}]   ;;  %s7050_s12 = inlined_call_operand.vmem [shape: f32[1,512], index: 12, kind: input, shape index: {}]   ;;  %s7051_s13 = inlined_call_operand.vmem [shape: bf16[512,256], index: 13, kind: input, shape index: {}]   ;;  %s7052_s14 = inlined_call_operand.vmem [shape: f32[1,256], index: 14, kind: input, shape index: {}]   ;;  %s7053_s15 = inlined_call_operand.vmem [shape: bf16[256,2], index: 15, kind: input, shape index: {}]   ;;  %s7054_s16 = inlined_call_operand.vmem [shape: f32[1,2], index: 16, kind: input, shape index: {}]   ;;  %s7055_s17 = inlined_call_operand.hbm [shape: f32[2,1,2], index: 17, kind: output, shape index: {}]  }
   0x1   :  { %7066 = sst [smem:[#allocation14_spill]] %s7038_s0 }
   0x2   :  { %7067 = sst [smem:[#allocation15_spill]] %s7039_s1 }
   0x3   :  { %7068 = sst [smem:[#allocation16_spill]] %s7055_s17 }
   0x4   :  { %22 = vsyncpa [#allocation4], 0 }
   0x5   :  { %24 = vsyncpa [#allocation4 + $0x1], 0  ;;  %s5558_s24 = smov 0   ;;  %s5560_s25 = smov 0  }
   0x6   :  { %s5562_s26 = smov 0   ;;  %s5564_s27 = smov 0  }
   0x7   :  { %s5566_s28 = smov 0   ;;  %s5568_s29 = smov 0  }
   0x8 LB: > { %7069 = sst [smem:[#allocation6_spill]] %s5442_s24  ;;  %s4268_s0 = sadd.s32 4294967295, %s5462_s29   ;;  %s5462_s29 = sphi %s5568_s29, %s30_s29   ;;  %s5458_s28 = sphi %s5566_s28, %s7090_s28   ;;  %s5454_s27 = sphi %s5564_s27, %s7089_s27   ;;  %s5450_s26 = sphi %s5562_s26, %s7088_s26   ;;  %s5446_s25 = sphi %s5560_s25, %s7092_s25   ;;  %s5442_s24 = sphi %s5558_s24, %s7091_s24  }
   0x9   : > { %7070 = sst [smem:[#allocation7_spill]] %s5450_s26  ;;  %s4269_s30 = sadd.s32 4294967294, %s5462_s29  }
   0xa   : > { %7071 = sst [smem:[#allocation8_spill]] %s5458_s28  ;;  %s42_s18 = sadd.s32 1, %s5458_s28 }
   0xb   : > { %7072 = sst [smem:[#allocation9_spill]] %s5462_s29  ;;  %s418_s19 = sadd.s32 1, %s5450_s26 }
   0xc   : > { %p44_p0 = scmp.ge.s32.totalorder %s42_s18, 2  ;;  %p428_p1 = scmp.ne.s32.totalorder %s5450_s26, %s5446_s25 }
   0xd   : > { %p429_p2 = scmp.eq.s32.totalorder %s4268_s0, 1  ;;  %p434_p3 = scmp.ne.s32.totalorder %s5446_s25, %s5442_s24 }
   0xe   : > { %s7094_s18 = smov (%p44_p0, %s42_s18), 0  ;;  %p435_p5 = scmp.eq.s32.totalorder %s4269_s30, 1 }
   0xf   : > { %7073 = sst [smem:[#allocation10_spill]] %s7094_s18  ;;  %p5598_p4 = por %p429_p2, %p428_p1 }
  0x10   : > { %s415_s20 = ssub.s32 %s5458_s28, %s7094_s18  ;;  %p4272_p6 = scmp.ge.s32.totalorder %s5462_s29, 1 }
  0x11   : > { %s7074_s1 = scalar_select %p5598_p4, 1, 0 }
  0x12   : > { %p416_p7 = scmp.eq.s32.totalorder %s415_s20, 0  ;;  %p5605_p8 = por %p435_p5, %p434_p3 }
  0x13   : > { %7075 = sst [smem:[#allocation11_spill]] %s7074_s1  ;;  %p516_p9 = scmp.lt.s32.totalorder %s5462_s29, 3 }
  0x14   : > { %s7076_s21 = scalar_select %p5605_p8, 1, 0 }
  0x15   : > { %s5611_s22 = scalar_select %p416_p7, %s5450_s26, %s418_s19  }
  0x16   : > { %7077 = sst [smem:[#allocation12_spill]] %s7076_s21  ;;  %p517_p10 = pnand %p4272_p6, %p516_p9 }
  0x17   : > { %7078 = sst [smem:[#allocation13_spill]] %s5611_s22  ;;  %p580_p11 = scmp.lt.s32.totalorder (!%p517_p10), %s5454_s27, 1  ;;  %v5464_v0 = vmov (!%p517_p10), 0.0   ;;  %vm5465_vm0 = vmmov (!%p517_p10), 0   ;;  %vm601_vm1 = vcmask (!%p517_p10), 1043456   ;;  %vm597_vm2 = vcmask (!%p517_p10), 64512  }
  0x18   : > { %520 = sbr.rel (%p517_p10) target bundleno = 2399 (0x95f), region = 88  ;;  %s4273_s23 = sshll.u32 (!%p517_p10), %s5454_s27, 1  ;;  %4738 = vmatprep.subr.bf16.mxu1 (!%p517_p10), %v5464_v0  ;;  %4740 = vmatprep.mubr.msk.bf16.mxu1 (!%p517_p10), %vm5465_vm0, %v5464_v0  ;;  %v4872_v5 = vld [vmem:[%s7041_s3] sm:$0xff] (!%p517_p10)   ;;  %v4873_v8 = vld [vmem:[%s7041_s3 + $0x8] sm:$0xff] (!%p517_p10)   ;;  %v4874_v9 = vld [vmem:[%s7041_s3 + $0x10] sm:$0xff] (!%p517_p10)   ;;  %vm688_vm3 = vcmask (!%p517_p10), 523264  }
  0x19   : > { %p574_p12 = scmp.lt.s32.totalorder (!%p517_p10), %s4273_s23, 3  ;;  %4756 = vmatprep.subr.bf16.mxu0 (!%p517_p10), %v5464_v0  ;;  %4764 = vmatprep.mubr.msk.bf16.mxu0 (!%p517_p10), %vm5465_vm0, %v5464_v0  ;;  %s7079_s18 = sld [smem:[#allocation15_spill]] (!%p517_p10)  ;;  %v4875_v10 = vld [vmem:[%s7041_s3 + $0x18] sm:$0xff] (!%p517_p10)   ;;  %v4876_v11 = vld [vmem:[%s7043_s5] sm:$0xff] (!%p517_p10)   ;;  %v4877_v12 = vld [vmem:[%s7043_s5 + $0x8] sm:$0xff] (!%p517_p10)   ;;  %vm4166_vm4 = vcmask (!%p517_p10), 8192  }
  0x1a   : > { %s7080_s24 = sld [smem:[#allocation14_spill]] (!%p517_p10)  ;;  %4757 = vmatpush3.bf16.msra.mxu0 (!%p517_p10), %v4876_v11  ;;  %v4276_v13 = vld [vmem:[%s7040_s2] ss:$0 sm:$0xff] (!%p517_p10)  ;;  %v4878_v23 = vld [vmem:[%s7043_s5 + $0x10] sm:$0xff] (!%p517_p10)   ;;  %v4879_v24 = vld [vmem:[%s7043_s5 + $0x18] sm:$0xff] (!%p517_p10)   ;;  %s570_s20 = sand.u32 (!%p517_p10), 1, %s5446_s25  }
  0x1b   : > { %4758 = vmatprep.subr.bf16.mxu0 (!%p517_p10), %v5464_v0  ;;  %v4880_v25 = vld [vmem:[%s7045_s7] sm:$0xff] (!%p517_p10)   ;;  %v4881_v26 = vld [vmem:[%s7045_s7 + $0x8] sm:$0xff] (!%p517_p10)   ;;  %v4882_v37 = vld [vmem:[%s7045_s7 + $0x10] sm:$0xff] (!%p517_p10)  }
  0x1c   : > { %v4278_v27 = vld [vmem:[%s7042_s4] ss:$0 sm:$0xff] (!%p517_p10)  ;;  %v4883_v38 = vld [vmem:[%s7045_s7 + $0x18] sm:$0xff] (!%p517_p10)   ;;  %v909_v43 = vld [vmem:[%s7047_s9 + $0x10] sm:$0xff] (!%p517_p10) }
  0x1d   : > { %v907_v39 = vld [vmem:[%s7047_s9] sm:$0xff] (!%p517_p10)  ;;  %v913_v44 = vld [vmem:[%s7047_s9 + $0x30] sm:$0xff] (!%p517_p10) }
  0x1e   : > { %4759 = vmatpush3.bf16.msra.mxu0 (!%p517_p10), %v4877_v12  ;;  %v911_v40 = vld [vmem:[%s7047_s9 + $0x20] sm:$0xff] (!%p517_p10)  ;;  %v4300_v45 = vcombine.low (!%p517_p10), %v909_v43, %v913_v44  ;;  %v4301_v46 = vcombine.high (!%p517_p10), %v909_v43, %v913_v44  ;;  %v917_v47 = vld [vmem:[%s7047_s9 + $0x50] sm:$0xff] (!%p517_p10) }
  0x1f   : > { %s581_s0 = scalar_select %p580_p11, %s5454_s27, 1  ;;  %4760 = vmatprep.subr.bf16.mxu0 %v5464_v0  ;;  %v4296_v41 = vcombine.low %v907_v39, %v911_v40  ;;  %v4297_v42 = vcombine.high %v907_v39, %v911_v40  ;;  %v921_v48 = vld [vmem:[%s7047_s9 + $0x70] sm:$0xff]  ;;  %v919_v11 = vld [vmem:[%s7047_s9 + $0x60] sm:$0xff] }
  0x20   : > { %s7096_s23 = smov (!%p574_p12, %s4273_s23), 3  ;;  %v4308_v49 = vcombine.low %v917_v47, %v921_v48  ;;  %v4309_v50 = vcombine.high %v917_v47, %v921_v48  ;;  %v925_v51 = vld [vmem:[%s7047_s9 + $0x90] sm:$0xff] }
  0x21   : > { %s4275_s30 = sshll.u32 %s581_s0, 3  ;;  %s4274_s22 = sshll.u32 %s7096_s23, 3  ;;  %v929_v52 = vld [vmem:[%s7047_s9 + $0xb0] sm:$0xff] }
  0x22   : > { %s583_s28 = scalar_lea.vmem %s7079_s18, %s4275_s30  ;;  %s577_s29 = scalar_lea.vmem %s7080_s24, %s4274_s22  ;;  %4761 = vmatpush3.bf16.msra.mxu0 %v4878_v23  ;;  %v4316_v53 = vcombine.low %v925_v51, %v929_v52  ;;  %v4317_v54 = vcombine.high %v925_v51, %v929_v52  ;;  %v933_v55 = vld [vmem:[%s7047_s9 + $0xd0] sm:$0xff] }
  0x23   : > { %v587_v1 = vld [vmem:[%s583_s28] sm:$0xff]  ;;  %v586_v4 = vld [vmem:[%s577_s29 + $0x8] sm:$0xff]  ;;  %4762 = vmatprep.subr.bf16.mxu0 %v5464_v0  ;;  %v937_v56 = vld [vmem:[%s7047_s9 + $0xf0] sm:$0xff]  ;;  %s4696_s18 = sshll.u32 %s5454_s27, 4  ;;  %s571_s28 = scalar_lea.vmem [#allocation3], %s570_s20 }
  0x24   : > { %v589_v2 = vpack.c.bf16 %v587_v1, %v587_v1  ;;  %v585_v3 = vld [vmem:[%s577_s29] sm:$0xff]  ;;  %v4324_v57 = vcombine.low %v933_v55, %v937_v56  ;;  %v4325_v58 = vcombine.high %v933_v55, %v937_v56  ;;  %v941_v59 = vld [vmem:[%s7047_s9 + $0x110] sm:$0xff]  ;;  %s4193_s17 = sshll.u32 %s571_s28, 4  ;;  %s7082_s29 = sld [smem:[#allocation16_spill]]  ;;  %s6992_s17 = int_to_ptr.vmem [resolvable:$true] %s4193_s17 }
  0x25   : > { %v588_v7 = vpack.c.bf16 %v586_v4, %v585_v3  ;;  %v945_v60 = vld [vmem:[%s7047_s9 + $0x130] sm:$0xff]  ;;  %v4284_v3 = vld [vmem:[%s7044_s6] ss:$0 sm:$0xff]  ;;  %s4181_s22 = scalar_lea.sflag [#allocation4], %s570_s20  ;;  %s5384_s23 = scalar_lea.vmem %s6992_s17, 16 }
  0x26   : > { %v603_v6 = vsel %vm601_vm1, %v589_v2, 0  ;;  %4763 = vmatpush3.bf16.msra.mxu0 %v4879_v24  ;;  %v4332_v61 = vcombine.low %v941_v59, %v945_v60  ;;  %v4333_v62 = vcombine.high %v941_v59, %v945_v60  ;;  %v949_v63 = vld [vmem:[%s7047_s9 + $0x150] sm:$0xff]  ;;  %v939_v24 = vld [vmem:[%s7047_s9 + $0x100] sm:$0xff]  ;;  %p5385_p13 = scmp.ne.s32.totalorder %s6992_s17, %s5384_s23  ;;  %s5467_s27 = smov [#allocation3]  }
  0x27   : > { %4739 = vmatpush3.bf16.msra.mxu1 %v603_v6  ;;  %1420 = vmatprep.subr.bf16.mxu0 %v4301_v46  ;;  %v965_v44 = vld [vmem:[%s7047_s9 + $0x1d0] sm:$0xff]  ;;  %v4290_v55 = vld [vmem:[%s7046_s8] ss:$0 sm:$0xff]  ;;  %s5388_s0 = sshll.u32 %s5467_s27, 4  ;;  %s5389_s0 = int_to_ptr.vmem [resolvable:$false] %s5388_s0 }
  0x28   : > { %4744 = vmatprep.subr.bf16.mxu1 %v5464_v0  ;;  %p5386_p0 = pnand %p5385_p13, %p5598_p4  ;;  %s5390_s30 = scalar_lea.vmem %s5389_s0, 32 }
  0x29   : > { %p5391_p2 = scmp.lt.s32.totalorder %s6992_s17, %s5389_s0  ;;  %p5392_p3 = scmp.lt.s32.totalorder %s5390_s30, %s5384_s23 }
  0x2a   : > { %4741 = vmatmul.mubr.msk.bf16.vlgmr.msra.gmra.mrb[0].mxu1 %vm597_vm2, %v588_v7  ;;  %s7083_s1 = smov %s7082_s29  ;;  %s6990_s21 = scalar_lea.hbm %s7082_s29, %s4696_s18 }
  0x2b   : > { %4745 = vmatpush3.bf16.msra.mxu1 %v4872_v5  ;;  %4752 = vmatprep.mubr.msk.bf16.mxu1 %vm5465_vm0, %v5464_v0  ;;  %p5387_p1 = pneg %p5386_p0  ;;  %p5393_p5 = por %p5392_p3, %p5391_p2 }
  0x2c   : > { %4746 = vmatprep.subr.bf16.mxu1 %v5464_v0 }
  0x2d   : > { %p5394_p6 = pnand %p5393_p5, %p5387_p1 }
  0x2f   : > { %4747 = vmatpush3.bf16.msra.mxu1 %v4873_v8 }
  0x30   : > { %4748 = vmatprep.subr.bf16.mxu1 %v5464_v0 }
  0x33   : > { %4749 = vmatpush3.bf16.msra.mxu1 %v4874_v9 }
  0x34   : > { %4750 = vmatprep.subr.bf16.mxu1 %v5464_v0 }
  0x37   : > { %4751 = vmatpush3.bf16.msra.mxu1 %v4875_v10  ;;  %v915_v10 = vld [vmem:[%s7047_s9 + $0x40] sm:$0xff] }
  0x38   : > { %4768 = vmatprep.subr.bf16.mxu1 %v5464_v0 }
  0xfd   : > { %v639_v14 = vpop.f32.mrb[0].mxu1 }
  0xfe   : > { %v640_v15 = vadd.f32 %v4276_v13, %v639_v14  ;;  %v4742_v16 = vpop.f32.mrb[1].mxu1 }
  0xff   : > { %v642_v17 = vpop.f32.mrb[2].mxu1  ;;  %v923_v16 = vld [vmem:[%s7047_s9 + $0x80] sm:$0xff] }
 0x100   : > { %v643_v18 = vadd.f32 %v4276_v13, %v642_v17  ;;  %v4743_v19 = vpop.f32.mrb[3].mxu1  ;;  %v646_v20 = vmax.f32 %v640_v15, 0.0  ;;  %v4305_v15 = vcombine.high %v915_v10, %v919_v11  ;;  %v927_v17 = vld [vmem:[%s7047_s9 + $0xa0] sm:$0xff] }
 0x101   : > { %v4313_v19 = vcombine.high %v923_v16, %v927_v17 }
 0x102   : > { %v647_v21 = vmax.f32 %v643_v18, 0.0  ;;  %v4304_v18 = vcombine.low %v915_v10, %v919_v11  ;;  %v4890_v10 = vld [vmem:[%s7049_s11 + $0x20] ss:$16 sps:$4 sm:$0xff]   ;;  %v932_v11 = vld [vmem:[%s7047_s9 + $0xc8] sm:$0xff] }
 0x104   : > { %v656_v22 = vpack.c.bf16 %v647_v21, %v646_v20  ;;  %v931_v20 = vld [vmem:[%s7047_s9 + $0xc0] sm:$0xff] }
 0x105   : > { %v935_v21 = vld [vmem:[%s7047_s9 + $0xe0] sm:$0xff] }
 0x106   : > { %4753 = vmatmul.mubr.msk.bf16.vlgmr.msra.gmra.mrb[4].mxu1 %vm688_vm3, %v656_v22  ;;  %v4312_v22 = vcombine.low %v923_v16, %v927_v17  ;;  %v4321_v23 = vcombine.high %v931_v20, %v935_v21  ;;  %v4896_v16 = vld [vmem:[%s7049_s11 + $0x40] ss:$16 sps:$4 sm:$0xff]   ;;  %v940_v17 = vld [vmem:[%s7047_s9 + $0x108] sm:$0xff] }
 0x107   : > { %4776 = vmatprep.mubr.msk.bf16.mxu1 %vm5465_vm0, %v5464_v0  ;;  %4769 = vmatpush3.bf16.msra.mxu1 %v4880_v25  ;;  %v943_v25 = vld [vmem:[%s7047_s9 + $0x120] sm:$0xff] }
 0x108   : > { %4770 = vmatprep.subr.bf16.mxu1 %v5464_v0 }
 0x10b   : > { %4771 = vmatpush3.bf16.msra.mxu1 %v4881_v26  ;;  %v4320_v26 = vcombine.low %v931_v20, %v935_v21 }
 0x10c   : > { %4772 = vmatprep.subr.bf16.mxu1 %v5464_v0 }
 0x10f   : > { %4773 = vmatpush3.bf16.msra.mxu1 %v4882_v37  ;;  %v961_v37 = vld [vmem:[%s7047_s9 + $0x1b0] sm:$0xff] }
 0x110   : > { %4774 = vmatprep.subr.bf16.mxu1 %v5464_v0  ;;  %v953_v0 = vld [vmem:[%s7047_s9 + $0x170] sm:$0xff] }
 0x111   : > { %v4340_v1 = vcombine.low %v949_v63, %v953_v0  ;;  %v4341_v2 = vcombine.high %v949_v63, %v953_v0  ;;  %v920_v63 = vld [vmem:[%s7047_s9 + $0x68] sm:$0xff] }
 0x113   : > { %4775 = vmatpush3.bf16.msra.mxu1 %v4883_v38 }
 0x114   : > { %1334 = vmatprep.subr.bf16.mxu1 %v4297_v42  ;;  %v967_v42 = vld [vmem:[%s7047_s9 + $0x1e0] sm:$0xff] }
 0x1d9   : > { %v726_v28 = vpop.f32.mrb[4].mxu1 }
 0x1da   : > { %v727_v29 = vadd.f32 %v4278_v27, %v726_v28  ;;  %v4754_v30 = vpop.f32.mrb[5].mxu1  ;;  %v947_v28 = vld [vmem:[%s7047_s9 + $0x140] sm:$0xff] }
 0x1db   : > { %v729_v31 = vpop.f32.mrb[6].mxu1  ;;  %v4328_v30 = vcombine.low %v939_v24, %v943_v25 }
 0x1dc   : > { %v730_v32 = vadd.f32 %v4278_v27, %v729_v31  ;;  %v4755_v33 = vpop.f32.mrb[7].mxu1  ;;  %v733_v34 = vmax.f32 %v727_v29, 0.0  ;;  %v4329_v27 = vcombine.high %v939_v24, %v943_v25  ;;  %v951_v29 = vld [vmem:[%s7047_s9 + $0x160] sm:$0xff]  ;;  %v952_v24 = vld [vmem:[%s7047_s9 + $0x168] sm:$0xff] }
 0x1dd   : > { %v4337_v31 = vcombine.high %v947_v28, %v951_v29  ;;  %v955_v33 = vld [vmem:[%s7047_s9 + $0x180] sm:$0xff] }
 0x1de   : > { %v734_v35 = vmax.f32 %v730_v32, 0.0  ;;  %v4336_v32 = vcombine.low %v947_v28, %v951_v29  ;;  %v4910_v25 = vld [vmem:[%s7049_s11 + $0x84] ss:$16 sps:$4 sm:$0xff]   ;;  %v4908_v28 = vld [vmem:[%s7049_s11 + $0x80] ss:$16 sps:$4 sm:$0xff]   ;;  %v956_v29 = vld [vmem:[%s7047_s9 + $0x188] sm:$0xff] }
 0x1e0   : > { %v743_v36 = vpack.c.bf16 %v734_v35, %v733_v34  ;;  %v959_v34 = vld [vmem:[%s7047_s9 + $0x1a0] sm:$0xff] }
 0x1e1   : > { %v4345_v35 = vcombine.high %v955_v33, %v959_v34  ;;  %v4344_v38 = vcombine.low %v955_v33, %v959_v34  ;;  %v4914_v34 = vld [vmem:[%s7049_s11 + $0xa0] ss:$16 sps:$4 sm:$0xff]  }
 0x1e2   : > { %4765 = vmatmul.mubr.msk.bf16.vlgmr.msra.gmra.mrb[0].mxu0 %vm688_vm3, %v743_v36  ;;  %v957_v36 = vld [vmem:[%s7047_s9 + $0x190] sm:$0xff] }
 0x1e3   : > { %1421 = vmatpush1.bf16.msra.mxu0 %v4300_v45  ;;  %v4349_v39 = vcombine.high %v957_v36, %v961_v37  ;;  %v4348_v40 = vcombine.low %v957_v36, %v961_v37  ;;  %v969_v45 = vld [vmem:[%s7047_s9 + $0x1f0] sm:$0xff]  ;;  %v968_v36 = vld [vmem:[%s7047_s9 + $0x1e8] sm:$0xff] }
 0x1e4   : > { %1422 = vmatprep.subr.bf16.mxu0 %v4309_v50  ;;  %v4357_v47 = vcombine.high %v965_v44, %v969_v45  ;;  %v4356_v48 = vcombine.low %v965_v44, %v969_v45  ;;  %v912_v50 = vld [vmem:[%s7047_s9 + $0x28] sm:$0xff]  ;;  %v4922_v37 = vld [vmem:[%s7049_s11 + $0xc4] ss:$16 sps:$4 sm:$0xff]  }
 0x1e7   : > { %1423 = vmatpush1.bf16.msra.mxu0 %v4308_v49  ;;  %v908_v49 = vld [vmem:[%s7047_s9 + $0x8] sm:$0xff] }
 0x1e8   : > { %1424 = vmatprep.subr.bf16.mxu0 %v4317_v54  ;;  %v4299_v51 = vcombine.high %v908_v49, %v912_v50  ;;  %v4298_v52 = vcombine.low %v908_v49, %v912_v50  ;;  %v4886_v54 = vld [vmem:[%s7049_s11 + $0x4] ss:$16 sps:$4 sm:$0xff]  }
 0x1e9   : > { %v4934_v49 = vld [vmem:[%s7049_s11 + $0x104] ss:$16 sps:$4 sm:$0xff]  }
 0x1eb   : > { %1425 = vmatpush1.bf16.msra.mxu0 %v4316_v53  ;;  %v5466_v53 = vmov 0  }
 0x1ec   : > { %1426 = vmatprep.subr.bf16.mxu0 %v4325_v58  ;;  %1452 = vmatprep.mubr.bf16.mxu0 %v5466_v53 }
 0x1ef   : > { %1427 = vmatpush1.bf16.msra.mxu0 %v4324_v57 }
 0x1f0   : > { %1428 = vmatprep.subr.bf16.mxu0 %v4333_v62  ;;  %v916_v62 = vld [vmem:[%s7047_s9 + $0x48] sm:$0xff] }
 0x1f3   : > { %1429 = vmatpush1.bf16.msra.mxu0 %v4332_v61 }
 0x1f4   : > { %1430 = vmatprep.subr.bf16.mxu0 %v4341_v2 }
 0x1f7   : > { %1431 = vmatpush1.bf16.msra.mxu0 %v4340_v1 }
 0x1f8   : > { %1432 = vmatprep.subr.bf16.mxu0 %v4349_v39 }
 0x1fb   : > { %1433 = vmatpush1.bf16.msra.mxu0 %v4348_v40  ;;  %v4920_v40 = vld [vmem:[%s7049_s11 + $0xc0] ss:$16 sps:$4 sm:$0xff]  }
 0x1fc   : > { %1434 = vmatprep.subr.bf16.mxu0 %v4357_v47  ;;  %v918_v47 = vld [vmem:[%s7047_s9 + $0x58] sm:$0xff] }
 0x1ff   : > { %1435 = vmatpush1.bf16.msra.mxu0 %v4356_v48  ;;  %v922_v48 = vld [vmem:[%s7047_s9 + $0x78] sm:$0xff] }
 0x200   : > { %3179 = vmatprep.subr.bf16.mxu0 %v4886_v54  ;;  %v926_v54 = vld [vmem:[%s7047_s9 + $0x98] sm:$0xff] }
 0x2b5   : > { %v812_v4 = vpop.f32.mrb[0].mxu0 }
 0x2b6   : > { %v813_v5 = vadd.f32 %v4284_v3, %v812_v4  ;;  %v4766_v6 = vpop.f32.mrb[1].mxu0  ;;  %v4884_v4 = vld [vmem:[%s7049_s11] ss:$16 sps:$4 sm:$0xff]  }
 0x2b7   : > { %v815_v7 = vpop.f32.mrb[2].mxu0  ;;  %v928_v6 = vld [vmem:[%s7047_s9 + $0xa8] sm:$0xff] }
 0x2b8   : > { %v816_v8 = vadd.f32 %v4284_v3, %v815_v7  ;;  %v4767_v9 = vpop.f32.mrb[3].mxu0  ;;  %v819_v12 = vmax.f32 %v813_v5, 0.0  ;;  %v4307_v3 = vcombine.high %v916_v62, %v920_v63  ;;  %v924_v5 = vld [vmem:[%s7047_s9 + $0x88] sm:$0xff]  ;;  %v4892_v7 = vld [vmem:[%s7049_s11 + $0x24] ss:$16 sps:$4 sm:$0xff]  }
 0x2b9   : > { %v4315_v9 = vcombine.high %v924_v5, %v928_v6 }
 0x2ba   : > { %v820_v13 = vmax.f32 %v816_v8, 0.0  ;;  %v4306_v8 = vcombine.low %v916_v62, %v920_v63 }
 0x2bc   : > { %v829_v14 = vpack.c.bf16 %v820_v13, %v819_v12  ;;  %v936_v12 = vld [vmem:[%s7047_s9 + $0xe8] sm:$0xff]  ;;  %v4898_v13 = vld [vmem:[%s7049_s11 + $0x44] ss:$16 sps:$4 sm:$0xff]  }
 0x2bd   : > { %v4322_v20 = vcombine.low %v932_v11, %v936_v12 }
 0x2be   : > { %4777 = vmatmul.mubr.msk.bf16.vlgmr.msra.gmra.mrb[8].mxu1 %vm688_vm3, %v829_v14  ;;  %v4314_v14 = vcombine.low %v924_v5, %v928_v6  ;;  %v950_v6 = vld [vmem:[%s7047_s9 + $0x158] sm:$0xff] }
 0x2bf   : > { %1335 = vmatpush1.bf16.msra.mxu1 %v4296_v41  ;;  %v963_v41 = vld [vmem:[%s7047_s9 + $0x1c0] sm:$0xff]  ;;  %1366 = vmatprep.mubr.bf16.mxu1 %v5466_v53 }
 0x2c0   : > { %1336 = vmatprep.subr.bf16.mxu1 %v4305_v15  ;;  %v4353_v43 = vcombine.high %v963_v41, %v967_v42  ;;  %v4352_v46 = vcombine.low %v963_v41, %v967_v42  ;;  %v4323_v15 = vcombine.high %v932_v11, %v936_v12  ;;  %v910_v41 = vld [vmem:[%s7047_s9 + $0x18] sm:$0xff] }
 0x2c1   : > { %v914_v42 = vld [vmem:[%s7047_s9 + $0x38] sm:$0xff] }
 0x2c2   : > { %v4303_v45 = vcombine.high %v910_v41, %v914_v42  ;;  %v4302_v50 = vcombine.low %v910_v41, %v914_v42  ;;  %v962_v11 = vld [vmem:[%s7047_s9 + $0x1b8] sm:$0xff]  ;;  %v4962_v41 = vld [vmem:[%s7049_s11 + $0x1a0] ss:$16 sps:$4 sm:$0xff]  }
 0x2c3   : > { %1337 = vmatpush1.bf16.msra.mxu1 %v4304_v18  ;;  %v944_v18 = vld [vmem:[%s7047_s9 + $0x128] sm:$0xff] }
 0x2c4   : > { %1338 = vmatprep.subr.bf16.mxu1 %v4313_v19  ;;  %v4904_v19 = vld [vmem:[%s7049_s11 + $0x64] ss:$16 sps:$4 sm:$0xff]   ;;  %v4331_v21 = vcombine.high %v940_v17, %v944_v18  ;;  %v4943_v42 = vld [vmem:[%s7049_s11 + $0x12c] ss:$16 sps:$4 sm:$0xff]  }
 0x2c7   : > { %1339 = vmatpush1.bf16.msra.mxu1 %v4312_v22  ;;  %v4902_v22 = vld [vmem:[%s7049_s11 + $0x60] ss:$16 sps:$4 sm:$0xff]  }
 0x2c8   : > { %1340 = vmatprep.subr.bf16.mxu1 %v4321_v23  ;;  %v948_v23 = vld [vmem:[%s7047_s9 + $0x148] sm:$0xff] }
 0x2cb   : > { %1341 = vmatpush1.bf16.msra.mxu1 %v4320_v26  ;;  %v4330_v26 = vcombine.low %v940_v17, %v944_v18 }
 0x2cc   : > { %1342 = vmatprep.subr.bf16.mxu1 %v4329_v27  ;;  %v4339_v27 = vcombine.high %v948_v23, %v952_v24 }
 0x2cf   : > { %1343 = vmatpush1.bf16.msra.mxu1 %v4328_v30  ;;  %v960_v30 = vld [vmem:[%s7047_s9 + $0x1a8] sm:$0xff] }
 0x2d0   : > { %1344 = vmatprep.subr.bf16.mxu1 %v4337_v31  ;;  %v4916_v31 = vld [vmem:[%s7049_s11 + $0xa4] ss:$16 sps:$4 sm:$0xff]   ;;  %v4347_v33 = vcombine.high %v956_v29, %v960_v30 }
 0x2d3   : > { %1345 = vmatpush1.bf16.msra.mxu1 %v4336_v32  ;;  %v4338_v32 = vcombine.low %v948_v23, %v952_v24  ;;  %v4901_v23 = vld [vmem:[%s7049_s11 + $0x4c] ss:$16 sps:$4 sm:$0xff]   ;;  %v4899_v24 = vld [vmem:[%s7049_s11 + $0x48] ss:$16 sps:$4 sm:$0xff]  }
 0x2d4   : > { %1346 = vmatprep.subr.bf16.mxu1 %v4345_v35  ;;  %v964_v35 = vld [vmem:[%s7047_s9 + $0x1c8] sm:$0xff] }
 0x2d5   : > { %v4355_v39 = vcombine.high %v964_v35, %v968_v36  ;;  %v4354_v44 = vcombine.low %v964_v35, %v968_v36  ;;  %v4958_v35 = vld [vmem:[%s7049_s11 + $0x184] ss:$16 sps:$4 sm:$0xff]   ;;  %v4929_v36 = vld [vmem:[%s7049_s11 + $0xe8] ss:$16 sps:$4 sm:$0xff]  }
 0x2d7   : > { %1347 = vmatpush1.bf16.msra.mxu1 %v4344_v38  ;;  %v4346_v38 = vcombine.low %v956_v29, %v960_v30  ;;  %v4917_v29 = vld [vmem:[%s7049_s11 + $0xa8] ss:$16 sps:$4 sm:$0xff]   ;;  %v4925_v30 = vld [vmem:[%s7049_s11 + $0xcc] ss:$16 sps:$4 sm:$0xff]  }
 0x2d8   : > { %1348 = vmatprep.subr.bf16.mxu1 %v4353_v43  ;;  %v4928_v43 = vld [vmem:[%s7049_s11 + $0xe4] ss:$16 sps:$4 sm:$0xff]  }
 0x2db   : > { %1349 = vmatpush1.bf16.msra.mxu1 %v4352_v46  ;;  %v4926_v46 = vld [vmem:[%s7049_s11 + $0xe0] ss:$16 sps:$4 sm:$0xff]  }
 0x2dc   : > { %1377 = vmatprep.subr.bf16.mxu1 %v4299_v51  ;;  %v4311_v51 = vcombine.high %v918_v47, %v922_v48 }
 0x391   : > { %v898_v56 = vpop.f32.mrb[8].mxu1 }
 0x392   : > { %v899_v57 = vadd.f32 %v4290_v55, %v898_v56  ;;  %v4778_v58 = vpop.f32.mrb[9].mxu1  ;;  %v4940_v56 = vld [vmem:[%s7049_s11 + $0x124] ss:$16 sps:$4 sm:$0xff]  }
 0x393   : > { %v901_v59 = vpop.f32.mrb[10].mxu1 }
 0x394   : > { %v902_v60 = vadd.f32 %v4290_v55, %v901_v59  ;;  %v4779_v61 = vpop.f32.mrb[11].mxu1  ;;  %v905_v0 = vmax.f32 %v899_v57, 0.0  ;;  %v930_v55 = vld [vmem:[%s7047_s9 + $0xb8] sm:$0xff]  ;;  %v4310_v57 = vcombine.low %v918_v47, %v922_v48  ;;  %v4938_v59 = vld [vmem:[%s7049_s11 + $0x120] ss:$16 sps:$4 sm:$0xff]  }
 0x395   : > { %v4319_v58 = vcombine.high %v926_v54, %v930_v55  ;;  %v938_v61 = vld [vmem:[%s7047_s9 + $0xf8] sm:$0xff]  ;;  %v4318_v62 = vcombine.low %v926_v54, %v930_v55  ;;  %v4976_v47 = vld [vmem:[%s7049_s11 + $0x1e4] ss:$16 sps:$4 sm:$0xff]   ;;  %v4974_v48 = vld [vmem:[%s7049_s11 + $0x1e0] ss:$16 sps:$4 sm:$0xff]  }
 0x396   : > { %v906_v1 = vmax.f32 %v902_v60, 0.0  ;;  %v934_v60 = vld [vmem:[%s7047_s9 + $0xd8] sm:$0xff] }
 0x397   : > { %v4327_v63 = vcombine.high %v934_v60, %v938_v61  ;;  %v4961_v54 = vld [vmem:[%s7049_s11 + $0x18c] ss:$16 sps:$4 sm:$0xff]   ;;  %v4959_v55 = vld [vmem:[%s7049_s11 + $0x188] ss:$16 sps:$4 sm:$0xff]  }
 0x398   : > { %v5807_v2 = vpack.c.bf16 %v906_v1, %v905_v0  ;;  %v4944_v0 = vld [vmem:[%s7049_s11 + $0x140] ss:$16 sps:$4 sm:$0xff]   ;;  %v942_v1 = vld [vmem:[%s7047_s9 + $0x118] sm:$0xff] }
 0x39a   : > { %1367 = vmatmul.mubr.bf16.vlgmr.msra.gmra.mrb[12].mxu1 %v5807_v2  ;;  %1453 = vmatmul.mubr.bf16.vlgmr.msra.gmra.mrb[4].mxu0 %v5807_v2 }
 0x39b   : > { %1378 = vmatpush1.bf16.msra.mxu1 %v4298_v52  ;;  %1409 = vmatprep.mubr.bf16.mxu1 %v5466_v53  ;;  %v4932_v52 = vld [vmem:[%s7049_s11 + $0x100] ss:$16 sps:$4 sm:$0xff]  }
 0x39c   : > { %1379 = vmatprep.subr.bf16.mxu1 %v4307_v3  ;;  %3180 = vmatpush1.bf16.msra.mxu0 %v4884_v4  ;;  %v946_v3 = vld [vmem:[%s7047_s9 + $0x138] sm:$0xff]  ;;  %v4326_v4 = vcombine.low %v934_v60, %v938_v61 }
 0x39d   : > { %3181 = vmatprep.subr.bf16.mxu0 %v4892_v7  ;;  %v4335_v5 = vcombine.high %v942_v1, %v946_v3  ;;  %v954_v7 = vld [vmem:[%s7047_s9 + $0x178] sm:$0xff] }
 0x39e   : > { %v4342_v12 = vcombine.low %v950_v6, %v954_v7  ;;  %v4979_v60 = vld [vmem:[%s7049_s11 + $0x1ec] ss:$16 sps:$4 sm:$0xff]   ;;  %v4977_v61 = vld [vmem:[%s7049_s11 + $0x1e8] ss:$16 sps:$4 sm:$0xff]  }
 0x39f   : > { %1380 = vmatpush1.bf16.msra.mxu1 %v4306_v8  ;;  %v4334_v8 = vcombine.low %v942_v1, %v946_v3  ;;  %v6103_v3 = vld [vmem:[%s7048_s10] sm:$0xff] }
 0x3a0   : > { %1381 = vmatprep.subr.bf16.mxu1 %v4315_v9  ;;  %3182 = vmatpush1.bf16.msra.mxu0 %v4890_v10  ;;  %v4343_v9 = vcombine.high %v950_v6, %v954_v7  ;;  %v958_v10 = vld [vmem:[%s7047_s9 + $0x198] sm:$0xff] }
 0x3a1   : > { %3183 = vmatprep.subr.bf16.mxu0 %v4898_v13  ;;  %v4351_v13 = vcombine.high %v958_v10, %v962_v11 }
 0x3a3   : > { %1382 = vmatpush1.bf16.msra.mxu1 %v4314_v14  ;;  %v966_v14 = vld [vmem:[%s7047_s9 + $0x1d8] sm:$0xff] }
 0x3a4   : > { %1383 = vmatprep.subr.bf16.mxu1 %v4323_v15  ;;  %3184 = vmatpush1.bf16.msra.mxu0 %v4896_v16  ;;  %v970_v15 = vld [vmem:[%s7047_s9 + $0x1f8] sm:$0xff]  ;;  %v4350_v16 = vcombine.low %v958_v10, %v962_v11 }
 0x3a5   : > { %3185 = vmatprep.subr.bf16.mxu0 %v4904_v19  ;;  %v4359_v17 = vcombine.high %v966_v14, %v970_v15  ;;  %v4358_v18 = vcombine.low %v966_v14, %v970_v15  ;;  %v4889_v19 = vld [vmem:[%s7049_s11 + $0xc] ss:$16 sps:$4 sm:$0xff]  }
 0x3a7   : > { %1384 = vmatpush1.bf16.msra.mxu1 %v4322_v20  ;;  %v4887_v20 = vld [vmem:[%s7049_s11 + $0x8] ss:$16 sps:$4 sm:$0xff]  }
 0x3a8   : > { %1385 = vmatprep.subr.bf16.mxu1 %v4331_v21  ;;  %3186 = vmatpush1.bf16.msra.mxu0 %v4902_v22  ;;  %v4895_v21 = vld [vmem:[%s7049_s11 + $0x2c] ss:$16 sps:$4 sm:$0xff]   ;;  %v4893_v22 = vld [vmem:[%s7049_s11 + $0x28] ss:$16 sps:$4 sm:$0xff]  }
 0x3a9   : > { %3187 = vmatprep.subr.bf16.mxu0 %v4910_v25  ;;  %v4905_v25 = vld [vmem:[%s7049_s11 + $0x68] ss:$16 sps:$4 sm:$0xff]  }
 0x3ab   : > { %1386 = vmatpush1.bf16.msra.mxu1 %v4330_v26  ;;  %v4913_v26 = vld [vmem:[%s7049_s11 + $0x8c] ss:$16 sps:$4 sm:$0xff]  }
 0x3ac   : > { %1387 = vmatprep.subr.bf16.mxu1 %v4339_v27  ;;  %3188 = vmatpush1.bf16.msra.mxu0 %v4908_v28  ;;  %v4911_v27 = vld [vmem:[%s7049_s11 + $0x88] ss:$16 sps:$4 sm:$0xff]   ;;  %v4919_v28 = vld [vmem:[%s7049_s11 + $0xac] ss:$16 sps:$4 sm:$0xff]  }
 0x3ad   : > { %3189 = vmatprep.subr.bf16.mxu0 %v4916_v31  ;;  %v4952_v31 = vld [vmem:[%s7049_s11 + $0x164] ss:$16 sps:$4 sm:$0xff]  }
 0x3af   : > { %1388 = vmatpush1.bf16.msra.mxu1 %v4338_v32  ;;  %v4923_v32 = vld [vmem:[%s7049_s11 + $0xc8] ss:$16 sps:$4 sm:$0xff]  }
 0x3b0   : > { %1389 = vmatprep.subr.bf16.mxu1 %v4347_v33  ;;  %3190 = vmatpush1.bf16.msra.mxu0 %v4914_v34  ;;  %v4950_v33 = vld [vmem:[%s7049_s11 + $0x160] ss:$16 sps:$4 sm:$0xff]   ;;  %v4931_v34 = vld [vmem:[%s7049_s11 + $0xec] ss:$16 sps:$4 sm:$0xff]  }
 0x3b1   : > { %3191 = vmatprep.subr.bf16.mxu0 %v4922_v37  ;;  %v4956_v37 = vld [vmem:[%s7049_s11 + $0x180] ss:$16 sps:$4 sm:$0xff]  }
 0x3b3   : > { %1390 = vmatpush1.bf16.msra.mxu1 %v4346_v38  ;;  %v4937_v38 = vld [vmem:[%s7049_s11 + $0x10c] ss:$16 sps:$4 sm:$0xff]  }
 0x3b4   : > { %1391 = vmatprep.subr.bf16.mxu1 %v4355_v39  ;;  %3192 = vmatpush1.bf16.msra.mxu0 %v4920_v40  ;;  %v4964_v39 = vld [vmem:[%s7049_s11 + $0x1a4] ss:$16 sps:$4 sm:$0xff]   ;;  %v4935_v40 = vld [vmem:[%s7049_s11 + $0x108] ss:$16 sps:$4 sm:$0xff]  }
 0x3b5   : > { %3193 = vmatprep.subr.bf16.mxu0 %v4928_v43  ;;  %v4970_v43 = vld [vmem:[%s7049_s11 + $0x1c4] ss:$16 sps:$4 sm:$0xff]  }
 0x3b7   : > { %1392 = vmatpush1.bf16.msra.mxu1 %v4354_v44  ;;  %v4941_v44 = vld [vmem:[%s7049_s11 + $0x128] ss:$16 sps:$4 sm:$0xff]  }
 0x3b8   : > { %1463 = vmatprep.subr.bf16.mxu1 %v4303_v45  ;;  %3194 = vmatpush1.bf16.msra.mxu0 %v4926_v46  ;;  %v4968_v45 = vld [vmem:[%s7049_s11 + $0x1c0] ss:$16 sps:$4 sm:$0xff]   ;;  %v4949_v46 = vld [vmem:[%s7049_s11 + $0x14c] ss:$16 sps:$4 sm:$0xff]  }
 0x3b9   : > { %3195 = vmatprep.subr.bf16.mxu0 %v4934_v49  ;;  %v4947_v49 = vld [vmem:[%s7049_s11 + $0x148] ss:$16 sps:$4 sm:$0xff]  }
 0x3ba   : > { %1410 = vmatmul.mubr.bf16.vlgmr.msra.gmra.mrb[16].mxu1 %v5807_v2 }
 0x3bb   : > { %1464 = vmatpush1.bf16.msra.mxu1 %v4302_v50  ;;  %1495 = vmatprep.mubr.bf16.mxu1 %v5466_v53  ;;  %v4946_v53 = vld [vmem:[%s7049_s11 + $0x144] ss:$16 sps:$4 sm:$0xff]   ;;  %v4955_v50 = vld [vmem:[%s7049_s11 + $0x16c] ss:$16 sps:$4 sm:$0xff]  }
 0x3bc   : > { %1465 = vmatprep.subr.bf16.mxu1 %v4311_v51  ;;  %3196 = vmatpush1.bf16.msra.mxu0 %v4932_v52  ;;  %v4982_v51 = vld [vmem:[%s7049_s11 + $0x204] ss:$16 sps:$4 sm:$0xff]   ;;  %v4953_v52 = vld [vmem:[%s7049_s11 + $0x168] ss:$16 sps:$4 sm:$0xff]  }
 0x3bd   : > { %3197 = vmatprep.subr.bf16.mxu0 %v4940_v56  ;;  %v4967_v56 = vld [vmem:[%s7049_s11 + $0x1ac] ss:$16 sps:$4 sm:$0xff]  }
 0x3bf   : > { %1466 = vmatpush1.bf16.msra.mxu1 %v4310_v57  ;;  %v4965_v57 = vld [vmem:[%s7049_s11 + $0x1a8] ss:$16 sps:$4 sm:$0xff]  }
 0x3c0   : > { %1467 = vmatprep.subr.bf16.mxu1 %v4319_v58  ;;  %3198 = vmatpush1.bf16.msra.mxu0 %v4938_v59  ;;  %v4973_v58 = vld [vmem:[%s7049_s11 + $0x1cc] ss:$16 sps:$4 sm:$0xff]   ;;  %v4971_v59 = vld [vmem:[%s7049_s11 + $0x1c8] ss:$16 sps:$4 sm:$0xff]  }
 0x3c1   : > { %3199 = vmatprep.subr.bf16.mxu0 %v4946_v53  ;;  %v4985_v53 = vld [vmem:[%s7049_s11 + $0x20c] ss:$16 sps:$4 sm:$0xff]  }
 0x3c3   : > { %1468 = vmatpush1.bf16.msra.mxu1 %v4318_v62  ;;  %v974_v62 = vlaneseq }
 0x3c4   : > { %1469 = vmatprep.subr.bf16.mxu1 %v4327_v63  ;;  %3200 = vmatpush1.bf16.msra.mxu0 %v4944_v0 }
 0x3c5   : > { %3201 = vmatprep.subr.bf16.mxu0 %v4952_v31  ;;  %v6094_v63 = vshrl.u32 %v974_v62, 7 }
 0x3c7   : > { %1470 = vmatpush1.bf16.msra.mxu1 %v4326_v4  ;;  %v6097_v0 = vsub.s32 0, %v6094_v63  ;;  %v992_v1 = vsub.s32 4, %v6094_v63  ;;  %v6106_v4 = vsub.s32 1, %v6094_v63 }
 0x3c8   : > { %1471 = vmatprep.subr.bf16.mxu1 %v4335_v5  ;;  %3202 = vmatpush1.bf16.msra.mxu0 %v4950_v33  ;;  %v996_v5 = vsub.s32 5, %v6094_v63 }
 0x3c9   : > { %3203 = vmatprep.subr.bf16.mxu0 %v4958_v35  ;;  %v977_v6 = vrot.slane %v6103_v3, %v6097_v0  ;;  %v993_v7 = vrot.slane %v6103_v3, %v992_v1  ;;  %v981_v10 = vrot.slane %v6103_v3, %v6106_v4  ;;  %v5006_v1 = vld [vmem:[%s7049_s11 + $0x284] ss:$16 sps:$4 sm:$0xff]  }
 0x3ca   : > { %v997_v11 = vrot.slane %v6103_v3, %v996_v5  ;;  %v5009_v5 = vld [vmem:[%s7049_s11 + $0x28c] ss:$16 sps:$4 sm:$0xff]  }
 0x3cb   : > { %1472 = vmatpush1.bf16.msra.mxu1 %v4334_v8 }
 0x3cc   : > { %1473 = vmatprep.subr.bf16.mxu1 %v4343_v9  ;;  %3204 = vmatpush1.bf16.msra.mxu0 %v4956_v37 }
 0x3cd   : > { %3205 = vmatprep.subr.bf16.mxu0 %v4964_v39 }
 0x3cf   : > { %1474 = vmatpush1.bf16.msra.mxu1 %v4342_v12 }
 0x3d0   : > { %1475 = vmatprep.subr.bf16.mxu1 %v4351_v13  ;;  %3206 = vmatpush1.bf16.msra.mxu0 %v4962_v41 }
 0x3d1   : > { %3207 = vmatprep.subr.bf16.mxu0 %v4970_v43  ;;  %v4983_v43 = vld [vmem:[%s7049_s11 + $0x208] ss:$16 sps:$4 sm:$0xff]  }
 0x3d3   : > { %1476 = vmatpush1.bf16.msra.mxu1 %v4350_v16 }
 0x3d4   : > { %1477 = vmatprep.subr.bf16.mxu1 %v4359_v17  ;;  %3208 = vmatpush1.bf16.msra.mxu0 %v4968_v45  ;;  %v4988_v45 = vld [vmem:[%s7049_s11 + $0x224] ss:$16 sps:$4 sm:$0xff]  }
 0x3d5   : > { %3209 = vmatprep.subr.bf16.mxu0 %v4976_v47  ;;  %v4986_v47 = vld [vmem:[%s7049_s11 + $0x220] ss:$16 sps:$4 sm:$0xff]  }
 0x3d7   : > { %1478 = vmatpush1.bf16.msra.mxu1 %v4358_v18 }
 0x3d8   : > { %3343 = vmatprep.subr.bf16.mxu1 %v4889_v19  ;;  %3210 = vmatpush1.bf16.msra.mxu0 %v4974_v48  ;;  %v4989_v48 = vld [vmem:[%s7049_s11 + $0x228] ss:$16 sps:$4 sm:$0xff]  }
 0x3d9   : > { %3220 = vmatprep.subr.bf16.mxu0 %v4982_v51  ;;  %v984_v51 = vsub.s32 2, %v6094_v63 }
 0x3da   : > { %1496 = vmatmul.mubr.bf16.vlgmr.msra.gmra.mrb[20].mxu1 %v5807_v2  ;;  %v4907_v2 = vld [vmem:[%s7049_s11 + $0x6c] ss:$16 sps:$4 sm:$0xff]  }
 0x3db   : > { %3344 = vmatpush1.bf16.msra.mxu1 %v4887_v20 }
 0x3dc   : > { %3345 = vmatprep.subr.bf16.mxu1 %v4895_v21 }
 0x3df   : > { %3346 = vmatpush1.bf16.msra.mxu1 %v4893_v22 }
 0x3e0   : > { %3347 = vmatprep.subr.bf16.mxu1 %v4901_v23 }
 0x3e3   : > { %3348 = vmatpush1.bf16.msra.mxu1 %v4899_v24 }
 0x3e4   : > { %3349 = vmatprep.subr.bf16.mxu1 %v4907_v2 }
 0x3e7   : > { %3350 = vmatpush1.bf16.msra.mxu1 %v4905_v25 }
 0x3e8   : > { %3351 = vmatprep.subr.bf16.mxu1 %v4913_v26 }
 0x3eb   : > { %3352 = vmatpush1.bf16.msra.mxu1 %v4911_v27 }
 0x3ec   : > { %3353 = vmatprep.subr.bf16.mxu1 %v4919_v28 }
 0x3ef   : > { %3354 = vmatpush1.bf16.msra.mxu1 %v4917_v29 }
 0x3f0   : > { %3355 = vmatprep.subr.bf16.mxu1 %v4925_v30 }
 0x3f3   : > { %3356 = vmatpush1.bf16.msra.mxu1 %v4923_v32 }
 0x3f4   : > { %3357 = vmatprep.subr.bf16.mxu1 %v4931_v34 }
 0x3f7   : > { %3358 = vmatpush1.bf16.msra.mxu1 %v4929_v36 }
 0x3f8   : > { %3359 = vmatprep.subr.bf16.mxu1 %v4937_v38 }
 0x3fb   : > { %3360 = vmatpush1.bf16.msra.mxu1 %v4935_v40 }
 0x3fc   : > { %3361 = vmatprep.subr.bf16.mxu1 %v4943_v42  ;;  %v4980_v42 = vld [vmem:[%s7049_s11 + $0x200] ss:$16 sps:$4 sm:$0xff]  }
 0x3ff   : > { %3362 = vmatpush1.bf16.msra.mxu1 %v4941_v44 }
 0x400   : > { %3363 = vmatprep.subr.bf16.mxu1 %v4949_v46  ;;  %v4991_v46 = vld [vmem:[%s7049_s11 + $0x22c] ss:$16 sps:$4 sm:$0xff]  }
 0x403   : > { %3364 = vmatpush1.bf16.msra.mxu1 %v4947_v49  ;;  %v4994_v49 = vld [vmem:[%s7049_s11 + $0x244] ss:$16 sps:$4 sm:$0xff]  }
 0x404   : > { %3365 = vmatprep.subr.bf16.mxu1 %v4955_v50  ;;  %v4997_v50 = vld [vmem:[%s7049_s11 + $0x24c] ss:$16 sps:$4 sm:$0xff]  }
 0x407   : > { %3366 = vmatpush1.bf16.msra.mxu1 %v4953_v52  ;;  %v4992_v52 = vld [vmem:[%s7049_s11 + $0x240] ss:$16 sps:$4 sm:$0xff]  }
 0x408   : > { %3367 = vmatprep.subr.bf16.mxu1 %v4961_v54  ;;  %v4995_v54 = vld [vmem:[%s7049_s11 + $0x248] ss:$16 sps:$4 sm:$0xff]  }
 0x40b   : > { %3368 = vmatpush1.bf16.msra.mxu1 %v4959_v55  ;;  %v988_v55 = vsub.s32 3, %v6094_v63 }
 0x40c   : > { %3369 = vmatprep.subr.bf16.mxu1 %v4967_v56  ;;  %v5000_v56 = vld [vmem:[%s7049_s11 + $0x264] ss:$16 sps:$4 sm:$0xff]  }
 0x40f   : > { %3370 = vmatpush1.bf16.msra.mxu1 %v4965_v57  ;;  %v5003_v57 = vld [vmem:[%s7049_s11 + $0x26c] ss:$16 sps:$4 sm:$0xff]  }
 0x410   : > { %3371 = vmatprep.subr.bf16.mxu1 %v4973_v58  ;;  %v985_v58 = vrot.slane %v6103_v3, %v984_v51 }
 0x413   : > { %3372 = vmatpush1.bf16.msra.mxu1 %v4971_v59 }
 0x414   : > { %3373 = vmatprep.subr.bf16.mxu1 %v4979_v60  ;;  %v989_v60 = vrot.slane %v6103_v3, %v988_v55 }
 0x417   : > { %3374 = vmatpush1.bf16.msra.mxu1 %v4977_v61  ;;  %v4998_v61 = vld [vmem:[%s7049_s11 + $0x260] ss:$16 sps:$4 sm:$0xff]  }
 0x418   : > { %3384 = vmatprep.subr.bf16.mxu1 %v4985_v53  ;;  %v5001_v53 = vld [vmem:[%s7049_s11 + $0x268] ss:$16 sps:$4 sm:$0xff]  }
 0x46d   : > { %v1368_v8 = vpop.f32.mrb[12].mxu1  ;;  %v1454_v9 = vpop.f32.mrb[4].mxu0 }
 0x46e   : > { %v1370_v12 = vpop.f32.mrb[13].mxu1  ;;  %v1456_v13 = vpop.f32.mrb[5].mxu0  ;;  %v1369_v16 = vadd.f32 %v1368_v8, %v977_v6  ;;  %v1455_v17 = vadd.f32 %v1454_v9, %v993_v7 }
 0x46f   : > { %v1372_v14 = vpop.f32.mrb[14].mxu1  ;;  %v1458_v15 = vpop.f32.mrb[6].mxu0  ;;  %v1371_v22 = vadd.f32 %v1370_v12, %v981_v10  ;;  %v1457_v23 = vadd.f32 %v1456_v13, %v997_v11  ;;  %v5004_v12 = vld [vmem:[%s7049_s11 + $0x280] ss:$16 sps:$4 sm:$0xff]   ;;  %v5007_v13 = vld [vmem:[%s7049_s11 + $0x288] ss:$16 sps:$4 sm:$0xff]  }
 0x470   : > { %v1373_v18 = vadd.f32 %v1372_v14, %v977_v6  ;;  %v1459_v19 = vadd.f32 %v1458_v15, %v993_v7  ;;  %v1374_v20 = vpop.f32.mrb[15].mxu1  ;;  %v1460_v21 = vpop.f32.mrb[7].mxu0  ;;  %v5012_v15 = vld [vmem:[%s7049_s11 + $0x2a4] ss:$16 sps:$4 sm:$0xff]  }
 0x471   : > { %v1375_v24 = vadd.f32 %v1374_v20, %v981_v10  ;;  %v1461_v2 = vadd.f32 %v1460_v21, %v997_v11  ;;  %v5013_v20 = vld [vmem:[%s7049_s11 + $0x2a8] ss:$16 sps:$4 sm:$0xff]   ;;  %v5018_v21 = vld [vmem:[%s7049_s11 + $0x2c4] ss:$16 sps:$4 sm:$0xff]  }
 0x472   : > { %v1506_v25 = vmax.f32 %v1369_v16, %v1373_v18  ;;  %v6115_v26 = vmax.f32 %v1455_v17, %v1459_v19  ;;  %v5015_v16 = vld [vmem:[%s7049_s11 + $0x2ac] ss:$16 sps:$4 sm:$0xff]   ;;  %v5010_v19 = vld [vmem:[%s7049_s11 + $0x2a0] ss:$16 sps:$4 sm:$0xff]  }
 0x473   : > { %v1507_v27 = vmax.f32 %v1371_v22, %v1375_v24  ;;  %v6117_v28 = vmax.f32 %v1457_v23, %v1461_v2  ;;  %v5021_v22 = vld [vmem:[%s7049_s11 + $0x2cc] ss:$16 sps:$4 sm:$0xff]   ;;  %v5016_v2 = vld [vmem:[%s7049_s11 + $0x2c0] ss:$16 sps:$4 sm:$0xff]  }
 0x474   : > { %v1565_v29 = vrot.slane %v1506_v25, 4 }
 0x475   : > { %v1571_v30 = vrot.slane %v1507_v27, 4 }
 0x476   : > { %v1566_v31 = vmax.f32 %v1506_v25, %v1565_v29  ;;  %v5019_v25 = vld [vmem:[%s7049_s11 + $0x2c8] ss:$16 sps:$4 sm:$0xff]   ;;  %v5027_v29 = vld [vmem:[%s7049_s11 + $0x2ec] ss:$16 sps:$4 sm:$0xff]  }
 0x477   : > { %v1572_v32 = vmax.f32 %v1507_v27, %v1571_v30  ;;  %v5024_v27 = vld [vmem:[%s7049_s11 + $0x2e4] ss:$16 sps:$4 sm:$0xff]  }
 0x478   : > { %v1567_v33 = vrot.slane %v1566_v31, 2 }
 0x479   : > { %v1573_v34 = vrot.slane %v1572_v32, 2 }
 0x47a   : > { %v1568_v35 = vmax.f32 %v1566_v31, %v1567_v33  ;;  %v5022_v31 = vld [vmem:[%s7049_s11 + $0x2e0] ss:$16 sps:$4 sm:$0xff]  }
 0x47b   : > { %v1574_v36 = vmax.f32 %v1572_v32, %v1573_v34  ;;  %v5025_v32 = vld [vmem:[%s7049_s11 + $0x2e8] ss:$16 sps:$4 sm:$0xff]   ;;  %v5030_v34 = vld [vmem:[%s7049_s11 + $0x304] ss:$16 sps:$4 sm:$0xff]  }
 0x47c   : > { %v1569_v37 = vrot.slane %v1568_v35, 1 }
 0x47d   : > { %v1575_v38 = vrot.slane %v1574_v36, 1 }
 0x47e   : > { %v1570_v39 = vmax.f32 %v1568_v35, %v1569_v37  ;;  %v5033_v35 = vld [vmem:[%s7049_s11 + $0x30c] ss:$16 sps:$4 sm:$0xff]  }
 0x47f   : > { %v1576_v40 = vmax.f32 %v1574_v36, %v1575_v38  ;;  %v5028_v38 = vld [vmem:[%s7049_s11 + $0x300] ss:$16 sps:$4 sm:$0xff]  }
 0x480   : > { %v1613_v44 = vpack.c.bf16 %v1570_v39, %v1570_v39  ;;  %v5031_v39 = vld [vmem:[%s7049_s11 + $0x308] ss:$16 sps:$4 sm:$0xff]  }
 0x481   : > { %v1614_v41 = vpack.c.bf16 %v1576_v40, %v1576_v40  ;;  %v5036_v40 = vld [vmem:[%s7049_s11 + $0x324] ss:$16 sps:$4 sm:$0xff]  }
 0x483   : > { %3211 = vmatprep.mubr.bf16.mxu0 %v1614_v41  ;;  %3375 = vmatprep.mubr.bf16.mxu1 %v1614_v41  ;;  %v5039_v41 = vld [vmem:[%s7049_s11 + $0x32c] ss:$16 sps:$4 sm:$0xff]  }
 0x484   : > { %3212 = vmatmul.mubr.bf16.vlgmr.msra.gmra.mrb[8].mxu0 %v1613_v44  ;;  %3376 = vmatmul.mubr.bf16.vlgmr.msra.gmra.mrb[24].mxu1 %v1613_v44  ;;  %v5042_v44 = vld [vmem:[%s7049_s11 + $0x344] ss:$16 sps:$4 sm:$0xff]  }
 0x485   : > { %3221 = vmatpush1.bf16.msra.mxu0 %v4980_v42  ;;  %3385 = vmatpush1.bf16.msra.mxu1 %v4983_v43  ;;  %v5034_v42 = vld [vmem:[%s7049_s11 + $0x320] ss:$16 sps:$4 sm:$0xff]   ;;  %v5037_v43 = vld [vmem:[%s7049_s11 + $0x328] ss:$16 sps:$4 sm:$0xff]  }
 0x486   : > { %3222 = vmatprep.subr.bf16.mxu0 %v4988_v45  ;;  %3386 = vmatprep.subr.bf16.mxu1 %v4991_v46  ;;  %v5045_v45 = vld [vmem:[%s7049_s11 + $0x34c] ss:$16 sps:$4 sm:$0xff]   ;;  %v1000_v46 = vsub.s32 6, %v6094_v63 }
 0x489   : > { %3223 = vmatpush1.bf16.msra.mxu0 %v4986_v47  ;;  %3387 = vmatpush1.bf16.msra.mxu1 %v4989_v48  ;;  %v5040_v47 = vld [vmem:[%s7049_s11 + $0x340] ss:$16 sps:$4 sm:$0xff]   ;;  %v5043_v48 = vld [vmem:[%s7049_s11 + $0x348] ss:$16 sps:$4 sm:$0xff]  }
 0x48a   : > { %3224 = vmatprep.subr.bf16.mxu0 %v4994_v49  ;;  %3388 = vmatprep.subr.bf16.mxu1 %v4997_v50  ;;  %v1004_v49 = vsub.s32 7, %v6094_v63  ;;  %v5361_v63 = vld [vmem:[%s7051_s13 + $0x1f0] ss:$8 sps:$4 sm:$0xff]  }
 0x48d   : > { %v1411_v59 = vpop.f32.mrb[16].mxu1  ;;  %3225 = vmatpush1.bf16.msra.mxu0 %v4992_v52  ;;  %3389 = vmatpush1.bf16.msra.mxu1 %v4995_v54  ;;  %v5048_v52 = vld [vmem:[%s7049_s11 + $0x364] ss:$16 sps:$4 sm:$0xff]   ;;  %v5051_v54 = vld [vmem:[%s7049_s11 + $0x36c] ss:$16 sps:$4 sm:$0xff]  }
 0x48e   : > { %v1413_v62 = vpop.f32.mrb[17].mxu1  ;;  %3226 = vmatprep.subr.bf16.mxu0 %v5000_v56  ;;  %3390 = vmatprep.subr.bf16.mxu1 %v5003_v57  ;;  %v1412_v7 = vadd.f32 %v1411_v59, %v985_v58  ;;  %v1595_v56 = vrot.slane %v6117_v28, 4  ;;  %v1001_v57 = vrot.slane %v6103_v3, %v1000_v46  ;;  %v1005_v59 = vrot.slane %v6103_v3, %v1004_v49  ;;  %v5057_v3 = vld [vmem:[%s7049_s11 + $0x38c] ss:$16 sps:$4 sm:$0xff]   ;;  %v5090_v46 = vld [vmem:[%s7049_s11 + $0x444] ss:$16 sps:$4 sm:$0xff]  }
 0x48f   : > { %v1415_v6 = vpop.f32.mrb[18].mxu1  ;;  %v1414_v10 = vadd.f32 %v1413_v62, %v989_v60  ;;  %v5091_v49 = vld [vmem:[%s7049_s11 + $0x448] ss:$16 sps:$4 sm:$0xff]  }
 0x490   : > { %v1416_v8 = vadd.f32 %v1415_v6, %v985_v58  ;;  %v1417_v9 = vpop.f32.mrb[19].mxu1 }
 0x491   : > { %v1418_v11 = vadd.f32 %v1417_v9, %v989_v60  ;;  %3227 = vmatpush1.bf16.msra.mxu0 %v4998_v61  ;;  %3391 = vmatpush1.bf16.msra.mxu1 %v5001_v53  ;;  %v5046_v60 = vld [vmem:[%s7049_s11 + $0x360] ss:$16 sps:$4 sm:$0xff]   ;;  %v5049_v61 = vld [vmem:[%s7049_s11 + $0x368] ss:$16 sps:$4 sm:$0xff]  }
 0x492   : > { %v6181_v14 = vmax.f32 %v1412_v7, %v1416_v8  ;;  %3228 = vmatprep.subr.bf16.mxu0 %v5006_v1  ;;  %3392 = vmatprep.subr.bf16.mxu1 %v5009_v5  ;;  %v5054_v1 = vld [vmem:[%s7049_s11 + $0x384] ss:$16 sps:$4 sm:$0xff]   ;;  %v1596_v5 = vmax.f32 %v6117_v28, %v1595_v56  ;;  %v5097_v56 = vld [vmem:[%s7049_s11 + $0x468] ss:$16 sps:$4 sm:$0xff]  }
 0x493   : > { %v1509_v17 = vmax.f32 %v1414_v10, %v1418_v11  ;;  %v5060_v28 = vld [vmem:[%s7049_s11 + $0x3a4] ss:$16 sps:$4 sm:$0xff]  }
 0x494   : > { %v1577_v50 = vrot.slane %v6181_v14, 4 }
 0x495   : > { %v1583_v18 = vrot.slane %v1509_v17, 4  ;;  %3229 = vmatpush1.bf16.msra.mxu0 %v5004_v12  ;;  %3393 = vmatpush1.bf16.msra.mxu1 %v5007_v13  ;;  %v5052_v12 = vld [vmem:[%s7049_s11 + $0x380] ss:$16 sps:$4 sm:$0xff]   ;;  %v5055_v13 = vld [vmem:[%s7049_s11 + $0x388] ss:$16 sps:$4 sm:$0xff]  }
 0x496   : > { %3230 = vmatprep.subr.bf16.mxu0 %v5012_v15  ;;  %3394 = vmatprep.subr.bf16.mxu1 %v5015_v16  ;;  %v1578_v53 = vmax.f32 %v6181_v14, %v1577_v50  ;;  %v5063_v16 = vld [vmem:[%s7049_s11 + $0x3ac] ss:$16 sps:$4 sm:$0xff]   ;;  %v5096_v50 = vld [vmem:[%s7049_s11 + $0x464] ss:$16 sps:$4 sm:$0xff]  }
 0x497   : > { %v1584_v23 = vmax.f32 %v1509_v17, %v1583_v18  ;;  %v1597_v17 = vrot.slane %v1596_v5, 2 }
 0x498   : > { %v1579_v14 = vrot.slane %v1578_v53, 2 }
 0x499   : > { %v1585_v24 = vrot.slane %v1584_v23, 2  ;;  %3231 = vmatpush1.bf16.msra.mxu0 %v5010_v19  ;;  %3395 = vmatpush1.bf16.msra.mxu1 %v5013_v20  ;;  %v5058_v19 = vld [vmem:[%s7049_s11 + $0x3a0] ss:$16 sps:$4 sm:$0xff]   ;;  %v5061_v20 = vld [vmem:[%s7049_s11 + $0x3a8] ss:$16 sps:$4 sm:$0xff]  }
 0x49a   : > { %3232 = vmatprep.subr.bf16.mxu0 %v5018_v21  ;;  %3396 = vmatprep.subr.bf16.mxu1 %v5021_v22  ;;  %v1580_v21 = vmax.f32 %v1578_v53, %v1579_v14  ;;  %v5066_v22 = vld [vmem:[%s7049_s11 + $0x3c4] ss:$16 sps:$4 sm:$0xff]   ;;  %v5111_v53 = vld [vmem:[%s7049_s11 + $0x4ac] ss:$16 sps:$4 sm:$0xff]   ;;  %v5124_v14 = vld [vmem:[%s7049_s11 + $0x500] ss:$16 sps:$4 sm:$0xff]  }
 0x49b   : > { %v1586_v30 = vmax.f32 %v1584_v23, %v1585_v24  ;;  %v5069_v23 = vld [vmem:[%s7049_s11 + $0x3cc] ss:$16 sps:$4 sm:$0xff]   ;;  %v1598_v24 = vmax.f32 %v1596_v5, %v1597_v17 }
 0x49c   : > { %v5117_v5 = vld [vmem:[%s7049_s11 + $0x4cc] ss:$16 sps:$4 sm:$0xff]  }
 0x49d   : > { %3233 = vmatpush1.bf16.msra.mxu0 %v5016_v2  ;;  %3397 = vmatpush1.bf16.msra.mxu1 %v5019_v25  ;;  %v1587_v33 = vrot.slane %v1586_v30, 1  ;;  %v5064_v2 = vld [vmem:[%s7049_s11 + $0x3c0] ss:$16 sps:$4 sm:$0xff]   ;;  %v5067_v25 = vld [vmem:[%s7049_s11 + $0x3c8] ss:$16 sps:$4 sm:$0xff]  }
 0x49e   : > { %3234 = vmatprep.subr.bf16.mxu0 %v5024_v27  ;;  %3398 = vmatprep.subr.bf16.mxu1 %v5027_v29  ;;  %v1581_v27 = vrot.slane %v1580_v21, 1  ;;  %v5072_v29 = vld [vmem:[%s7049_s11 + $0x3e4] ss:$16 sps:$4 sm:$0xff]   ;;  %v5135_v17 = vld [vmem:[%s7049_s11 + $0x52c] ss:$16 sps:$4 sm:$0xff]  }
 0x49f   : > { %v1588_v36 = vmax.f32 %v1586_v30, %v1587_v33  ;;  %v5075_v30 = vld [vmem:[%s7049_s11 + $0x3ec] ss:$16 sps:$4 sm:$0xff]   ;;  %v5073_v33 = vld [vmem:[%s7049_s11 + $0x3e8] ss:$16 sps:$4 sm:$0xff]  }
 0x4a1   : > { %3235 = vmatpush1.bf16.msra.mxu0 %v5022_v31  ;;  %3399 = vmatpush1.bf16.msra.mxu1 %v5025_v32  ;;  %v1616_v37 = vpack.c.bf16 %v1588_v36, %v1588_v36  ;;  %v1599_v31 = vrot.slane %v1598_v24, 1  ;;  %v5070_v32 = vld [vmem:[%s7049_s11 + $0x3e0] ss:$16 sps:$4 sm:$0xff]   ;;  %v5081_v36 = vld [vmem:[%s7049_s11 + $0x40c] ss:$16 sps:$4 sm:$0xff]  }
 0x4a2   : > { %3236 = vmatprep.subr.bf16.mxu0 %v5030_v34  ;;  %3400 = vmatprep.subr.bf16.mxu1 %v5033_v35  ;;  %v1582_v34 = vmax.f32 %v1580_v21, %v1581_v27  ;;  %v5078_v35 = vld [vmem:[%s7049_s11 + $0x404] ss:$16 sps:$4 sm:$0xff]   ;;  %v5147_v27 = vld [vmem:[%s7049_s11 + $0x56c] ss:$16 sps:$4 sm:$0xff]  }
 0x4a3   : > { %3252 = vmatprep.mubr.bf16.mxu0 %v1616_v37  ;;  %3416 = vmatprep.mubr.bf16.mxu1 %v1616_v37  ;;  %v1600_v37 = vmax.f32 %v1598_v24, %v1599_v31  ;;  %v5138_v21 = vld [vmem:[%s7049_s11 + $0x544] ss:$16 sps:$4 sm:$0xff]   ;;  %v1589_v24 = vrot.slane %v6115_v26, 4 }
 0x4a5   : > { %3237 = vmatpush1.bf16.msra.mxu0 %v5028_v38  ;;  %3401 = vmatpush1.bf16.msra.mxu1 %v5031_v39  ;;  %v5076_v38 = vld [vmem:[%s7049_s11 + $0x400] ss:$16 sps:$4 sm:$0xff]   ;;  %v1615_v39 = vpack.c.bf16 %v1582_v34, %v1582_v34  ;;  %v1590_v31 = vmax.f32 %v6115_v26, %v1589_v24  ;;  %v5153_v34 = vld [vmem:[%s7049_s11 + $0x58c] ss:$16 sps:$4 sm:$0xff]   ;;  %v5205_v24 = vld [vmem:[%s7049_s11 + $0x6a8] ss:$16 sps:$4 sm:$0xff]  }
 0x4a6   : > { %3238 = vmatprep.subr.bf16.mxu0 %v5036_v40  ;;  %3402 = vmatprep.subr.bf16.mxu1 %v5039_v41  ;;  %v5079_v40 = vld [vmem:[%s7049_s11 + $0x408] ss:$16 sps:$4 sm:$0xff]   ;;  %v1618_v41 = vpack.c.bf16 %v1600_v37, %v1600_v37  ;;  %v5148_v26 = vld [vmem:[%s7049_s11 + $0x580] ss:$16 sps:$4 sm:$0xff]  }
 0x4a7   : > { %v5151_v37 = vld [vmem:[%s7049_s11 + $0x588] ss:$16 sps:$4 sm:$0xff]  }
 0x4a9   : > { %3239 = vmatpush1.bf16.msra.mxu0 %v5034_v42  ;;  %3403 = vmatpush1.bf16.msra.mxu1 %v5037_v43  ;;  %v5084_v42 = vld [vmem:[%s7049_s11 + $0x424] ss:$16 sps:$4 sm:$0xff]   ;;  %v5087_v43 = vld [vmem:[%s7049_s11 + $0x42c] ss:$16 sps:$4 sm:$0xff]  }
 0x4aa   : > { %3240 = vmatprep.subr.bf16.mxu0 %v5042_v44  ;;  %3404 = vmatprep.subr.bf16.mxu1 %v5045_v45  ;;  %v5082_v44 = vld [vmem:[%s7049_s11 + $0x420] ss:$16 sps:$4 sm:$0xff]   ;;  %v5085_v45 = vld [vmem:[%s7049_s11 + $0x428] ss:$16 sps:$4 sm:$0xff]  }
 0x4ad   : > { %v1497_v58 = vpop.f32.mrb[20].mxu1  ;;  %3241 = vmatpush1.bf16.msra.mxu0 %v5040_v47  ;;  %3405 = vmatpush1.bf16.msra.mxu1 %v5043_v48  ;;  %v5093_v47 = vld [vmem:[%s7049_s11 + $0x44c] ss:$16 sps:$4 sm:$0xff]   ;;  %v5088_v48 = vld [vmem:[%s7049_s11 + $0x440] ss:$16 sps:$4 sm:$0xff]  }
 0x4ae   : > { %v1499_v62 = vpop.f32.mrb[21].mxu1  ;;  %3242 = vmatprep.subr.bf16.mxu0 %v5048_v52  ;;  %3406 = vmatprep.subr.bf16.mxu1 %v5051_v54  ;;  %v1498_v7 = vadd.f32 %v1497_v58, %v1001_v57  ;;  %v5099_v52 = vld [vmem:[%s7049_s11 + $0x46c] ss:$16 sps:$4 sm:$0xff]   ;;  %v5094_v54 = vld [vmem:[%s7049_s11 + $0x460] ss:$16 sps:$4 sm:$0xff]  }
 0x4af   : > { %v1501_v6 = vpop.f32.mrb[22].mxu1  ;;  %v1500_v10 = vadd.f32 %v1499_v62, %v1005_v59  ;;  %v5105_v58 = vld [vmem:[%s7049_s11 + $0x48c] ss:$16 sps:$4 sm:$0xff]   ;;  %v5106_v62 = vld [vmem:[%s7049_s11 + $0x4a0] ss:$16 sps:$4 sm:$0xff]  }
 0x4b0   : > { %v1502_v8 = vadd.f32 %v1501_v6, %v1001_v57  ;;  %v1503_v9 = vpop.f32.mrb[23].mxu1  ;;  %v5102_v57 = vld [vmem:[%s7049_s11 + $0x484] ss:$16 sps:$4 sm:$0xff]   ;;  %v5112_v6 = vld [vmem:[%s7049_s11 + $0x4c0] ss:$16 sps:$4 sm:$0xff]  }
 0x4b1   : > { %v1504_v11 = vadd.f32 %v1503_v9, %v1005_v59  ;;  %3243 = vmatpush1.bf16.msra.mxu0 %v5046_v60  ;;  %3407 = vmatpush1.bf16.msra.mxu1 %v5049_v61  ;;  %v5100_v59 = vld [vmem:[%s7049_s11 + $0x480] ss:$16 sps:$4 sm:$0xff]   ;;  %v5103_v60 = vld [vmem:[%s7049_s11 + $0x488] ss:$16 sps:$4 sm:$0xff]   ;;  %v5108_v61 = vld [vmem:[%s7049_s11 + $0x4a4] ss:$16 sps:$4 sm:$0xff]  }
 0x4b2   : > { %v6287_v15 = vmax.f32 %v1498_v7, %v1502_v8  ;;  %3244 = vmatprep.subr.bf16.mxu0 %v5054_v1  ;;  %3408 = vmatprep.subr.bf16.mxu1 %v5057_v3  ;;  %v5109_v1 = vld [vmem:[%s7049_s11 + $0x4a8] ss:$16 sps:$4 sm:$0xff]   ;;  %v5114_v3 = vld [vmem:[%s7049_s11 + $0x4c4] ss:$16 sps:$4 sm:$0xff]   ;;  %v5123_v9 = vld [vmem:[%s7049_s11 + $0x4ec] ss:$16 sps:$4 sm:$0xff]  }
 0x4b3   : > { %v6295_v18 = vmax.f32 %v1500_v10, %v1504_v11  ;;  %v5115_v7 = vld [vmem:[%s7049_s11 + $0x4c8] ss:$16 sps:$4 sm:$0xff]   ;;  %v5120_v8 = vld [vmem:[%s7049_s11 + $0x4e4] ss:$16 sps:$4 sm:$0xff]   ;;  %v5118_v10 = vld [vmem:[%s7049_s11 + $0x4e0] ss:$16 sps:$4 sm:$0xff]  }
 0x4b4   : > { %v5121_v11 = vld [vmem:[%s7049_s11 + $0x4e8] ss:$16 sps:$4 sm:$0xff]  }
 0x4b5   : > { %3245 = vmatpush1.bf16.msra.mxu0 %v5052_v12  ;;  %3409 = vmatpush1.bf16.msra.mxu1 %v5055_v13  ;;  %v5126_v12 = vld [vmem:[%s7049_s11 + $0x504] ss:$16 sps:$4 sm:$0xff]   ;;  %v5129_v13 = vld [vmem:[%s7049_s11 + $0x50c] ss:$16 sps:$4 sm:$0xff]  }
 0x4b6   : > { %3246 = vmatprep.subr.bf16.mxu0 %v5060_v28  ;;  %3410 = vmatprep.subr.bf16.mxu1 %v5063_v16  ;;  %v5127_v28 = vld [vmem:[%s7049_s11 + $0x508] ss:$16 sps:$4 sm:$0xff]   ;;  %v5132_v16 = vld [vmem:[%s7049_s11 + $0x524] ss:$16 sps:$4 sm:$0xff]  }
 0x4b9   : > { %3247 = vmatpush1.bf16.msra.mxu0 %v5058_v19  ;;  %3411 = vmatpush1.bf16.msra.mxu1 %v5061_v20  ;;  %v5130_v19 = vld [vmem:[%s7049_s11 + $0x520] ss:$16 sps:$4 sm:$0xff]   ;;  %v5133_v20 = vld [vmem:[%s7049_s11 + $0x528] ss:$16 sps:$4 sm:$0xff]  }
 0x4ba   : > { %3248 = vmatprep.subr.bf16.mxu0 %v5066_v22  ;;  %3412 = vmatprep.subr.bf16.mxu1 %v5069_v23  ;;  %v5141_v22 = vld [vmem:[%s7049_s11 + $0x54c] ss:$16 sps:$4 sm:$0xff]   ;;  %v5136_v23 = vld [vmem:[%s7049_s11 + $0x540] ss:$16 sps:$4 sm:$0xff]  }
 0x4bd   : > { %3249 = vmatpush1.bf16.msra.mxu0 %v5064_v2  ;;  %3413 = vmatpush1.bf16.msra.mxu1 %v5067_v25  ;;  %v5139_v2 = vld [vmem:[%s7049_s11 + $0x548] ss:$16 sps:$4 sm:$0xff]   ;;  %v5144_v25 = vld [vmem:[%s7049_s11 + $0x564] ss:$16 sps:$4 sm:$0xff]  }
 0x4be   : > { %3250 = vmatprep.subr.bf16.mxu0 %v5072_v29  ;;  %3414 = vmatprep.subr.bf16.mxu1 %v5075_v30  ;;  %v1607_v29 = vrot.slane %v6295_v18, 4  ;;  %v5142_v30 = vld [vmem:[%s7049_s11 + $0x560] ss:$16 sps:$4 sm:$0xff]  }
 0x4c1   : > { %3251 = vmatpush1.bf16.msra.mxu0 %v5070_v32  ;;  %3415 = vmatpush1.bf16.msra.mxu1 %v5073_v33  ;;  %v5145_v32 = vld [vmem:[%s7049_s11 + $0x568] ss:$16 sps:$4 sm:$0xff]   ;;  %v5150_v33 = vld [vmem:[%s7049_s11 + $0x584] ss:$16 sps:$4 sm:$0xff]  }
 0x4c2   : > { %3261 = vmatprep.subr.bf16.mxu0 %v5078_v35  ;;  %3425 = vmatprep.subr.bf16.mxu1 %v5081_v36  ;;  %v1608_v35 = vmax.f32 %v6295_v18, %v1607_v29  ;;  %v1591_v36 = vrot.slane %v1590_v31, 2  ;;  %v5159_v18 = vld [vmem:[%s7049_s11 + $0x5ac] ss:$16 sps:$4 sm:$0xff]   ;;  %v5211_v29 = vld [vmem:[%s7049_s11 + $0x6c8] ss:$16 sps:$4 sm:$0xff]  }
 0x4c4   : > { %3253 = vmatmul.mubr.bf16.vlgmr.msra.gmra.mrb[8].mxu0 %v1615_v39  ;;  %3417 = vmatmul.mubr.bf16.vlgmr.msra.gmra.mrb[24].mxu1 %v1615_v39  ;;  %v1609_v39 = vrot.slane %v1608_v35, 2 }
 0x4c5   : > { %3262 = vmatpush1.bf16.msra.mxu0 %v5076_v38  ;;  %3293 = vmatprep.mubr.bf16.mxu0 %v1618_v41  ;;  %v5156_v38 = vld [vmem:[%s7049_s11 + $0x5a4] ss:$16 sps:$4 sm:$0xff]  }
 0x4c6   : > { %3426 = vmatpush1.bf16.msra.mxu1 %v5079_v40  ;;  %3457 = vmatprep.mubr.bf16.mxu1 %v1618_v41  ;;  %v5154_v40 = vld [vmem:[%s7049_s11 + $0x5a0] ss:$16 sps:$4 sm:$0xff]   ;;  %v1592_v41 = vmax.f32 %v1590_v31, %v1591_v36  ;;  %v5219_v31 = vld [vmem:[%s7049_s11 + $0x6ec] ss:$16 sps:$4 sm:$0xff]   ;;  %v5223_v36 = vld [vmem:[%s7049_s11 + $0x708] ss:$16 sps:$4 sm:$0xff]  }
 0x4c7   : > { %3263 = vmatprep.subr.bf16.mxu0 %v5084_v42  ;;  %3427 = vmatprep.subr.bf16.mxu1 %v5087_v43  ;;  %v5157_v42 = vld [vmem:[%s7049_s11 + $0x5a8] ss:$16 sps:$4 sm:$0xff]   ;;  %v5162_v43 = vld [vmem:[%s7049_s11 + $0x5c4] ss:$16 sps:$4 sm:$0xff]  }
 0x4c9   : > { %3264 = vmatpush1.bf16.msra.mxu0 %v5082_v44  ;;  %v5165_v44 = vld [vmem:[%s7049_s11 + $0x5cc] ss:$16 sps:$4 sm:$0xff]  }
 0x4ca   : > { %3428 = vmatpush1.bf16.msra.mxu1 %v5085_v45  ;;  %3265 = vmatprep.subr.bf16.mxu0 %v5090_v46  ;;  %v1610_v45 = vmax.f32 %v1608_v35, %v1609_v39  ;;  %v5160_v46 = vld [vmem:[%s7049_s11 + $0x5c0] ss:$16 sps:$4 sm:$0xff]   ;;  %v5225_v35 = vld [vmem:[%s7049_s11 + $0x70c] ss:$16 sps:$4 sm:$0xff]   ;;  %v5229_v39 = vld [vmem:[%s7049_s11 + $0x728] ss:$16 sps:$4 sm:$0xff]  }
 0x4cb   : > { %3429 = vmatprep.subr.bf16.mxu1 %v5093_v47  ;;  %v1593_v47 = vrot.slane %v1592_v41, 1 }
 0x4cd   : > { %3266 = vmatpush1.bf16.msra.mxu0 %v5088_v48  ;;  %v5163_v48 = vld [vmem:[%s7049_s11 + $0x5c8] ss:$16 sps:$4 sm:$0xff]  }
 0x4ce   : > { %3430 = vmatpush1.bf16.msra.mxu1 %v5091_v49  ;;  %3267 = vmatprep.subr.bf16.mxu0 %v5096_v50  ;;  %v5168_v49 = vld [vmem:[%s7049_s11 + $0x5e4] ss:$16 sps:$4 sm:$0xff]   ;;  %v5171_v50 = vld [vmem:[%s7049_s11 + $0x5ec] ss:$16 sps:$4 sm:$0xff]  }
 0x4cf   : > { %3431 = vmatprep.subr.bf16.mxu1 %v5099_v52  ;;  %v1611_v52 = vrot.slane %v1610_v45, 1 }
 0x4d1   : > { %3268 = vmatpush1.bf16.msra.mxu0 %v5094_v54  ;;  %v5166_v54 = vld [vmem:[%s7049_s11 + $0x5e0] ss:$16 sps:$4 sm:$0xff]  }
 0x4d2   : > { %3432 = vmatpush1.bf16.msra.mxu1 %v5097_v56  ;;  %3269 = vmatprep.subr.bf16.mxu0 %v5102_v57  ;;  %v5169_v56 = vld [vmem:[%s7049_s11 + $0x5e8] ss:$16 sps:$4 sm:$0xff]   ;;  %v1594_v57 = vmax.f32 %v1592_v41, %v1593_v47  ;;  %v5237_v41 = vld [vmem:[%s7049_s11 + $0x74c] ss:$16 sps:$4 sm:$0xff]   ;;  %v5238_v47 = vld [vmem:[%s7049_s11 + $0x760] ss:$16 sps:$4 sm:$0xff]  }
 0x4d3   : > { %3433 = vmatprep.subr.bf16.mxu1 %v5105_v58  ;;  %v5174_v58 = vld [vmem:[%s7049_s11 + $0x604] ss:$16 sps:$4 sm:$0xff]  }
 0x4d5   : > { %3270 = vmatpush1.bf16.msra.mxu0 %v5100_v59  ;;  %v5177_v59 = vld [vmem:[%s7049_s11 + $0x60c] ss:$16 sps:$4 sm:$0xff]  }
 0x4d6   : > { %3434 = vmatpush1.bf16.msra.mxu1 %v5103_v60  ;;  %3271 = vmatprep.subr.bf16.mxu0 %v5108_v61  ;;  %v1612_v60 = vmax.f32 %v1610_v45, %v1611_v52  ;;  %v5172_v61 = vld [vmem:[%s7049_s11 + $0x600] ss:$16 sps:$4 sm:$0xff]   ;;  %v5240_v45 = vld [vmem:[%s7049_s11 + $0x764] ss:$16 sps:$4 sm:$0xff]   ;;  %v5249_v52 = vld [vmem:[%s7049_s11 + $0x78c] ss:$16 sps:$4 sm:$0xff]  }
 0x4d7   : > { %3435 = vmatprep.subr.bf16.mxu1 %v5111_v53  ;;  %v1617_v53 = vpack.c.bf16 %v1594_v57, %v1594_v57  ;;  %v5252_v57 = vld [vmem:[%s7049_s11 + $0x7a4] ss:$16 sps:$4 sm:$0xff]  }
 0x4d9   : > { %3272 = vmatpush1.bf16.msra.mxu0 %v5106_v62  ;;  %v5175_v62 = vld [vmem:[%s7049_s11 + $0x608] ss:$16 sps:$4 sm:$0xff]  }
 0x4da   : > { %3436 = vmatpush1.bf16.msra.mxu1 %v5109_v1  ;;  %3273 = vmatprep.subr.bf16.mxu0 %v5114_v3  ;;  %v5180_v1 = vld [vmem:[%s7049_s11 + $0x624] ss:$16 sps:$4 sm:$0xff]   ;;  %v1620_v3 = vpack.c.bf16 %v1612_v60, %v1612_v60 }
 0x4db   : > { %3437 = vmatprep.subr.bf16.mxu1 %v5117_v5  ;;  %v5183_v5 = vld [vmem:[%s7049_s11 + $0x62c] ss:$16 sps:$4 sm:$0xff]  }
 0x4dd   : > { %3274 = vmatpush1.bf16.msra.mxu0 %v5112_v6  ;;  %v5178_v6 = vld [vmem:[%s7049_s11 + $0x620] ss:$16 sps:$4 sm:$0xff]  }
 0x4de   : > { %3438 = vmatpush1.bf16.msra.mxu1 %v5115_v7  ;;  %3275 = vmatprep.subr.bf16.mxu0 %v5120_v8  ;;  %v5181_v7 = vld [vmem:[%s7049_s11 + $0x628] ss:$16 sps:$4 sm:$0xff]   ;;  %v5186_v8 = vld [vmem:[%s7049_s11 + $0x644] ss:$16 sps:$4 sm:$0xff]  }
 0x4df   : > { %3439 = vmatprep.subr.bf16.mxu1 %v5123_v9  ;;  %v5189_v9 = vld [vmem:[%s7049_s11 + $0x64c] ss:$16 sps:$4 sm:$0xff]  }
 0x4e1   : > { %3276 = vmatpush1.bf16.msra.mxu0 %v5118_v10  ;;  %v5184_v10 = vld [vmem:[%s7049_s11 + $0x640] ss:$16 sps:$4 sm:$0xff]  }
 0x4e2   : > { %3440 = vmatpush1.bf16.msra.mxu1 %v5121_v11  ;;  %3277 = vmatprep.subr.bf16.mxu0 %v5126_v12  ;;  %v5187_v11 = vld [vmem:[%s7049_s11 + $0x648] ss:$16 sps:$4 sm:$0xff]   ;;  %v5192_v12 = vld [vmem:[%s7049_s11 + $0x664] ss:$16 sps:$4 sm:$0xff]  }
 0x4e3   : > { %3441 = vmatprep.subr.bf16.mxu1 %v5129_v13  ;;  %v5195_v13 = vld [vmem:[%s7049_s11 + $0x66c] ss:$16 sps:$4 sm:$0xff]  }
 0x4e5   : > { %3278 = vmatpush1.bf16.msra.mxu0 %v5124_v14  ;;  %v5190_v14 = vld [vmem:[%s7049_s11 + $0x660] ss:$16 sps:$4 sm:$0xff]  }
 0x4e6   : > { %3442 = vmatpush1.bf16.msra.mxu1 %v5127_v28  ;;  %3279 = vmatprep.subr.bf16.mxu0 %v5132_v16  ;;  %v5193_v28 = vld [vmem:[%s7049_s11 + $0x668] ss:$16 sps:$4 sm:$0xff]   ;;  %v5198_v16 = vld [vmem:[%s7049_s11 + $0x684] ss:$16 sps:$4 sm:$0xff]  }
 0x4e7   : > { %3443 = vmatprep.subr.bf16.mxu1 %v5135_v17  ;;  %v5201_v17 = vld [vmem:[%s7049_s11 + $0x68c] ss:$16 sps:$4 sm:$0xff]  }
 0x4e9   : > { %3280 = vmatpush1.bf16.msra.mxu0 %v5130_v19  ;;  %v5196_v19 = vld [vmem:[%s7049_s11 + $0x680] ss:$16 sps:$4 sm:$0xff]  }
 0x4ea   : > { %3444 = vmatpush1.bf16.msra.mxu1 %v5133_v20  ;;  %3281 = vmatprep.subr.bf16.mxu0 %v5138_v21  ;;  %v5199_v20 = vld [vmem:[%s7049_s11 + $0x688] ss:$16 sps:$4 sm:$0xff]   ;;  %v5204_v21 = vld [vmem:[%s7049_s11 + $0x6a4] ss:$16 sps:$4 sm:$0xff]  }
 0x4eb   : > { %3445 = vmatprep.subr.bf16.mxu1 %v5141_v22  ;;  %v5207_v22 = vld [vmem:[%s7049_s11 + $0x6ac] ss:$16 sps:$4 sm:$0xff]  }
 0x4ed   : > { %3282 = vmatpush1.bf16.msra.mxu0 %v5136_v23  ;;  %v5202_v23 = vld [vmem:[%s7049_s11 + $0x6a0] ss:$16 sps:$4 sm:$0xff]  }
 0x4ee   : > { %3446 = vmatpush1.bf16.msra.mxu1 %v5139_v2  ;;  %3283 = vmatprep.subr.bf16.mxu0 %v5144_v25  ;;  %v5210_v2 = vld [vmem:[%s7049_s11 + $0x6c4] ss:$16 sps:$4 sm:$0xff]   ;;  %v5213_v25 = vld [vmem:[%s7049_s11 + $0x6cc] ss:$16 sps:$4 sm:$0xff]  }
 0x4ef   : > { %3447 = vmatprep.subr.bf16.mxu1 %v5147_v27  ;;  %v5208_v27 = vld [vmem:[%s7049_s11 + $0x6c0] ss:$16 sps:$4 sm:$0xff]  }
 0x4f1   : > { %3284 = vmatpush1.bf16.msra.mxu0 %v5142_v30  ;;  %v5216_v30 = vld [vmem:[%s7049_s11 + $0x6e4] ss:$16 sps:$4 sm:$0xff]  }
 0x4f2   : > { %3448 = vmatpush1.bf16.msra.mxu1 %v5145_v32  ;;  %3285 = vmatprep.subr.bf16.mxu0 %v5150_v33  ;;  %v5214_v32 = vld [vmem:[%s7049_s11 + $0x6e0] ss:$16 sps:$4 sm:$0xff]   ;;  %v5217_v33 = vld [vmem:[%s7049_s11 + $0x6e8] ss:$16 sps:$4 sm:$0xff]  }
 0x4f3   : > { %3449 = vmatprep.subr.bf16.mxu1 %v5153_v34  ;;  %v5222_v34 = vld [vmem:[%s7049_s11 + $0x704] ss:$16 sps:$4 sm:$0xff]  }
 0x4f5   : > { %3286 = vmatpush1.bf16.msra.mxu0 %v5148_v26  ;;  %v5220_v26 = vld [vmem:[%s7049_s11 + $0x700] ss:$16 sps:$4 sm:$0xff]  }
 0x4f6   : > { %3450 = vmatpush1.bf16.msra.mxu1 %v5151_v37  ;;  %3287 = vmatprep.subr.bf16.mxu0 %v5156_v38  ;;  %v5228_v37 = vld [vmem:[%s7049_s11 + $0x724] ss:$16 sps:$4 sm:$0xff]   ;;  %v5231_v38 = vld [vmem:[%s7049_s11 + $0x72c] ss:$16 sps:$4 sm:$0xff]  }
 0x4f7   : > { %3451 = vmatprep.subr.bf16.mxu1 %v5159_v18  ;;  %v5226_v18 = vld [vmem:[%s7049_s11 + $0x720] ss:$16 sps:$4 sm:$0xff]  }
 0x4f9   : > { %3288 = vmatpush1.bf16.msra.mxu0 %v5154_v40  ;;  %v5234_v40 = vld [vmem:[%s7049_s11 + $0x744] ss:$16 sps:$4 sm:$0xff]  }
 0x4fa   : > { %3452 = vmatpush1.bf16.msra.mxu1 %v5157_v42  ;;  %3289 = vmatprep.subr.bf16.mxu0 %v5162_v43  ;;  %v5232_v42 = vld [vmem:[%s7049_s11 + $0x740] ss:$16 sps:$4 sm:$0xff]   ;;  %v1601_v43 = vrot.slane %v6287_v15, 4 }
 0x4fb   : > { %3453 = vmatprep.subr.bf16.mxu1 %v5165_v44  ;;  %v5235_v44 = vld [vmem:[%s7049_s11 + $0x748] ss:$16 sps:$4 sm:$0xff]  }
 0x4fd   : > { %3290 = vmatpush1.bf16.msra.mxu0 %v5160_v46  ;;  %v5243_v46 = vld [vmem:[%s7049_s11 + $0x76c] ss:$16 sps:$4 sm:$0xff]  }
 0x4fe   : > { %3454 = vmatpush1.bf16.msra.mxu1 %v5163_v48  ;;  %3291 = vmatprep.subr.bf16.mxu0 %v5168_v49  ;;  %v1602_v48 = vmax.f32 %v6287_v15, %v1601_v43  ;;  %v5241_v49 = vld [vmem:[%s7049_s11 + $0x768] ss:$16 sps:$4 sm:$0xff]   ;;  %v5244_v15 = vld [vmem:[%s7049_s11 + $0x780] ss:$16 sps:$4 sm:$0xff]  }
 0x4ff   : > { %3455 = vmatprep.subr.bf16.mxu1 %v5171_v50  ;;  %v5246_v50 = vld [vmem:[%s7049_s11 + $0x784] ss:$16 sps:$4 sm:$0xff]   ;;  %v5313_v43 = vld [vmem:[%s7051_s13 + $0xf0] ss:$8 sps:$4 sm:$0xff]  }
 0x501   : > { %3292 = vmatpush1.bf16.msra.mxu0 %v5166_v54  ;;  %v1603_v54 = vrot.slane %v1602_v48, 2 }
 0x502   : > { %3456 = vmatpush1.bf16.msra.mxu1 %v5169_v56  ;;  %3302 = vmatprep.subr.bf16.mxu0 %v5174_v58  ;;  %v5247_v56 = vld [vmem:[%s7049_s11 + $0x788] ss:$16 sps:$4 sm:$0xff]   ;;  %v5255_v58 = vld [vmem:[%s7049_s11 + $0x7ac] ss:$16 sps:$4 sm:$0xff]  }
 0x503   : > { %3466 = vmatprep.subr.bf16.mxu1 %v5177_v59  ;;  %v5250_v59 = vld [vmem:[%s7049_s11 + $0x7a0] ss:$16 sps:$4 sm:$0xff]   ;;  %v1604_v60 = vmax.f32 %v1602_v48, %v1603_v54  ;;  %v5367_v48 = vld [vmem:[%s7053_s15 + $0x8] sm:$0xff]  }
 0x504   : > { %3294 = vmatmul.mubr.bf16.vlgmr.msra.gmra.mrb[8].mxu0 %v1617_v53  ;;  %v5372_v54 = vld [vmem:[%s7053_s15 + $0x60] sm:$0xff]  }
 0x505   : > { %3458 = vmatmul.mubr.bf16.vlgmr.msra.gmra.mrb[24].mxu1 %v1617_v53  ;;  %3303 = vmatpush1.bf16.msra.mxu0 %v5172_v61  ;;  %v5253_v61 = vld [vmem:[%s7049_s11 + $0x7a8] ss:$16 sps:$4 sm:$0xff]   ;;  %v5258_v53 = vld [vmem:[%s7049_s11 + $0x7c4] ss:$16 sps:$4 sm:$0xff]  }
 0x506   : > { %3334 = vmatprep.mubr.bf16.mxu0 %v1620_v3  ;;  %3467 = vmatpush1.bf16.msra.mxu1 %v5175_v62  ;;  %v5261_v62 = vld [vmem:[%s7049_s11 + $0x7cc] ss:$16 sps:$4 sm:$0xff]  }
 0x507   : > { %3498 = vmatprep.mubr.bf16.mxu1 %v1620_v3  ;;  %3304 = vmatprep.subr.bf16.mxu0 %v5180_v1  ;;  %v5256_v1 = vld [vmem:[%s7049_s11 + $0x7c0] ss:$16 sps:$4 sm:$0xff]   ;;  %v1605_v3 = vrot.slane %v1604_v60, 1 }
 0x508   : > { %3468 = vmatprep.subr.bf16.mxu1 %v5183_v5  ;;  %v5259_v5 = vld [vmem:[%s7049_s11 + $0x7c8] ss:$16 sps:$4 sm:$0xff]  }
 0x509   : > { %3305 = vmatpush1.bf16.msra.mxu0 %v5178_v6  ;;  %v5264_v6 = vld [vmem:[%s7049_s11 + $0x7e4] ss:$16 sps:$4 sm:$0xff]  }
 0x50a   : > { %3469 = vmatpush1.bf16.msra.mxu1 %v5181_v7  ;;  %3306 = vmatprep.subr.bf16.mxu0 %v5186_v8  ;;  %v5267_v7 = vld [vmem:[%s7049_s11 + $0x7ec] ss:$16 sps:$4 sm:$0xff]   ;;  %v5262_v8 = vld [vmem:[%s7049_s11 + $0x7e0] ss:$16 sps:$4 sm:$0xff]  }
 0x50b   : > { %3470 = vmatprep.subr.bf16.mxu1 %v5189_v9  ;;  %v5265_v9 = vld [vmem:[%s7049_s11 + $0x7e8] ss:$16 sps:$4 sm:$0xff]  }
 0x50d   : > { %3307 = vmatpush1.bf16.msra.mxu0 %v5184_v10  ;;  %v1606_v10 = vmax.f32 %v1604_v60, %v1605_v3 }
 0x50e   : > { %3471 = vmatpush1.bf16.msra.mxu1 %v5187_v11  ;;  %3308 = vmatprep.subr.bf16.mxu0 %v5192_v12  ;;  %v5270_v11 = vld [vmem:[%s7051_s13 + $0x4] ss:$8 sps:$4 sm:$0xff]   ;;  %v5268_v12 = vld [vmem:[%s7051_s13] ss:$8 sps:$4 sm:$0xff]  }
 0x50f   : > { %3472 = vmatprep.subr.bf16.mxu1 %v5195_v13  ;;  %v1619_v13 = vpack.c.bf16 %v1606_v10, %v1606_v10 }
 0x511   : > { %3309 = vmatpush1.bf16.msra.mxu0 %v5190_v14  ;;  %v5273_v14 = vld [vmem:[%s7051_s13 + $0x14] ss:$8 sps:$4 sm:$0xff]  }
 0x512   : > { %3473 = vmatpush1.bf16.msra.mxu1 %v5193_v28  ;;  %3310 = vmatprep.subr.bf16.mxu0 %v5198_v16  ;;  %v5271_v28 = vld [vmem:[%s7051_s13 + $0x10] ss:$8 sps:$4 sm:$0xff]   ;;  %v5276_v16 = vld [vmem:[%s7051_s13 + $0x24] ss:$8 sps:$4 sm:$0xff]  }
 0x513   : > { %3474 = vmatprep.subr.bf16.mxu1 %v5201_v17  ;;  %v5274_v17 = vld [vmem:[%s7051_s13 + $0x20] ss:$8 sps:$4 sm:$0xff]  }
 0x515   : > { %3311 = vmatpush1.bf16.msra.mxu0 %v5196_v19  ;;  %v5279_v19 = vld [vmem:[%s7051_s13 + $0x34] ss:$8 sps:$4 sm:$0xff]  }
 0x516   : > { %3475 = vmatpush1.bf16.msra.mxu1 %v5199_v20  ;;  %3312 = vmatprep.subr.bf16.mxu0 %v5204_v21  ;;  %v5277_v20 = vld [vmem:[%s7051_s13 + $0x30] ss:$8 sps:$4 sm:$0xff]   ;;  %v5282_v21 = vld [vmem:[%s7051_s13 + $0x44] ss:$8 sps:$4 sm:$0xff]  }
 0x517   : > { %3476 = vmatprep.subr.bf16.mxu1 %v5207_v22  ;;  %v5280_v22 = vld [vmem:[%s7051_s13 + $0x40] ss:$8 sps:$4 sm:$0xff]  }
 0x519   : > { %3313 = vmatpush1.bf16.msra.mxu0 %v5202_v23  ;;  %v5285_v23 = vld [vmem:[%s7051_s13 + $0x54] ss:$8 sps:$4 sm:$0xff]  }
 0x51a   : > { %3477 = vmatpush1.bf16.msra.mxu1 %v5205_v24  ;;  %3314 = vmatprep.subr.bf16.mxu0 %v5210_v2  ;;  %v5283_v24 = vld [vmem:[%s7051_s13 + $0x50] ss:$8 sps:$4 sm:$0xff]   ;;  %v5288_v2 = vld [vmem:[%s7051_s13 + $0x64] ss:$8 sps:$4 sm:$0xff]  }
 0x51b   : > { %3478 = vmatprep.subr.bf16.mxu1 %v5213_v25  ;;  %v5286_v25 = vld [vmem:[%s7051_s13 + $0x60] ss:$8 sps:$4 sm:$0xff]  }
 0x51d   : > { %3315 = vmatpush1.bf16.msra.mxu0 %v5208_v27  ;;  %v5291_v27 = vld [vmem:[%s7051_s13 + $0x74] ss:$8 sps:$4 sm:$0xff]  }
 0x51e   : > { %3479 = vmatpush1.bf16.msra.mxu1 %v5211_v29  ;;  %3316 = vmatprep.subr.bf16.mxu0 %v5216_v30  ;;  %v5289_v29 = vld [vmem:[%s7051_s13 + $0x70] ss:$8 sps:$4 sm:$0xff]   ;;  %v5294_v30 = vld [vmem:[%s7051_s13 + $0x84] ss:$8 sps:$4 sm:$0xff]  }
 0x51f   : > { %3480 = vmatprep.subr.bf16.mxu1 %v5219_v31  ;;  %v5292_v31 = vld [vmem:[%s7051_s13 + $0x80] ss:$8 sps:$4 sm:$0xff]  }
 0x521   : > { %3317 = vmatpush1.bf16.msra.mxu0 %v5214_v32  ;;  %v5297_v32 = vld [vmem:[%s7051_s13 + $0x94] ss:$8 sps:$4 sm:$0xff]  }
 0x522   : > { %3481 = vmatpush1.bf16.msra.mxu1 %v5217_v33  ;;  %3318 = vmatprep.subr.bf16.mxu0 %v5222_v34  ;;  %v5295_v33 = vld [vmem:[%s7051_s13 + $0x90] ss:$8 sps:$4 sm:$0xff]   ;;  %v5300_v34 = vld [vmem:[%s7051_s13 + $0xa4] ss:$8 sps:$4 sm:$0xff]  }
 0x523   : > { %3482 = vmatprep.subr.bf16.mxu1 %v5225_v35  ;;  %v5298_v35 = vld [vmem:[%s7051_s13 + $0xa0] ss:$8 sps:$4 sm:$0xff]  }
 0x525   : > { %3319 = vmatpush1.bf16.msra.mxu0 %v5220_v26  ;;  %v5303_v26 = vld [vmem:[%s7051_s13 + $0xb4] ss:$8 sps:$4 sm:$0xff]  }
 0x526   : > { %3483 = vmatpush1.bf16.msra.mxu1 %v5223_v36  ;;  %3320 = vmatprep.subr.bf16.mxu0 %v5228_v37  ;;  %v5301_v36 = vld [vmem:[%s7051_s13 + $0xb0] ss:$8 sps:$4 sm:$0xff]   ;;  %v5306_v37 = vld [vmem:[%s7051_s13 + $0xc4] ss:$8 sps:$4 sm:$0xff]  }
 0x527   : > { %3484 = vmatprep.subr.bf16.mxu1 %v5231_v38  ;;  %v5304_v38 = vld [vmem:[%s7051_s13 + $0xc0] ss:$8 sps:$4 sm:$0xff]  }
 0x529   : > { %3321 = vmatpush1.bf16.msra.mxu0 %v5226_v18  ;;  %v5309_v18 = vld [vmem:[%s7051_s13 + $0xd4] ss:$8 sps:$4 sm:$0xff]  }
 0x52a   : > { %3485 = vmatpush1.bf16.msra.mxu1 %v5229_v39  ;;  %3322 = vmatprep.subr.bf16.mxu0 %v5234_v40  ;;  %v5307_v39 = vld [vmem:[%s7051_s13 + $0xd0] ss:$8 sps:$4 sm:$0xff]   ;;  %v5312_v40 = vld [vmem:[%s7051_s13 + $0xe4] ss:$8 sps:$4 sm:$0xff]  }
 0x52b   : > { %3486 = vmatprep.subr.bf16.mxu1 %v5237_v41  ;;  %v5310_v41 = vld [vmem:[%s7051_s13 + $0xe0] ss:$8 sps:$4 sm:$0xff]  }
 0x52d   : > { %3323 = vmatpush1.bf16.msra.mxu0 %v5232_v42  ;;  %v5315_v42 = vld [vmem:[%s7051_s13 + $0xf4] ss:$8 sps:$4 sm:$0xff]  }
 0x52e   : > { %3487 = vmatpush1.bf16.msra.mxu1 %v5235_v44  ;;  %3324 = vmatprep.subr.bf16.mxu0 %v5240_v45  ;;  %v5318_v44 = vld [vmem:[%s7051_s13 + $0x104] ss:$8 sps:$4 sm:$0xff]  }
 0x52f   : > { %3488 = vmatprep.subr.bf16.mxu1 %v5243_v46  ;;  %v5364_v45 = vld [vmem:[%s7053_s15 + $0x40] sm:$0xff]  }
 0x530   : > { %v5365_v46 = vld [vmem:[%s7053_s15] sm:$0xff]  }
 0x531   : > { %3325 = vmatpush1.bf16.msra.mxu0 %v5238_v47  ;;  %v5366_v47 = vld [vmem:[%s7053_s15 + $0x48] sm:$0xff]  }
 0x532   : > { %3489 = vmatpush1.bf16.msra.mxu1 %v5241_v49  ;;  %3326 = vmatprep.subr.bf16.mxu0 %v5246_v50  ;;  %v5368_v49 = vld [vmem:[%s7053_s15 + $0x50] sm:$0xff]  }
 0x533   : > { %3490 = vmatprep.subr.bf16.mxu1 %v5249_v52  ;;  %v5369_v50 = vld [vmem:[%s7053_s15 + $0x10] sm:$0xff]   ;;  %v5370_v52 = vld [vmem:[%s7053_s15 + $0x58] sm:$0xff]  }
 0x535   : > { %3327 = vmatpush1.bf16.msra.mxu0 %v5244_v15  ;;  %v5371_v15 = vld [vmem:[%s7053_s15 + $0x18] sm:$0xff]  }
 0x536   : > { %3491 = vmatpush1.bf16.msra.mxu1 %v5247_v56  ;;  %3328 = vmatprep.subr.bf16.mxu0 %v5252_v57  ;;  %v5373_v56 = vld [vmem:[%s7053_s15 + $0x20] sm:$0xff]   ;;  %v5374_v57 = vld [vmem:[%s7053_s15 + $0x68] sm:$0xff]  }
 0x537   : > { %3492 = vmatprep.subr.bf16.mxu1 %v5255_v58  ;;  %v5375_v58 = vld [vmem:[%s7053_s15 + $0x28] sm:$0xff]  }
 0x539   : > { %3329 = vmatpush1.bf16.msra.mxu0 %v5250_v59  ;;  %v6855_v59 = vld [vmem:[%s7050_s12] sm:$0xf] }
 0x53a   : > { %3493 = vmatpush1.bf16.msra.mxu1 %v5253_v61  ;;  %3330 = vmatprep.subr.bf16.mxu0 %v5258_v53  ;;  %v3162_v60 = vrot.slane %v6855_v59, %v6097_v0  ;;  %v3166_v61 = vrot.slane %v6855_v59, %v6106_v4  ;;  %v3174_v53 = vrot.slane %v6855_v59, %v988_v55  ;;  %v5316_v55 = vld [vmem:[%s7051_s13 + $0x100] ss:$8 sps:$4 sm:$0xff]  }
 0x53b   : > { %3494 = vmatprep.subr.bf16.mxu1 %v5261_v62 }
 0x53d   : > { %3331 = vmatpush1.bf16.msra.mxu0 %v5256_v1 }
 0x53e   : > { %3495 = vmatpush1.bf16.msra.mxu1 %v5259_v5  ;;  %3332 = vmatprep.subr.bf16.mxu0 %v5264_v6 }
 0x53f   : > { %3496 = vmatprep.subr.bf16.mxu1 %v5267_v7 }
 0x541   : > { %3333 = vmatpush1.bf16.msra.mxu0 %v5262_v8 }
 0x542   : > { %3497 = vmatpush1.bf16.msra.mxu1 %v5265_v9  ;;  %3911 = vmatprep.subr.bf16.mxu0 %v5270_v11 }
 0x543   : > { %4716 = vmatprep.subr.bf16.mxu1 %v5364_v45  ;;  %v3170_v45 = vrot.slane %v6855_v59, %v984_v51 }
 0x544   : > { %3335 = vmatmul.mubr.bf16.vlgmr.msra.gmra.mrb[8].mxu0 %v1619_v13 }
 0x545   : > { %3499 = vmatmul.mubr.bf16.vlgmr.msra.gmra.mrb[24].mxu1 %v1619_v13  ;;  %3912 = vmatpush1.bf16.msra.mxu0 %v5268_v12 }
 0x546   : > { %3913 = vmatprep.subr.bf16.mxu0 %v5273_v14  ;;  %4717 = vmatpush3.bf16.msra.mxu1 %v5365_v46  ;;  %v5360_v46 = vld [vmem:[%s7051_s13 + $0x1e4] ss:$8 sps:$4 sm:$0xff]  }
 0x547   : > { %4718 = vmatprep.subr.bf16.mxu1 %v5366_v47  ;;  %v5358_v47 = vld [vmem:[%s7051_s13 + $0x1e0] ss:$8 sps:$4 sm:$0xff]  }
 0x549   : > { %3914 = vmatpush1.bf16.msra.mxu0 %v5271_v28 }
 0x54a   : > { %3915 = vmatprep.subr.bf16.mxu0 %v5276_v16  ;;  %4719 = vmatpush3.bf16.msra.mxu1 %v5367_v48 }
 0x54b   : > { %4720 = vmatprep.subr.bf16.mxu1 %v5368_v49  ;;  %v5363_v49 = vld [vmem:[%s7051_s13 + $0x1f4] ss:$8 sps:$4 sm:$0xff]  }
 0x54d   : > { %3916 = vmatpush1.bf16.msra.mxu0 %v5274_v17 }
 0x54e   : > { %3917 = vmatprep.subr.bf16.mxu0 %v5279_v19  ;;  %4721 = vmatpush3.bf16.msra.mxu1 %v5369_v50  ;;  %v5321_v19 = vld [vmem:[%s7051_s13 + $0x114] ss:$8 sps:$4 sm:$0xff]  }
 0x54f   : > { %4722 = vmatprep.subr.bf16.mxu1 %v5370_v52  ;;  %v5376_v52 = vld [vmem:[%s7053_s15 + $0x70] sm:$0xff]  }
 0x551   : > { %3918 = vmatpush1.bf16.msra.mxu0 %v5277_v20 }
 0x552   : > { %3919 = vmatprep.subr.bf16.mxu0 %v5282_v21  ;;  %4723 = vmatpush3.bf16.msra.mxu1 %v5371_v15  ;;  %v5319_v21 = vld [vmem:[%s7051_s13 + $0x110] ss:$8 sps:$4 sm:$0xff]  }
 0x553   : > { %4724 = vmatprep.subr.bf16.mxu1 %v5372_v54  ;;  %v5377_v15 = vld [vmem:[%s7053_s15 + $0x30] sm:$0xff]   ;;  %v5378_v54 = vld [vmem:[%s7053_s15 + $0x78] sm:$0xff]  }
 0x555   : > { %3920 = vmatpush1.bf16.msra.mxu0 %v5280_v22  ;;  %v5324_v22 = vld [vmem:[%s7051_s13 + $0x124] ss:$8 sps:$4 sm:$0xff]  }
 0x556   : > { %3921 = vmatprep.subr.bf16.mxu0 %v5285_v23  ;;  %4725 = vmatpush3.bf16.msra.mxu1 %v5373_v56  ;;  %v5322_v23 = vld [vmem:[%s7051_s13 + $0x120] ss:$8 sps:$4 sm:$0xff]   ;;  %v5379_v56 = vld [vmem:[%s7053_s15 + $0x38] sm:$0xff]  }
 0x557   : > { %4726 = vmatprep.subr.bf16.mxu1 %v5374_v57  ;;  %v3579_v57 = vld [vmem:[%s7052_s14] sm:$0x3] }
 0x558   : > { %v3908_v59 = vrot.slane %v3579_v57, %v6106_v4 }
 0x559   : > { %3922 = vmatpush1.bf16.msra.mxu0 %v5283_v24  ;;  %v5327_v24 = vld [vmem:[%s7051_s13 + $0x134] ss:$8 sps:$4 sm:$0xff]  }
 0x55a   : > { %3923 = vmatprep.subr.bf16.mxu0 %v5288_v2  ;;  %4727 = vmatpush3.bf16.msra.mxu1 %v5375_v58  ;;  %v5325_v2 = vld [vmem:[%s7051_s13 + $0x130] ss:$8 sps:$4 sm:$0xff]   ;;  %v3904_v58 = vrot.slane %v3579_v57, %v6097_v0  ;;  %v4029_v0 = vld [vmem:[%s7054_s16] sm:$0x1] }
 0x55b   : > { %4728 = vmatprep.subr.bf16.mxu1 %v5376_v52 }
 0x55d   : > { %3924 = vmatpush1.bf16.msra.mxu0 %v5286_v25  ;;  %v5330_v25 = vld [vmem:[%s7051_s13 + $0x144] ss:$8 sps:$4 sm:$0xff]  }
 0x55e   : > { %3925 = vmatprep.subr.bf16.mxu0 %v5291_v27  ;;  %v5328_v27 = vld [vmem:[%s7051_s13 + $0x140] ss:$8 sps:$4 sm:$0xff]   ;;  %4729 = vmatpush3.bf16.msra.mxu1 %v5377_v15 }
 0x55f   : > { %4730 = vmatprep.subr.bf16.mxu1 %v5378_v54 }
 0x561   : > { %3926 = vmatpush1.bf16.msra.mxu0 %v5289_v29  ;;  %v5333_v29 = vld [vmem:[%s7051_s13 + $0x154] ss:$8 sps:$4 sm:$0xff]  }
 0x562   : > { %3927 = vmatprep.subr.bf16.mxu0 %v5294_v30  ;;  %v5331_v30 = vld [vmem:[%s7051_s13 + $0x150] ss:$8 sps:$4 sm:$0xff]   ;;  %4731 = vmatpush3.bf16.msra.mxu1 %v5379_v56 }
 0x565   : > { %3928 = vmatpush1.bf16.msra.mxu0 %v5292_v31  ;;  %v5336_v31 = vld [vmem:[%s7051_s13 + $0x164] ss:$8 sps:$4 sm:$0xff]  }
 0x566   : > { %3929 = vmatprep.subr.bf16.mxu0 %v5297_v32  ;;  %v5334_v32 = vld [vmem:[%s7051_s13 + $0x160] ss:$8 sps:$4 sm:$0xff]  }
 0x569   : > { %3930 = vmatpush1.bf16.msra.mxu0 %v5295_v33  ;;  %v5339_v33 = vld [vmem:[%s7051_s13 + $0x174] ss:$8 sps:$4 sm:$0xff]  }
 0x56a   : > { %3931 = vmatprep.subr.bf16.mxu0 %v5300_v34  ;;  %v5337_v34 = vld [vmem:[%s7051_s13 + $0x170] ss:$8 sps:$4 sm:$0xff]  }
 0x56d   : > { %3932 = vmatpush1.bf16.msra.mxu0 %v5298_v35  ;;  %v5342_v35 = vld [vmem:[%s7051_s13 + $0x184] ss:$8 sps:$4 sm:$0xff]  }
 0x56e   : > { %3933 = vmatprep.subr.bf16.mxu0 %v5303_v26  ;;  %v5340_v26 = vld [vmem:[%s7051_s13 + $0x180] ss:$8 sps:$4 sm:$0xff]  }
 0x571   : > { %3934 = vmatpush1.bf16.msra.mxu0 %v5301_v36  ;;  %v5345_v36 = vld [vmem:[%s7051_s13 + $0x194] ss:$8 sps:$4 sm:$0xff]  }
 0x572   : > { %3935 = vmatprep.subr.bf16.mxu0 %v5306_v37  ;;  %v5343_v37 = vld [vmem:[%s7051_s13 + $0x190] ss:$8 sps:$4 sm:$0xff]  }
 0x575   : > { %3936 = vmatpush1.bf16.msra.mxu0 %v5304_v38  ;;  %v5348_v38 = vld [vmem:[%s7051_s13 + $0x1a4] ss:$8 sps:$4 sm:$0xff]  }
 0x576   : > { %3937 = vmatprep.subr.bf16.mxu0 %v5309_v18  ;;  %v5346_v18 = vld [vmem:[%s7051_s13 + $0x1a0] ss:$8 sps:$4 sm:$0xff]  }
 0x579   : > { %3938 = vmatpush1.bf16.msra.mxu0 %v5307_v39  ;;  %v5351_v39 = vld [vmem:[%s7051_s13 + $0x1b4] ss:$8 sps:$4 sm:$0xff]  }
 0x57a   : > { %3939 = vmatprep.subr.bf16.mxu0 %v5312_v40  ;;  %v5349_v40 = vld [vmem:[%s7051_s13 + $0x1b0] ss:$8 sps:$4 sm:$0xff]  }
 0x57d   : > { %3940 = vmatpush1.bf16.msra.mxu0 %v5310_v41  ;;  %v5354_v41 = vld [vmem:[%s7051_s13 + $0x1c4] ss:$8 sps:$4 sm:$0xff]  }
 0x57e   : > { %3941 = vmatprep.subr.bf16.mxu0 %v5315_v42  ;;  %v5352_v42 = vld [vmem:[%s7051_s13 + $0x1c0] ss:$8 sps:$4 sm:$0xff]  }
 0x581   : > { %3942 = vmatpush1.bf16.msra.mxu0 %v5313_v43  ;;  %v5357_v43 = vld [vmem:[%s7051_s13 + $0x1d4] ss:$8 sps:$4 sm:$0xff]  }
 0x582   : > { %3952 = vmatprep.subr.bf16.mxu0 %v5318_v44  ;;  %v5355_v44 = vld [vmem:[%s7051_s13 + $0x1d0] ss:$8 sps:$4 sm:$0xff]  }
 0x617   : > { %v3336_v62 = vpop.f32.mrb[8].mxu0 }
 0x618   : > { %v4780_v1 = vadd.f32 %v3336_v62, %v3162_v60  ;;  %v6864_v3 = vpop.f32.mrb[24].mxu1  ;;  %v3338_v5 = vpop.f32.mrb[9].mxu0 }
 0x619   : > { %v4781_v6 = vadd.f32 %v3338_v5, %v3166_v61  ;;  %v3502_v7 = vpop.f32.mrb[25].mxu1  ;;  %v3340_v8 = vpop.f32.mrb[10].mxu0  ;;  %v4782_v48 = vadd.f32 %v6864_v3, %v3170_v45 }
 0x61a   : > { %v3507_v9 = vmax.f32 %v4780_v1, 0.0  ;;  %v4783_v10 = vadd.f32 %v3502_v7, %v3174_v53  ;;  %v3504_v11 = vpop.f32.mrb[26].mxu1  ;;  %v3341_v12 = vpop.f32.mrb[11].mxu0 }
 0x61b   : > { %v3508_v13 = vmax.f32 %v4781_v6, 0.0  ;;  %v3505_v14 = vpop.f32.mrb[27].mxu1  ;;  %v3509_v51 = vmax.f32 %v4782_v48, 0.0 }
 0x61c   : > { %v3510_v28 = vmax.f32 %v4783_v10, 0.0  ;;  %v3511_v17 = vpack.c.bf16 %v3507_v9, %v3507_v9 }
 0x61d   : > { %v3512_v16 = vpack.c.bf16 %v3508_v13, %v3508_v13  ;;  %v3513_v50 = vpack.c.bf16 %v3509_v51, %v3509_v51 }
 0x61e   : > { %v3514_v20 = vpack.c.bf16 %v3510_v28, %v3510_v28 }
 0x61f   : > { %3943 = vmatprep.mubr.bf16.mxu0 %v3512_v16 }
 0x620   : > { %3944 = vmatmul.mubr.bf16.vlgmr.msra.gmra.mrb[12].mxu0 %v3511_v17 }
 0x621   : > { %3953 = vmatpush1.bf16.msra.mxu0 %v5316_v55  ;;  %3984 = vmatprep.mubr.bf16.mxu0 %v3514_v20 }
 0x622   : > { %3954 = vmatprep.subr.bf16.mxu0 %v5321_v19 }
 0x625   : > { %3955 = vmatpush1.bf16.msra.mxu0 %v5319_v21 }
 0x626   : > { %3956 = vmatprep.subr.bf16.mxu0 %v5324_v22 }
 0x629   : > { %3957 = vmatpush1.bf16.msra.mxu0 %v5322_v23 }
 0x62a   : > { %3958 = vmatprep.subr.bf16.mxu0 %v5327_v24 }
 0x62d   : > { %3959 = vmatpush1.bf16.msra.mxu0 %v5325_v2 }
 0x62e   : > { %3960 = vmatprep.subr.bf16.mxu0 %v5330_v25 }
 0x631   : > { %3961 = vmatpush1.bf16.msra.mxu0 %v5328_v27 }
 0x632   : > { %3962 = vmatprep.subr.bf16.mxu0 %v5333_v29 }
 0x635   : > { %3963 = vmatpush1.bf16.msra.mxu0 %v5331_v30 }
 0x636   : > { %3964 = vmatprep.subr.bf16.mxu0 %v5336_v31 }
 0x639   : > { %3965 = vmatpush1.bf16.msra.mxu0 %v5334_v32 }
 0x63a   : > { %3966 = vmatprep.subr.bf16.mxu0 %v5339_v33 }
 0x63d   : > { %3967 = vmatpush1.bf16.msra.mxu0 %v5337_v34 }
 0x63e   : > { %3968 = vmatprep.subr.bf16.mxu0 %v5342_v35 }
 0x641   : > { %3969 = vmatpush1.bf16.msra.mxu0 %v5340_v26 }
 0x642   : > { %3970 = vmatprep.subr.bf16.mxu0 %v5345_v36 }
 0x645   : > { %3971 = vmatpush1.bf16.msra.mxu0 %v5343_v37 }
 0x646   : > { %3972 = vmatprep.subr.bf16.mxu0 %v5348_v38 }
 0x649   : > { %3973 = vmatpush1.bf16.msra.mxu0 %v5346_v18 }
 0x64a   : > { %3974 = vmatprep.subr.bf16.mxu0 %v5351_v39 }
 0x64d   : > { %3975 = vmatpush1.bf16.msra.mxu0 %v5349_v40 }
 0x64e   : > { %3976 = vmatprep.subr.bf16.mxu0 %v5354_v41 }
 0x651   : > { %3977 = vmatpush1.bf16.msra.mxu0 %v5352_v42 }
 0x652   : > { %3978 = vmatprep.subr.bf16.mxu0 %v5357_v43 }
 0x655   : > { %3979 = vmatpush1.bf16.msra.mxu0 %v5355_v44 }
 0x656   : > { %3980 = vmatprep.subr.bf16.mxu0 %v5360_v46 }
 0x659   : > { %3981 = vmatpush1.bf16.msra.mxu0 %v5358_v47 }
 0x65a   : > { %3982 = vmatprep.subr.bf16.mxu0 %v5363_v49 }
 0x65d   : > { %3983 = vmatpush1.bf16.msra.mxu0 %v5361_v63 }
 0x660   : > { %3985 = vmatmul.mubr.bf16.vlgmr.msra.gmra.mrb[12].mxu0 %v3513_v50 }
 0x733   : > { %v3986_v60 = vpop.f32.mrb[12].mxu0 }
 0x734   : > { %v4784_v61 = vadd.f32 %v3986_v60, %v3904_v58  ;;  %v3988_v53 = vpop.f32.mrb[13].mxu0 }
 0x735   : > { %v4785_v62 = vadd.f32 %v3988_v53, %v3908_v59  ;;  %v3990_v1 = vpop.f32.mrb[14].mxu0 }
 0x736   : > { %v3993_v3 = vmax.f32 %v4784_v61, 0.0  ;;  %v3991_v5 = vpop.f32.mrb[15].mxu0 }
 0x737   : > { %v3994_v6 = vmax.f32 %v4785_v62, 0.0 }
 0x738   : > { %v3995_v8 = vpack.c.bf16 %v3993_v3, %v3993_v3 }
 0x739   : > { %v3996_v7 = vpack.c.bf16 %v3994_v6, %v3994_v6 }
 0x73b   : > { %4158 = vmatprep.mubr.bf16.mxu1 %v3996_v7 }
 0x73c   : > { %4159 = vmatmul.mubr.bf16.vlgmr.msra.gmra.mrb[28].mxu1 %v3995_v8 }
 0x80f   : > { %v4732_v9 = vpop.f32.mrb[28].mxu1 }
 0x810   : > { %v4733_v10 = vpop.f32.mrb[29].mxu1 }
 0x811   : > { %v4734_v11 = vadd.f32 %v4733_v10, %v4732_v9  ;;  %v4735_v4 = vpop.f32.mrb[30].mxu1 }
 0x812   : > { %v4736_v12 = vpop.f32.mrb[31].mxu1 }
 0x813   : > { %v4161_v13 = vadd.f32 %v4734_v11, %v4029_v0 }
 0x815   : > { %v4167_v14 = vsel %vm4166_vm4, %v4161_v13, -inf }
 0x816   : > { %4168 = vmax.xlane.f32.xlu0 %v4167_v14 }
 0x8a3   : > { %v4169_v28 = vpop.xlane.xlu0 %4168 }
 0x8a4   : > { %v4170_v16 = vsub.f32 %v4161_v13, %v4169_v28 }
 0x8a6   : > { %v4171_v55 = vmul.f32 1.442695, %v4170_v16 }
 0x8a8   : > { %5380 = vpow2.f32 %v4171_v55 }
 0x8b2   : > { %v5381_v17 = vpop.eup %5380 }
 0x8b3   : > { %v4173_v19 = vsel %vm4166_vm4, %v5381_v17, 0.0 }
 0x8b4   : > { %4174 = vadd.xlane.f32.xlu0 %v4173_v19 }
 0x941   : > { %v4175_v20 = vpop.xlane.xlu0 %4174 }
 0x942   : > { %5382 = vlog2.f32 %v4175_v20 }
 0x94c   : > { %v5383_v21 = vpop.eup %5382 }
 0x94d   : > { %v4177_v22 = vmul.f32 0.6931472, %v5383_v21 }
 0x94f   : > { %v4178_v23 = vsub.f32 %v4170_v16, %v4177_v22 }
 0x951   : > { %4179 = vst.msk [vmem:[%s571_s28] sm:$0x1] %vm4166_vm4, %v4178_v23 }
 0x952   : > { %5397 = shalt.err (!%p5394_p6)
}
 0x953   : > { %s5398_s20 = scalar_lea.hbm %s6990_s21, 16  ;;  %s5402_s24 = scalar_lea.hbm %s7083_s1, 32 }
 0x954   : > { %p5399_p7 = scmp.ne.s32.totalorder %s6990_s21, %s5398_s20  ;;  %p5403_p11 = scmp.lt.u32.totalorder %s6990_s21, %s7083_s1 }
 0x955   : > { %p5404_p12 = scmp.lt.u32.totalorder %s5402_s24, %s5398_s20  ;;  %p5406_p0 = scmp.lt.u32.totalorder %s5398_s20, %s6990_s21 }
 0x956   : > { %p5400_p9 = pnand %p5399_p7, %p5598_p4 }
 0x957   : > { %p5405_p13 = por %p5404_p12, %p5403_p11 }
 0x958   : > { %p5401_p10 = pneg %p5400_p9 }
 0x959   : > { %p5407_p1 = por %p5406_p0, %p5405_p13 }
 0x95b   : > { %p5408_p2 = pnand %p5407_p1, %p5401_p10 }
 0x95d   : > { %5411 = shalt.err (!%p5408_p2)
}
 0x95e   : > { %4814 = dma.vmem_to_hbm [thread:$0]  (%p5598_p4), %s6992_s17, 16, %s6990_s21, %s4181_s22  }
 0x95f PF: > { %s7084_s23 = sld [smem:[#allocation9_spill]]  ;;  %s7085_s27 = sld [smem:[#allocation6_spill]] }
 0x965   : > { %p4820_p3 = scmp.ge.s32.totalorder %s7084_s23, 2  ;;  %s4205_s30 = sand.u32 1, %s7085_s27  }
 0x966   : > { %s4206_s18 = scalar_lea.sflag [#allocation4], %s4205_s30 }
 0x967   : > { %p4817_p5 = pnand %p4820_p3, %p5605_p8 }
 0x969   : > { %5437 = dma.done.wait (!%p4817_p5), %s4206_s18, 16  }
 0x96a   : > { %5439 = vsyncadd (!%p4817_p5), %s4206_s18, 4294967280  ;;  %s30_s29 = sadd.s32 1, %s7084_s23   ;;  %s7087_s20 = sld [smem:[#allocation7_spill]] }
 0x96b   : > { %p27_p6 = scmp.ge.s32.totalorder %s30_s29, 4   ;;  %s7088_s26 = sld [smem:[#allocation13_spill]] }
 0x96c   : > { %s7089_s27 = sld [smem:[#allocation8_spill]]  ;;  %s7090_s28 = sld [smem:[#allocation10_spill]] }
 0x96d   : > { %s7091_s24 = smov %s5446_s25  ;;  %29 = sbr.rel (!%p27_p6) target bundleno = 8 (0x8), region = 138 }
 0x970   : > { %s7092_s25 = smov %s7087_s20 }
 0x974   :  { %4210 = vsyncpa [#allocation4], 1 }
 0x975   :  { %4212 = vsyncpa [#allocation4 + $0x1], 1 }

</bundles_post_ra>
